<compile_context>
chip_gen: v7x
topology: tpu7x:2x2x1
jax: 0.10.0
libtpu: 0.0.40
codegen_flags: <defaults>
</compile_context>

<pallas_src>
import functools

import jax
import jax.numpy as jnp
from jax.experimental import pallas as pl
from jax.experimental.pallas import tpu as pltpu


def _leaky(x, slope):
    return jnp.where(x >= 0.0, x, slope * x)


# -----------------------------------------------------------------------------
# Single fused kernel: one grid step per batch element, everything stays in VMEM.
# -----------------------------------------------------------------------------
def _up_fused_kernel(xp_ref, skip_ref, wsub_ref, bt_ref, gamma_ref, beta_ref,
                     a_ref, at_ref, w1a_ref, w1b_ref, b1_ref, w2_ref, b2_ref,
                     w3_ref, b3_ref, o_ref, hpad_ref, *, H, W, cpg, eps, slope):
    Cin = xp_ref.shape[-1]
    m = w2_ref.shape[-1]
    HW = H * W

    # ---- 9 shared shifted views of the 1-px-padded input (static slices) ----
    shifts = [[xp_ref[0, ry:ry + H, rx:rx + W, :].astype(jnp.float32)
               for rx in range(3)] for ry in range(3)]

    # ---- sub-pixel transposed conv: one K=4*Cin GEMM per output-pixel parity ----
    xups = []
    for a in (0, 1):
        for b in (0, 1):
            patch = jnp.concatenate(
                [shifts[a + dy][b + dx] for dy in (0, 1) for dx in (0, 1)],
                axis=-1).reshape(HW, 4 * Cin)
            xups.append(jnp.dot(patch, wsub_ref[2 * a + b],
                                preferred_element_type=jnp.float32))
    # bias hoisted out of the parity loop: single broadcast + add
    xall = jnp.concatenate(xups, axis=0) + bt_ref[...].astype(jnp.float32)  # (4HW, Cin)

    # ---- GroupNorm over all spatial positions of this batch element ----
    inv_count = 1.0 / (4.0 * HW * cpg)
    s = jnp.sum(xall, axis=0, keepdims=True)                    # (1, Cin)
    ss = jnp.sum(xall * xall, axis=0, keepdims=True)            # (1, Cin)
    if cpg == 1:
        # G == Cin: group pooling is identity -> skip the one-hot matmuls entirely.
        mean_c = s * inv_count
        ex2_c = ss * inv_count
    else:
        A = a_ref[...].astype(jnp.float32)                      # (Cin, G) one-hot
        AT = at_ref[...].astype(jnp.float32)                    # (G, Cin)
        mean_c = jnp.dot(jnp.dot(s, A, preferred_element_type=jnp.float32) * inv_count,
                         AT, preferred_element_type=jnp.float32)
        ex2_c = jnp.dot(jnp.dot(ss, A, preferred_element_type=jnp.float32) * inv_count,
                        AT, preferred_element_type=jnp.float32)
    var_c = ex2_c - mean_c * mean_c
    inv_c = jax.lax.rsqrt(var_c + eps)
    scale_c = inv_c * gamma_ref[...].astype(jnp.float32)
    shift_c = beta_ref[...].astype(jnp.float32) - mean_c * scale_c
    y = _leaky(xall * scale_c + shift_c, slope)                 # (4HW, Cin)

    # ---- conv1 (1x1): channel concat with skip folded into two K-slices ----
    sk = skip_ref[0].reshape(4 * HW, Cin).astype(jnp.float32)
    h = (jnp.dot(y, w1a_ref[...], preferred_element_type=jnp.float32)
         + jnp.dot(sk, w1b_ref[...], preferred_element_type=jnp.float32)
         + b1_ref[...].astype(jnp.float32))
    h = _leaky(h, slope)

    # ---- conv2 (1x1) ----
    h = (jnp.dot(h, w2_ref[...], preferred_element_type=jnp.float32)
         + b2_ref[...].astype(jnp.float32))
    h = _leaky(h, slope)                                        # (4HW, m)

    # ---- stage conv2 output into zero-padded per-parity planes (VMEM scratch) ----
    # (zeroed every grid step: with a "parallel" grid each core owns its own scratch)
    hpad_ref[...] = jnp.zeros_like(hpad_ref)
    for p in range(4):
        hpad_ref[p, 1:H + 1, 1:W + 1, :] = (
            h[p * HW:(p + 1) * HW, :].reshape(H, W, m).astype(hpad_ref.dtype))

    # ---- conv3 (3x3, pad=1) computed in parity space: tap (dy,dx) of output parity
    # (a,b) reads input parity ((a+dy)%2,(b+dx)%2) at spatial offset ((a+dy)//2,(b+dx)//2)
    patches = []
    for a in (0, 1):
        for b in (0, 1):
            taps = []
            for dy in (-1, 0, 1):
                for dx in (-1, 0, 1):
                    pa, oy = (a + dy) % 2, (a + dy) // 2
                    pb, ox = (b + dx) % 2, (b + dx) // 2
                    taps.append(hpad_ref[2 * pa + pb,
                                         1 + oy:1 + oy + H,
                                         1 + ox:1 + ox + W, :].astype(jnp.float32))
            patches.append(jnp.concatenate(taps, axis=-1).reshape(HW, 9 * m))
    patch = jnp.concatenate(patches, axis=0)                    # (4HW, 9m)
    out = jnp.dot(patch, w3_ref[...], preferred_element_type=jnp.float32)
    out = _leaky(out + b3_ref[...].astype(jnp.float32), slope)  # (4HW, out_ch)

    # lane-dense channel-major store: (out_ch, 4*H*W) -> 256 unmasked lanes
    o_ref[0] = jnp.transpose(out).astype(o_ref.dtype)


# -----------------------------------------------------------------------------
# Wrapper
# -----------------------------------------------------------------------------
def up_forward_pallas(x, x_skip, params, *, num_groups=32, slope=0.2, eps=1e-5):
    """Forward pass of `up` (ConvBlock='ResConvBlock', Res_bool=False). NCHW in/out."""
    N, Cin, H, W = x.shape
    OH, OW = 2 * H, 2 * W
    m_ch = params["w1"].shape[0]
    out_ch = params["w3"].shape[0]
    dt = x.dtype
    G = num_groups
    cpg = Cin // G

    # ---- layout glue (small, data movement only) ----
    xn = jnp.transpose(x, (0, 2, 3, 1))                                  # NHWC
    xpad = jnp.pad(xn, ((0, 0), (1, 1), (1, 1), (0, 0)))                 # 1-px halo
    # skip: NCHW -> output-pixel-parity layout (N, 4, H*W, Cin), parity = 2*a + b
    skip_par = (x_skip.reshape(N, Cin, H, 2, W, 2)
                .transpose(0, 3, 5, 2, 4, 1)
                .reshape(N, 4, H * W, Cin)).astype(dt)

    # ---- weights in matmul form (constant-folded under jit) ----
    # torch ConvTranspose weight (Cin, Cout, 4, 4): equivalent forward-conv kernel is
    # flip(wt); tap (ky,kx) of output parity (a,b) is ky = 2*dy + a, kx = 2*dx + b with
    # patch row order (dy, dx, cin).
    wt_flip = jnp.flip(params["wt"], axis=(2, 3))                        # (cin,cout,ky,kx)
    w_sub = (wt_flip.reshape(Cin, Cin, 2, 2, 2, 2)                       # (cin,cout,dy,a,dx,b)
             .transpose(3, 5, 2, 4, 0, 1)                                # (a,b,dy,dx,cin,cout)
             .reshape(4, 4 * Cin, Cin)).astype(dt)

    w1 = params["w1"].reshape(m_ch, 2 * Cin)
    w1a = jnp.transpose(w1[:, :Cin]).astype(dt)                          # x_up slice
    w1b = jnp.transpose(w1[:, Cin:]).astype(dt)                          # skip slice
    w2m = jnp.transpose(params["w2"].reshape(m_ch, m_ch)).astype(dt)
    w3m = jnp.transpose(params["w3"], (2, 3, 1, 0)).reshape(9 * m_ch, out_ch).astype(dt)

    A = (jnp.arange(Cin)[:, None] // cpg == jnp.arange(G)[None, :]).astype(dt)
    AT = jnp.transpose(A)

    kern = functools.partial(_up_fused_kernel, H=H, W=W, cpg=cpg, eps=eps, slope=slope)
    out_par = pl.pallas_call(
        kern,
        out_shape=jax.ShapeDtypeStruct((N, out_ch, 4 * H * W), dt),
        grid_spec=pltpu.PrefetchScalarGridSpec(
            num_scalar_prefetch=0,
            grid=(N,),
            in_specs=[
                pl.BlockSpec((1, H + 2, W + 2, Cin), lambda n: (n, 0, 0, 0)),
                pl.BlockSpec((1, 4, H * W, Cin), lambda n: (n, 0, 0, 0)),
                pl.BlockSpec((4, 4 * Cin, Cin), lambda n: (0, 0, 0)),
                pl.BlockSpec((1, Cin), lambda n: (0, 0)),
                pl.BlockSpec((1, Cin), lambda n: (0, 0)),
                pl.BlockSpec((1, Cin), lambda n: (0, 0)),
                pl.BlockSpec((Cin, G), lambda n: (0, 0)),
                pl.BlockSpec((G, Cin), lambda n: (0, 0)),
                pl.BlockSpec((Cin, m_ch), lambda n: (0, 0)),
                pl.BlockSpec((Cin, m_ch), lambda n: (0, 0)),
                pl.BlockSpec((1, m_ch), lambda n: (0, 0)),
                pl.BlockSpec((m_ch, m_ch), lambda n: (0, 0)),
                pl.BlockSpec((1, m_ch), lambda n: (0, 0)),
                pl.BlockSpec((9 * m_ch, out_ch), lambda n: (0, 0)),
                pl.BlockSpec((1, out_ch), lambda n: (0, 0)),
            ],
            out_specs=pl.BlockSpec((1, out_ch, 4 * H * W), lambda n: (n, 0, 0)),
            scratch_shapes=[pltpu.VMEM((4, H + 2, W + 2, m_ch), jnp.float32)],
        ),
        compiler_params=pltpu.CompilerParams(dimension_semantics=("parallel",)),
    )(xpad, skip_par, w_sub,
      params["bt"].reshape(1, Cin).astype(dt),
      params["gamma"].reshape(1, Cin).astype(dt),
      params["beta"].reshape(1, Cin).astype(dt),
      A, AT, w1a, w1b,
      params["b1"].reshape(1, m_ch).astype(dt),
      w2m,
      params["b2"].reshape(1, m_ch).astype(dt),
      w3m,
      params["b3"].reshape(1, out_ch).astype(dt))

    # parity-major (a, b, h, w) -> NCHW spatial interleave (tiny, smallest tensor)
    out = (out_par.reshape(N, out_ch, 2, 2, H, W)
           .transpose(0, 1, 4, 2, 5, 3)
           .reshape(N, out_ch, OH, OW))
    return out


# -----------------------------------------------------------------------------
# Pure-JAX reference (for verification)
# -----------------------------------------------------------------------------
def up_forward_ref(x, x_skip, p, *, num_groups=32, slope=0.2, eps=1e-5):
    hp = jax.lax.Precision.HIGHEST
    w_conv = jnp.transpose(jnp.flip(p["wt"], axis=(2, 3)), (1, 0, 2, 3))  # OIHW
    y = jax.lax.conv_general_dilated(
        x, w_conv, window_strides=(1, 1), padding=((2, 2), (2, 2)),
        lhs_dilation=(2, 2), dimension_numbers=("NCHW", "OIHW", "NCHW"), precision=hp)
    y = y + p["bt"][None, :, None, None]
    N, C, H, W = y.shape
    cpg = C // num_groups
    yr = y.reshape(N, num_groups, cpg * H * W)
    mean = yr.mean(axis=2, keepdims=True)
    var = yr.var(axis=2, keepdims=True)
    yn = ((yr - mean) / jnp.sqrt(var + eps)).reshape(N, C, H, W)
    yn = yn * p["gamma"][None, :, None, None] + p["beta"][None, :, None, None]
    yn = jnp.where(yn >= 0, yn, slope * yn)
    Fx = jnp.concatenate([yn, x_skip], axis=1)

    def conv(v, w, b, pad):
        o = jax.lax.conv_general_dilated(
            v, w, (1, 1), ((pad, pad), (pad, pad)),
            dimension_numbers=("NCHW", "OIHW", "NCHW"), precision=hp)
        return o + b[None, :, None, None]

    h = conv(Fx, p["w1"], p["b1"], 0); h = jnp.where(h >= 0, h, slope * h)
    h = conv(h, p["w2"], p["b2"], 0); h = jnp.where(h >= 0, h, slope * h)
    h = conv(h, p["w3"], p["b3"], 1); h = jnp.where(h >= 0, h, slope * h)
    return h


# -----------------------------------------------------------------------------
# Main
# -----------------------------------------------------------------------------
if __name__ == "__main__":
    # up(in_ch=32, m_ch=16, out_ch=8, ConvBlock='ResConvBlock')
    in_ch, m_ch, out_ch = 32, 16, 8           # in_ch must be divisible by 32 (GroupNorm)
    N, H, W = 2, 8, 8

    key = jax.random.PRNGKey(0)
    ks = jax.random.split(key, 12)
    f32 = jnp.float32
    params = {
        # ConvTranspose2d(in_ch, in_ch, 4, 2, 1): weight (Cin, Cout, 4, 4)
        "wt": (0.05 * jax.random.normal(ks[0], (in_ch, in_ch, 4, 4))).astype(f32),
        "bt": (0.05 * jax.random.normal(ks[1], (in_ch,))).astype(f32),
        # GroupNorm(32, in_ch)
        "gamma": (1.0 + 0.1 * jax.random.normal(ks[2], (in_ch,))).astype(f32),
        "beta": (0.1 * jax.random.normal(ks[3], (in_ch,))).astype(f32),
        # ResConvBlock(out_ch, m_ch, 2*in_ch, Res_bool=False)
        "w1": (0.05 * jax.random.normal(ks[4], (m_ch, 2 * in_ch, 1, 1))).astype(f32),
        "b1": (0.05 * jax.random.normal(ks[5], (m_ch,))).astype(f32),
        "w2": (0.05 * jax.random.normal(ks[6], (m_ch, m_ch, 1, 1))).astype(f32),
        "b2": (0.05 * jax.random.normal(ks[7], (m_ch,))).astype(f32),
        "w3": (0.05 * jax.random.normal(ks[8], (out_ch, m_ch, 3, 3))).astype(f32),
        "b3": (0.05 * jax.random.normal(ks[9], (out_ch,))).astype(f32),
        # TODO(synk): cnn_skip of ResConvBlock is dead code for Res_bool=False; not instantiated.
    }

    x = jax.random.normal(ks[10], (N, in_ch, H, W), dtype=f32)
    x_skip = jax.random.normal(ks[11], (N, in_ch, 2 * H, 2 * W), dtype=f32)

    fwd = jax.jit(lambda a, b: up_forward_pallas(a, b, params))
    out = fwd(x, x_skip)
    jax.block_until_ready(out)

    ref = up_forward_ref(x, x_skip, params)
    jax.block_until_ready(ref)

    assert out.shape == (N, out_ch, 2 * H, 2 * W), out.shape
    assert bool(jnp.all(jnp.isfinite(out)))
    max_err = float(jnp.max(jnp.abs(out - ref)))
    assert max_err < 2e-3, f"max abs error vs reference: {max_err}"

    print("KERNEL_OK")
</pallas_src>

<mosaic_0001>
module attributes {stable_mosaic.version = 11 : i64} {
  func.func @_up_fused_kernel(%arg0: i32, %arg1: memref<1x10x10x32xf32, #tpu.memory_space<vmem>>, %arg2: memref<1x4x64x32xf32, #tpu.memory_space<vmem>>, %arg3: memref<4x128x32xf32, #tpu.memory_space<vmem>>, %arg4: memref<1x32xf32, #tpu.memory_space<vmem>>, %arg5: memref<1x32xf32, #tpu.memory_space<vmem>>, %arg6: memref<1x32xf32, #tpu.memory_space<vmem>>, %arg7: memref<32x32xf32, #tpu.memory_space<vmem>>, %arg8: memref<32x32xf32, #tpu.memory_space<vmem>>, %arg9: memref<32x16xf32, #tpu.memory_space<vmem>>, %arg10: memref<32x16xf32, #tpu.memory_space<vmem>>, %arg11: memref<1x16xf32, #tpu.memory_space<vmem>>, %arg12: memref<16x16xf32, #tpu.memory_space<vmem>>, %arg13: memref<1x16xf32, #tpu.memory_space<vmem>>, %arg14: memref<144x8xf32, #tpu.memory_space<vmem>>, %arg15: memref<1x8xf32, #tpu.memory_space<vmem>>, %arg16: memref<1x8x256xf32, #tpu.memory_space<vmem>>, %arg17: memref<4x10x10x16xf32, #tpu.memory_space<vmem>>) attributes {dimension_semantics = [#tpu.dimension_semantics<parallel>], iteration_bounds = array<i64: 2>, scalar_prefetch = 0 : i64, scratch_operands = 1 : i64, tpu.core_type = #tpu.core_type<tc>, window_params = [{transform_indices = @transform_0, window_bounds = array<i64: 1, 10, 10, 32>}, {transform_indices = @transform_1, window_bounds = array<i64: 1, 4, 64, 32>}, {pipeline_mode = #tpu.pipeline_mode<synchronous>, transform_indices = @transform_2, window_bounds = array<i64: 4, 128, 32>}, {pipeline_mode = #tpu.pipeline_mode<synchronous>, transform_indices = @transform_3, window_bounds = array<i64: 1, 32>}, {pipeline_mode = #tpu.pipeline_mode<synchronous>, transform_indices = @transform_4, window_bounds = array<i64: 1, 32>}, {pipeline_mode = #tpu.pipeline_mode<synchronous>, transform_indices = @transform_5, window_bounds = array<i64: 1, 32>}, {pipeline_mode = #tpu.pipeline_mode<synchronous>, transform_indices = @transform_6, window_bounds = array<i64: 32, 32>}, {pipeline_mode = #tpu.pipeline_mode<synchronous>, transform_indices = @transform_7, window_bounds = array<i64: 32, 32>}, {pipeline_mode = #tpu.pipeline_mode<synchronous>, transform_indices = @transform_8, window_bounds = array<i64: 32, 16>}, {pipeline_mode = #tpu.pipeline_mode<synchronous>, transform_indices = @transform_9, window_bounds = array<i64: 32, 16>}, {pipeline_mode = #tpu.pipeline_mode<synchronous>, transform_indices = @transform_10, window_bounds = array<i64: 1, 16>}, {pipeline_mode = #tpu.pipeline_mode<synchronous>, transform_indices = @transform_11, window_bounds = array<i64: 16, 16>}, {pipeline_mode = #tpu.pipeline_mode<synchronous>, transform_indices = @transform_12, window_bounds = array<i64: 1, 16>}, {pipeline_mode = #tpu.pipeline_mode<synchronous>, transform_indices = @transform_13, window_bounds = array<i64: 144, 8>}, {pipeline_mode = #tpu.pipeline_mode<synchronous>, transform_indices = @transform_14, window_bounds = array<i64: 1, 8>}, {transform_indices = @transform_15, window_bounds = array<i64: 1, 8, 256>}]} {
    %c0 = arith.constant 0 : index
    %c0_0 = arith.constant 0 : index
    %c0_1 = arith.constant 0 : index
    %c0_2 = arith.constant 0 : index
    %0 = vector.load %arg1[%c0, %c0_0, %c0_1, %c0_2] : memref<1x10x10x32xf32, #tpu.memory_space<vmem>>, vector<1x8x8x32xf32>
    %1 = vector.shape_cast %0 : vector<1x8x8x32xf32> to vector<8x8x32xf32>
    %c0_3 = arith.constant 0 : index
    %c0_4 = arith.constant 0 : index
    %c1 = arith.constant 1 : index
    %c0_5 = arith.constant 0 : index
    %2 = vector.load %arg1[%c0_3, %c0_4, %c1, %c0_5] : memref<1x10x10x32xf32, #tpu.memory_space<vmem>>, vector<1x8x8x32xf32>
    %3 = vector.shape_cast %2 : vector<1x8x8x32xf32> to vector<8x8x32xf32>
    %c0_6 = arith.constant 0 : index
    %c0_7 = arith.constant 0 : index
    %c2 = arith.constant 2 : index
    %c0_8 = arith.constant 0 : index
    %4 = vector.load %arg1[%c0_6, %c0_7, %c2, %c0_8] : memref<1x10x10x32xf32, #tpu.memory_space<vmem>>, vector<1x8x8x32xf32>
    %5 = vector.shape_cast %4 : vector<1x8x8x32xf32> to vector<8x8x32xf32>
    %c0_9 = arith.constant 0 : index
    %c1_10 = arith.constant 1 : index
    %c0_11 = arith.constant 0 : index
    %c0_12 = arith.constant 0 : index
    %6 = vector.load %arg1[%c0_9, %c1_10, %c0_11, %c0_12] : memref<1x10x10x32xf32, #tpu.memory_space<vmem>>, vector<1x8x8x32xf32>
    %7 = vector.shape_cast %6 : vector<1x8x8x32xf32> to vector<8x8x32xf32>
    %c0_13 = arith.constant 0 : index
    %c1_14 = arith.constant 1 : index
    %c1_15 = arith.constant 1 : index
    %c0_16 = arith.constant 0 : index
    %8 = vector.load %arg1[%c0_13, %c1_14, %c1_15, %c0_16] : memref<1x10x10x32xf32, #tpu.memory_space<vmem>>, vector<1x8x8x32xf32>
    %9 = vector.shape_cast %8 : vector<1x8x8x32xf32> to vector<8x8x32xf32>
    %c0_17 = arith.constant 0 : index
    %c1_18 = arith.constant 1 : index
    %c2_19 = arith.constant 2 : index
    %c0_20 = arith.constant 0 : index
    %10 = vector.load %arg1[%c0_17, %c1_18, %c2_19, %c0_20] : memref<1x10x10x32xf32, #tpu.memory_space<vmem>>, vector<1x8x8x32xf32>
    %11 = vector.shape_cast %10 : vector<1x8x8x32xf32> to vector<8x8x32xf32>
    %c0_21 = arith.constant 0 : index
    %c2_22 = arith.constant 2 : index
    %c0_23 = arith.constant 0 : index
    %c0_24 = arith.constant 0 : index
    %12 = vector.load %arg1[%c0_21, %c2_22, %c0_23, %c0_24] : memref<1x10x10x32xf32, #tpu.memory_space<vmem>>, vector<1x8x8x32xf32>
    %13 = vector.shape_cast %12 : vector<1x8x8x32xf32> to vector<8x8x32xf32>
    %c0_25 = arith.constant 0 : index
    %c2_26 = arith.constant 2 : index
    %c1_27 = arith.constant 1 : index
    %c0_28 = arith.constant 0 : index
    %14 = vector.load %arg1[%c0_25, %c2_26, %c1_27, %c0_28] : memref<1x10x10x32xf32, #tpu.memory_space<vmem>>, vector<1x8x8x32xf32>
    %15 = vector.shape_cast %14 : vector<1x8x8x32xf32> to vector<8x8x32xf32>
    %c0_29 = arith.constant 0 : index
    %c2_30 = arith.constant 2 : index
    %c2_31 = arith.constant 2 : index
    %c0_32 = arith.constant 0 : index
    %16 = vector.load %arg1[%c0_29, %c2_30, %c2_31, %c0_32] : memref<1x10x10x32xf32, #tpu.memory_space<vmem>>, vector<1x8x8x32xf32>
    %17 = vector.shape_cast %16 : vector<1x8x8x32xf32> to vector<8x8x32xf32>
    %18 = tpu.concatenate %1, %3, %7, %9 in 2 : vector<8x8x32xf32>, vector<8x8x32xf32>, vector<8x8x32xf32>, vector<8x8x32xf32> -> vector<8x8x128xf32>
    %19 = vector.shape_cast %18 : vector<8x8x128xf32> to vector<64x128xf32>
    %c0_33 = arith.constant 0 : index
    %c0_34 = arith.constant 0 : index
    %c0_35 = arith.constant 0 : index
    %20 = vector.load %arg3[%c0_33, %c0_34, %c0_35] : memref<4x128x32xf32, #tpu.memory_space<vmem>>, vector<1x128x32xf32>
    %21 = vector.shape_cast %20 : vector<1x128x32xf32> to vector<128x32xf32>
    %cst = arith.constant dense<0.000000e+00> : vector<64x32xf32>
    %22 = tpu.matmul %19, %21, %cst {dimension_numbers = #tpu.dot_dimension_numbers<[1], [0], [0], [1], [0, 0, 1, 1], [], []>} : vector<64x128xf32>, vector<128x32xf32>, vector<64x32xf32> -> vector<64x32xf32>
    %23 = tpu.concatenate %3, %5, %9, %11 in 2 : vector<8x8x32xf32>, vector<8x8x32xf32>, vector<8x8x32xf32>, vector<8x8x32xf32> -> vector<8x8x128xf32>
    %24 = vector.shape_cast %23 : vector<8x8x128xf32> to vector<64x128xf32>
    %c1_36 = arith.constant 1 : index
    %c0_37 = arith.constant 0 : index
    %c0_38 = arith.constant 0 : index
    %25 = vector.load %arg3[%c1_36, %c0_37, %c0_38] : memref<4x128x32xf32, #tpu.memory_space<vmem>>, vector<1x128x32xf32>
    %26 = vector.shape_cast %25 : vector<1x128x32xf32> to vector<128x32xf32>
    %cst_39 = arith.constant dense<0.000000e+00> : vector<64x32xf32>
    %27 = tpu.matmul %24, %26, %cst_39 {dimension_numbers = #tpu.dot_dimension_numbers<[1], [0], [0], [1], [0, 0, 1, 1], [], []>} : vector<64x128xf32>, vector<128x32xf32>, vector<64x32xf32> -> vector<64x32xf32>
    %28 = tpu.concatenate %7, %9, %13, %15 in 2 : vector<8x8x32xf32>, vector<8x8x32xf32>, vector<8x8x32xf32>, vector<8x8x32xf32> -> vector<8x8x128xf32>
    %29 = vector.shape_cast %28 : vector<8x8x128xf32> to vector<64x128xf32>
    %c2_40 = arith.constant 2 : index
    %c0_41 = arith.constant 0 : index
    %c0_42 = arith.constant 0 : index
    %30 = vector.load %arg3[%c2_40, %c0_41, %c0_42] : memref<4x128x32xf32, #tpu.memory_space<vmem>>, vector<1x128x32xf32>
    %31 = vector.shape_cast %30 : vector<1x128x32xf32> to vector<128x32xf32>
    %cst_43 = arith.constant dense<0.000000e+00> : vector<64x32xf32>
    %32 = tpu.matmul %29, %31, %cst_43 {dimension_numbers = #tpu.dot_dimension_numbers<[1], [0], [0], [1], [0, 0, 1, 1], [], []>} : vector<64x128xf32>, vector<128x32xf32>, vector<64x32xf32> -> vector<64x32xf32>
    %33 = tpu.concatenate %9, %11, %15, %17 in 2 : vector<8x8x32xf32>, vector<8x8x32xf32>, vector<8x8x32xf32>, vector<8x8x32xf32> -> vector<8x8x128xf32>
    %34 = vector.shape_cast %33 : vector<8x8x128xf32> to vector<64x128xf32>
    %c3 = arith.constant 3 : index
    %c0_44 = arith.constant 0 : index
    %c0_45 = arith.constant 0 : index
    %35 = vector.load %arg3[%c3, %c0_44, %c0_45] : memref<4x128x32xf32, #tpu.memory_space<vmem>>, vector<1x128x32xf32>
    %36 = vector.shape_cast %35 : vector<1x128x32xf32> to vector<128x32xf32>
    %cst_46 = arith.constant dense<0.000000e+00> : vector<64x32xf32>
    %37 = tpu.matmul %34, %36, %cst_46 {dimension_numbers = #tpu.dot_dimension_numbers<[1], [0], [0], [1], [0, 0, 1, 1], [], []>} : vector<64x128xf32>, vector<128x32xf32>, vector<64x32xf32> -> vector<64x32xf32>
    %38 = tpu.concatenate %22, %27, %32, %37 in 0 : vector<64x32xf32>, vector<64x32xf32>, vector<64x32xf32>, vector<64x32xf32> -> vector<256x32xf32>
    %c0_47 = arith.constant 0 : index
    %c0_48 = arith.constant 0 : index
    %39 = vector.load %arg4[%c0_47, %c0_48] : memref<1x32xf32, #tpu.memory_space<vmem>>, vector<1x32xf32>
    %40 = vector.broadcast %39 : vector<1x32xf32> to vector<256x32xf32>
    %41 = arith.addf %38, %40 : vector<256x32xf32>
    %cst_49 = arith.constant dense<0.000000e+00> : vector<32xf32>
    %42 = vector.multi_reduction <add>, %41, %cst_49 [0] : vector<256x32xf32> to vector<32xf32>
    %43 = vector.shape_cast %42 : vector<32xf32> to vector<1x32xf32>
    %44 = arith.mulf %41, %41 : vector<256x32xf32>
    %cst_50 = arith.constant dense<0.000000e+00> : vector<32xf32>
    %45 = vector.multi_reduction <add>, %44, %cst_50 [0] : vector<256x32xf32> to vector<32xf32>
    %46 = vector.shape_cast %45 : vector<32xf32> to vector<1x32xf32>
    %cst_51 = arith.constant 3.906250e-03 : f32
    %47 = vector.broadcast %cst_51 : f32 to vector<1x32xf32>
    %48 = arith.mulf %43, %47 : vector<1x32xf32>
    %cst_52 = arith.constant 3.906250e-03 : f32
    %49 = vector.broadcast %cst_52 : f32 to vector<1x32xf32>
    %50 = arith.mulf %46, %49 : vector<1x32xf32>
    %51 = arith.mulf %48, %48 : vector<1x32xf32>
    %52 = arith.subf %50, %51 : vector<1x32xf32>
    %cst_53 = arith.constant 9.99999974E-6 : f32
    %53 = vector.broadcast %cst_53 : f32 to vector<1x32xf32>
    %54 = arith.addf %52, %53 : vector<1x32xf32>
    %55 = math.rsqrt %54 : vector<1x32xf32>
    %c0_54 = arith.constant 0 : index
    %c0_55 = arith.constant 0 : index
    %56 = vector.load %arg5[%c0_54, %c0_55] : memref<1x32xf32, #tpu.memory_space<vmem>>, vector<1x32xf32>
    %57 = arith.mulf %55, %56 : vector<1x32xf32>
    %c0_56 = arith.constant 0 : index
    %c0_57 = arith.constant 0 : index
    %58 = vector.load %arg6[%c0_56, %c0_57] : memref<1x32xf32, #tpu.memory_space<vmem>>, vector<1x32xf32>
    %59 = arith.mulf %48, %57 : vector<1x32xf32>
    %60 = arith.subf %58, %59 : vector<1x32xf32>
    %61 = vector.broadcast %57 : vector<1x32xf32> to vector<256x32xf32>
    %62 = arith.mulf %41, %61 : vector<256x32xf32>
    %63 = vector.broadcast %60 : vector<1x32xf32> to vector<256x32xf32>
    %64 = arith.addf %62, %63 : vector<256x32xf32>
    %cst_58 = arith.constant 0.000000e+00 : f32
    %65 = vector.broadcast %cst_58 : f32 to vector<256x32xf32>
    %66 = arith.cmpf oge, %64, %65 : vector<256x32xf32>
    %cst_59 = arith.constant 2.000000e-01 : f32
    %67 = vector.broadcast %cst_59 : f32 to vector<256x32xf32>
    %68 = arith.mulf %67, %64 : vector<256x32xf32>
    %69 = arith.select %66, %64, %68 : vector<256x32xi1>, vector<256x32xf32>
    %c0_60 = arith.constant 0 : index
    %c0_61 = arith.constant 0 : index
    %c0_62 = arith.constant 0 : index
    %c0_63 = arith.constant 0 : index
    %70 = vector.load %arg2[%c0_60, %c0_61, %c0_62, %c0_63] : memref<1x4x64x32xf32, #tpu.memory_space<vmem>>, vector<1x4x64x32xf32>
    %71 = vector.shape_cast %70 : vector<1x4x64x32xf32> to vector<4x64x32xf32>
    %72 = vector.shape_cast %71 : vector<4x64x32xf32> to vector<256x32xf32>
    %c0_64 = arith.constant 0 : index
    %c0_65 = arith.constant 0 : index
    %73 = vector.load %arg9[%c0_64, %c0_65] : memref<32x16xf32, #tpu.memory_space<vmem>>, vector<32x16xf32>
    %cst_66 = arith.constant dense<0.000000e+00> : vector<256x16xf32>
    %74 = tpu.matmul %69, %73, %cst_66 {dimension_numbers = #tpu.dot_dimension_numbers<[1], [0], [0], [1], [0, 0, 1, 1], [], []>} : vector<256x32xf32>, vector<32x16xf32>, vector<256x16xf32> -> vector<256x16xf32>
    %c0_67 = arith.constant 0 : index
    %c0_68 = arith.constant 0 : index
    %75 = vector.load %arg10[%c0_67, %c0_68] : memref<32x16xf32, #tpu.memory_space<vmem>>, vector<32x16xf32>
    %cst_69 = arith.constant dense<0.000000e+00> : vector<256x16xf32>
    %76 = tpu.matmul %72, %75, %cst_69 {dimension_numbers = #tpu.dot_dimension_numbers<[1], [0], [0], [1], [0, 0, 1, 1], [], []>} : vector<256x32xf32>, vector<32x16xf32>, vector<256x16xf32> -> vector<256x16xf32>
    %77 = arith.addf %74, %76 : vector<256x16xf32>
    %c0_70 = arith.constant 0 : index
    %c0_71 = arith.constant 0 : index
    %78 = vector.load %arg11[%c0_70, %c0_71] : memref<1x16xf32, #tpu.memory_space<vmem>>, vector<1x16xf32>
    %79 = vector.broadcast %78 : vector<1x16xf32> to vector<256x16xf32>
    %80 = arith.addf %77, %79 : vector<256x16xf32>
    %cst_72 = arith.constant 0.000000e+00 : f32
    %81 = vector.broadcast %cst_72 : f32 to vector<256x16xf32>
    %82 = arith.cmpf oge, %80, %81 : vector<256x16xf32>
    %cst_73 = arith.constant 2.000000e-01 : f32
    %83 = vector.broadcast %cst_73 : f32 to vector<256x16xf32>
    %84 = arith.mulf %83, %80 : vector<256x16xf32>
    %85 = arith.select %82, %80, %84 : vector<256x16xi1>, vector<256x16xf32>
    %c0_74 = arith.constant 0 : index
    %c0_75 = arith.constant 0 : index
    %86 = vector.load %arg12[%c0_74, %c0_75] : memref<16x16xf32, #tpu.memory_space<vmem>>, vector<16x16xf32>
    %cst_76 = arith.constant dense<0.000000e+00> : vector<256x16xf32>
    %87 = tpu.matmul %85, %86, %cst_76 {dimension_numbers = #tpu.dot_dimension_numbers<[1], [0], [0], [1], [0, 0, 1, 1], [], []>} : vector<256x16xf32>, vector<16x16xf32>, vector<256x16xf32> -> vector<256x16xf32>
    %c0_77 = arith.constant 0 : index
    %c0_78 = arith.constant 0 : index
    %88 = vector.load %arg13[%c0_77, %c0_78] : memref<1x16xf32, #tpu.memory_space<vmem>>, vector<1x16xf32>
    %89 = vector.broadcast %88 : vector<1x16xf32> to vector<256x16xf32>
    %90 = arith.addf %87, %89 : vector<256x16xf32>
    %cst_79 = arith.constant 0.000000e+00 : f32
    %91 = vector.broadcast %cst_79 : f32 to vector<256x16xf32>
    %92 = arith.cmpf oge, %90, %91 : vector<256x16xf32>
    %cst_80 = arith.constant 2.000000e-01 : f32
    %93 = vector.broadcast %cst_80 : f32 to vector<256x16xf32>
    %94 = arith.mulf %93, %90 : vector<256x16xf32>
    %95 = arith.select %92, %90, %94 : vector<256x16xi1>, vector<256x16xf32>
    %cst_81 = arith.constant 0.000000e+00 : f32
    %96 = vector.broadcast %cst_81 : f32 to vector<4x10x10x16xf32>
    %c0_82 = arith.constant 0 : index
    %c0_83 = arith.constant 0 : index
    %c0_84 = arith.constant 0 : index
    %c0_85 = arith.constant 0 : index
    %97 = vector.load %arg17[%c0_82, %c0_83, %c0_84, %c0_85] : memref<4x10x10x16xf32, #tpu.memory_space<vmem>>, vector<4x10x10x16xf32>
    tpu.vector_store %arg17[%c0_82, %c0_83, %c0_84, %c0_85], %96 {strides = array<i32>} : memref<4x10x10x16xf32, #tpu.memory_space<vmem>>, vector<4x10x10x16xf32>,
    %98 = vector.extract_strided_slice %95 {offsets = [0, 0], sizes = [64, 16], strides = [1, 1]} : vector<256x16xf32> to vector<64x16xf32>
    %99 = vector.shape_cast %98 : vector<64x16xf32> to vector<8x8x16xf32>
    %c0_86 = arith.constant 0 : index
    %c1_87 = arith.constant 1 : index
    %c1_88 = arith.constant 1 : index
    %c0_89 = arith.constant 0 : index
    %100 = vector.load %arg17[%c0_86, %c1_87, %c1_88, %c0_89] : memref<4x10x10x16xf32, #tpu.memory_space<vmem>>, vector<1x8x8x16xf32>
    %101 = vector.shape_cast %100 : vector<1x8x8x16xf32> to vector<8x8x16xf32>
    %102 = vector.shape_cast %99 : vector<8x8x16xf32> to vector<1x8x8x16xf32>
    tpu.vector_store %arg17[%c0_86, %c1_87, %c1_88, %c0_89], %102 {strides = array<i32>} : memref<4x10x10x16xf32, #tpu.memory_space<vmem>>, vector<1x8x8x16xf32>,
    %103 = vector.extract_strided_slice %95 {offsets = [64, 0], sizes = [64, 16], strides = [1, 1]} : vector<256x16xf32> to vector<64x16xf32>
    %104 = vector.shape_cast %103 : vector<64x16xf32> to vector<8x8x16xf32>
    %c1_90 = arith.constant 1 : index
    %c1_91 = arith.constant 1 : index
    %c1_92 = arith.constant 1 : index
    %c0_93 = arith.constant 0 : index
    %105 = vector.load %arg17[%c1_90, %c1_91, %c1_92, %c0_93] : memref<4x10x10x16xf32, #tpu.memory_space<vmem>>, vector<1x8x8x16xf32>
    %106 = vector.shape_cast %105 : vector<1x8x8x16xf32> to vector<8x8x16xf32>
    %107 = vector.shape_cast %104 : vector<8x8x16xf32> to vector<1x8x8x16xf32>
    tpu.vector_store %arg17[%c1_90, %c1_91, %c1_92, %c0_93], %107 {strides = array<i32>} : memref<4x10x10x16xf32, #tpu.memory_space<vmem>>, vector<1x8x8x16xf32>,
    %108 = vector.extract_strided_slice %95 {offsets = [128, 0], sizes = [64, 16], strides = [1, 1]} : vector<256x16xf32> to vector<64x16xf32>
    %109 = vector.shape_cast %108 : vector<64x16xf32> to vector<8x8x16xf32>
    %c2_94 = arith.constant 2 : index
    %c1_95 = arith.constant 1 : index
    %c1_96 = arith.constant 1 : index
    %c0_97 = arith.constant 0 : index
    %110 = vector.load %arg17[%c2_94, %c1_95, %c1_96, %c0_97] : memref<4x10x10x16xf32, #tpu.memory_space<vmem>>, vector<1x8x8x16xf32>
    %111 = vector.shape_cast %110 : vector<1x8x8x16xf32> to vector<8x8x16xf32>
    %112 = vector.shape_cast %109 : vector<8x8x16xf32> to vector<1x8x8x16xf32>
    tpu.vector_store %arg17[%c2_94, %c1_95, %c1_96, %c0_97], %112 {strides = array<i32>} : memref<4x10x10x16xf32, #tpu.memory_space<vmem>>, vector<1x8x8x16xf32>,
    %113 = vector.extract_strided_slice %95 {offsets = [192, 0], sizes = [64, 16], strides = [1, 1]} : vector<256x16xf32> to vector<64x16xf32>
    %114 = vector.shape_cast %113 : vector<64x16xf32> to vector<8x8x16xf32>
    %c3_98 = arith.constant 3 : index
    %c1_99 = arith.constant 1 : index
    %c1_100 = arith.constant 1 : index
    %c0_101 = arith.constant 0 : index
    %115 = vector.load %arg17[%c3_98, %c1_99, %c1_100, %c0_101] : memref<4x10x10x16xf32, #tpu.memory_space<vmem>>, vector<1x8x8x16xf32>
    %116 = vector.shape_cast %115 : vector<1x8x8x16xf32> to vector<8x8x16xf32>
    %117 = vector.shape_cast %114 : vector<8x8x16xf32> to vector<1x8x8x16xf32>
    tpu.vector_store %arg17[%c3_98, %c1_99, %c1_100, %c0_101], %117 {strides = array<i32>} : memref<4x10x10x16xf32, #tpu.memory_space<vmem>>, vector<1x8x8x16xf32>,
    %c3_102 = arith.constant 3 : index
    %c0_103 = arith.constant 0 : index
    %c0_104 = arith.constant 0 : index
    %c0_105 = arith.constant 0 : index
    %118 = vector.load %arg17[%c3_102, %c0_103, %c0_104, %c0_105] : memref<4x10x10x16xf32, #tpu.memory_space<vmem>>, vector<1x8x8x16xf32>
    %119 = vector.shape_cast %118 : vector<1x8x8x16xf32> to vector<8x8x16xf32>
    %c2_106 = arith.constant 2 : index
    %c0_107 = arith.constant 0 : index
    %c1_108 = arith.constant 1 : index
    %c0_109 = arith.constant 0 : index
    %120 = vector.load %arg17[%c2_106, %c0_107, %c1_108, %c0_109] : memref<4x10x10x16xf32, #tpu.memory_space<vmem>>, vector<1x8x8x16xf32>
    %121 = vector.shape_cast %120 : vector<1x8x8x16xf32> to vector<8x8x16xf32>
    %c3_110 = arith.constant 3 : index
    %c0_111 = arith.constant 0 : index
    %c1_112 = arith.constant 1 : index
    %c0_113 = arith.constant 0 : index
    %122 = vector.load %arg17[%c3_110, %c0_111, %c1_112, %c0_113] : memref<4x10x10x16xf32, #tpu.memory_space<vmem>>, vector<1x8x8x16xf32>
    %123 = vector.shape_cast %122 : vector<1x8x8x16xf32> to vector<8x8x16xf32>
    %c1_114 = arith.constant 1 : index
    %c1_115 = arith.constant 1 : index
    %c0_116 = arith.constant 0 : index
    %c0_117 = arith.constant 0 : index
    %124 = vector.load %arg17[%c1_114, %c1_115, %c0_116, %c0_117] : memref<4x10x10x16xf32, #tpu.memory_space<vmem>>, vector<1x8x8x16xf32>
    %125 = vector.shape_cast %124 : vector<1x8x8x16xf32> to vector<8x8x16xf32>
    %c0_118 = arith.constant 0 : index
    %c1_119 = arith.constant 1 : index
    %c1_120 = arith.constant 1 : index
    %c0_121 = arith.constant 0 : index
    %126 = vector.load %arg17[%c0_118, %c1_119, %c1_120, %c0_121] : memref<4x10x10x16xf32, #tpu.memory_space<vmem>>, vector<1x8x8x16xf32>
    %127 = vector.shape_cast %126 : vector<1x8x8x16xf32> to vector<8x8x16xf32>
    %c1_122 = arith.constant 1 : index
    %c1_123 = arith.constant 1 : index
    %c1_124 = arith.constant 1 : index
    %c0_125 = arith.constant 0 : index
    %128 = vector.load %arg17[%c1_122, %c1_123, %c1_124, %c0_125] : memref<4x10x10x16xf32, #tpu.memory_space<vmem>>, vector<1x8x8x16xf32>
    %129 = vector.shape_cast %128 : vector<1x8x8x16xf32> to vector<8x8x16xf32>
    %c3_126 = arith.constant 3 : index
    %c1_127 = arith.constant 1 : index
    %c0_128 = arith.constant 0 : index
    %c0_129 = arith.constant 0 : index
    %130 = vector.load %arg17[%c3_126, %c1_127, %c0_128, %c0_129] : memref<4x10x10x16xf32, #tpu.memory_space<vmem>>, vector<1x8x8x16xf32>
    %131 = vector.shape_cast %130 : vector<1x8x8x16xf32> to vector<8x8x16xf32>
    %c2_130 = arith.constant 2 : index
    %c1_131 = arith.constant 1 : index
    %c1_132 = arith.constant 1 : index
    %c0_133 = arith.constant 0 : index
    %132 = vector.load %arg17[%c2_130, %c1_131, %c1_132, %c0_133] : memref<4x10x10x16xf32, #tpu.memory_space<vmem>>, vector<1x8x8x16xf32>
    %133 = vector.shape_cast %132 : vector<1x8x8x16xf32> to vector<8x8x16xf32>
    %c3_134 = arith.constant 3 : index
    %c1_135 = arith.constant 1 : index
    %c1_136 = arith.constant 1 : index
    %c0_137 = arith.constant 0 : index
    %134 = vector.load %arg17[%c3_134, %c1_135, %c1_136, %c0_137] : memref<4x10x10x16xf32, #tpu.memory_space<vmem>>, vector<1x8x8x16xf32>
    %135 = vector.shape_cast %134 : vector<1x8x8x16xf32> to vector<8x8x16xf32>
    %136 = tpu.concatenate %119, %121, %123, %125, %127, %129, %131, %133, %135 in 2 : vector<8x8x16xf32>, vector<8x8x16xf32>, vector<8x8x16xf32>, vector<8x8x16xf32>, vector<8x8x16xf32>, vector<8x8x16xf32>, vector<8x8x16xf32>, vector<8x8x16xf32>, vector<8x8x16xf32> -> vector<8x8x144xf32>
    %137 = vector.shape_cast %136 : vector<8x8x144xf32> to vector<64x144xf32>
    %c2_138 = arith.constant 2 : index
    %c0_139 = arith.constant 0 : index
    %c1_140 = arith.constant 1 : index
    %c0_141 = arith.constant 0 : index
    %138 = vector.load %arg17[%c2_138, %c0_139, %c1_140, %c0_141] : memref<4x10x10x16xf32, #tpu.memory_space<vmem>>, vector<1x8x8x16xf32>
    %139 = vector.shape_cast %138 : vector<1x8x8x16xf32> to vector<8x8x16xf32>
    %c3_142 = arith.constant 3 : index
    %c0_143 = arith.constant 0 : index
    %c1_144 = arith.constant 1 : index
    %c0_145 = arith.constant 0 : index
    %140 = vector.load %arg17[%c3_142, %c0_143, %c1_144, %c0_145] : memref<4x10x10x16xf32, #tpu.memory_space<vmem>>, vector<1x8x8x16xf32>
    %141 = vector.shape_cast %140 : vector<1x8x8x16xf32> to vector<8x8x16xf32>
    %c2_146 = arith.constant 2 : index
    %c0_147 = arith.constant 0 : index
    %c2_148 = arith.constant 2 : index
    %c0_149 = arith.constant 0 : index
    %142 = vector.load %arg17[%c2_146, %c0_147, %c2_148, %c0_149] : memref<4x10x10x16xf32, #tpu.memory_space<vmem>>, vector<1x8x8x16xf32>
    %143 = vector.shape_cast %142 : vector<1x8x8x16xf32> to vector<8x8x16xf32>
    %c0_150 = arith.constant 0 : index
    %c1_151 = arith.constant 1 : index
    %c1_152 = arith.constant 1 : index
    %c0_153 = arith.constant 0 : index
    %144 = vector.load %arg17[%c0_150, %c1_151, %c1_152, %c0_153] : memref<4x10x10x16xf32, #tpu.memory_space<vmem>>, vector<1x8x8x16xf32>
    %145 = vector.shape_cast %144 : vector<1x8x8x16xf32> to vector<8x8x16xf32>
    %c1_154 = arith.constant 1 : index
    %c1_155 = arith.constant 1 : index
    %c1_156 = arith.constant 1 : index
    %c0_157 = arith.constant 0 : index
    %146 = vector.load %arg17[%c1_154, %c1_155, %c1_156, %c0_157] : memref<4x10x10x16xf32, #tpu.memory_space<vmem>>, vector<1x8x8x16xf32>
    %147 = vector.shape_cast %146 : vector<1x8x8x16xf32> to vector<8x8x16xf32>
    %c0_158 = arith.constant 0 : index
    %c1_159 = arith.constant 1 : index
    %c2_160 = arith.constant 2 : index
    %c0_161 = arith.constant 0 : index
    %148 = vector.load %arg17[%c0_158, %c1_159, %c2_160, %c0_161] : memref<4x10x10x16xf32, #tpu.memory_space<vmem>>, vector<1x8x8x16xf32>
    %149 = vector.shape_cast %148 : vector<1x8x8x16xf32> to vector<8x8x16xf32>
    %c2_162 = arith.constant 2 : index
    %c1_163 = arith.constant 1 : index
    %c1_164 = arith.constant 1 : index
    %c0_165 = arith.constant 0 : index
    %150 = vector.load %arg17[%c2_162, %c1_163, %c1_164, %c0_165] : memref<4x10x10x16xf32, #tpu.memory_space<vmem>>, vector<1x8x8x16xf32>
    %151 = vector.shape_cast %150 : vector<1x8x8x16xf32> to vector<8x8x16xf32>
    %c3_166 = arith.constant 3 : index
    %c1_167 = arith.constant 1 : index
    %c1_168 = arith.constant 1 : index
    %c0_169 = arith.constant 0 : index
    %152 = vector.load %arg17[%c3_166, %c1_167, %c1_168, %c0_169] : memref<4x10x10x16xf32, #tpu.memory_space<vmem>>, vector<1x8x8x16xf32>
    %153 = vector.shape_cast %152 : vector<1x8x8x16xf32> to vector<8x8x16xf32>
    %c2_170 = arith.constant 2 : index
    %c1_171 = arith.constant 1 : index
    %c2_172 = arith.constant 2 : index
    %c0_173 = arith.constant 0 : index
    %154 = vector.load %arg17[%c2_170, %c1_171, %c2_172, %c0_173] : memref<4x10x10x16xf32, #tpu.memory_space<vmem>>, vector<1x8x8x16xf32>
    %155 = vector.shape_cast %154 : vector<1x8x8x16xf32> to vector<8x8x16xf32>
    %156 = tpu.concatenate %139, %141, %143, %145, %147, %149, %151, %153, %155 in 2 : vector<8x8x16xf32>, vector<8x8x16xf32>, vector<8x8x16xf32>, vector<8x8x16xf32>, vector<8x8x16xf32>, vector<8x8x16xf32>, vector<8x8x16xf32>, vector<8x8x16xf32>, vector<8x8x16xf32> -> vector<8x8x144xf32>
    %157 = vector.shape_cast %156 : vector<8x8x144xf32> to vector<64x144xf32>
    %c1_174 = arith.constant 1 : index
    %c1_175 = arith.constant 1 : index
    %c0_176 = arith.constant 0 : index
    %c0_177 = arith.constant 0 : index
    %158 = vector.load %arg17[%c1_174, %c1_175, %c0_176, %c0_177] : memref<4x10x10x16xf32, #tpu.memory_space<vmem>>, vector<1x8x8x16xf32>
    %159 = vector.shape_cast %158 : vector<1x8x8x16xf32> to vector<8x8x16xf32>
    %c0_178 = arith.constant 0 : index
    %c1_179 = arith.constant 1 : index
    %c1_180 = arith.constant 1 : index
    %c0_181 = arith.constant 0 : index
    %160 = vector.load %arg17[%c0_178, %c1_179, %c1_180, %c0_181] : memref<4x10x10x16xf32, #tpu.memory_space<vmem>>, vector<1x8x8x16xf32>
    %161 = vector.shape_cast %160 : vector<1x8x8x16xf32> to vector<8x8x16xf32>
    %c1_182 = arith.constant 1 : index
    %c1_183 = arith.constant 1 : index
    %c1_184 = arith.constant 1 : index
    %c0_185 = arith.constant 0 : index
    %162 = vector.load %arg17[%c1_182, %c1_183, %c1_184, %c0_185] : memref<4x10x10x16xf32, #tpu.memory_space<vmem>>, vector<1x8x8x16xf32>
    %163 = vector.shape_cast %162 : vector<1x8x8x16xf32> to vector<8x8x16xf32>
    %c3_186 = arith.constant 3 : index
    %c1_187 = arith.constant 1 : index
    %c0_188 = arith.constant 0 : index
    %c0_189 = arith.constant 0 : index
    %164 = vector.load %arg17[%c3_186, %c1_187, %c0_188, %c0_189] : memref<4x10x10x16xf32, #tpu.memory_space<vmem>>, vector<1x8x8x16xf32>
    %165 = vector.shape_cast %164 : vector<1x8x8x16xf32> to vector<8x8x16xf32>
    %c2_190 = arith.constant 2 : index
    %c1_191 = arith.constant 1 : index
    %c1_192 = arith.constant 1 : index
    %c0_193 = arith.constant 0 : index
    %166 = vector.load %arg17[%c2_190, %c1_191, %c1_192, %c0_193] : memref<4x10x10x16xf32, #tpu.memory_space<vmem>>, vector<1x8x8x16xf32>
    %167 = vector.shape_cast %166 : vector<1x8x8x16xf32> to vector<8x8x16xf32>
    %c3_194 = arith.constant 3 : index
    %c1_195 = arith.constant 1 : index
    %c1_196 = arith.constant 1 : index
    %c0_197 = arith.constant 0 : index
    %168 = vector.load %arg17[%c3_194, %c1_195, %c1_196, %c0_197] : memref<4x10x10x16xf32, #tpu.memory_space<vmem>>, vector<1x8x8x16xf32>
    %169 = vector.shape_cast %168 : vector<1x8x8x16xf32> to vector<8x8x16xf32>
    %c1_198 = arith.constant 1 : index
    %c2_199 = arith.constant 2 : index
    %c0_200 = arith.constant 0 : index
    %c0_201 = arith.constant 0 : index
    %170 = vector.load %arg17[%c1_198, %c2_199, %c0_200, %c0_201] : memref<4x10x10x16xf32, #tpu.memory_space<vmem>>, vector<1x8x8x16xf32>
    %171 = vector.shape_cast %170 : vector<1x8x8x16xf32> to vector<8x8x16xf32>
    %c0_202 = arith.constant 0 : index
    %c2_203 = arith.constant 2 : index
    %c1_204 = arith.constant 1 : index
    %c0_205 = arith.constant 0 : index
    %172 = vector.load %arg17[%c0_202, %c2_203, %c1_204, %c0_205] : memref<4x10x10x16xf32, #tpu.memory_space<vmem>>, vector<1x8x8x16xf32>
    %173 = vector.shape_cast %172 : vector<1x8x8x16xf32> to vector<8x8x16xf32>
    %c1_206 = arith.constant 1 : index
    %c2_207 = arith.constant 2 : index
    %c1_208 = arith.constant 1 : index
    %c0_209 = arith.constant 0 : index
    %174 = vector.load %arg17[%c1_206, %c2_207, %c1_208, %c0_209] : memref<4x10x10x16xf32, #tpu.memory_space<vmem>>, vector<1x8x8x16xf32>
    %175 = vector.shape_cast %174 : vector<1x8x8x16xf32> to vector<8x8x16xf32>
    %176 = tpu.concatenate %159, %161, %163, %165, %167, %169, %171, %173, %175 in 2 : vector<8x8x16xf32>, vector<8x8x16xf32>, vector<8x8x16xf32>, vector<8x8x16xf32>, vector<8x8x16xf32>, vector<8x8x16xf32>, vector<8x8x16xf32>, vector<8x8x16xf32>, vector<8x8x16xf32> -> vector<8x8x144xf32>
    %177 = vector.shape_cast %176 : vector<8x8x144xf32> to vector<64x144xf32>
    %c0_210 = arith.constant 0 : index
    %c1_211 = arith.constant 1 : index
    %c1_212 = arith.constant 1 : index
    %c0_213 = arith.constant 0 : index
    %178 = vector.load %arg17[%c0_210, %c1_211, %c1_212, %c0_213] : memref<4x10x10x16xf32, #tpu.memory_space<vmem>>, vector<1x8x8x16xf32>
    %179 = vector.shape_cast %178 : vector<1x8x8x16xf32> to vector<8x8x16xf32>
    %c1_214 = arith.constant 1 : index
    %c1_215 = arith.constant 1 : index
    %c1_216 = arith.constant 1 : index
    %c0_217 = arith.constant 0 : index
    %180 = vector.load %arg17[%c1_214, %c1_215, %c1_216, %c0_217] : memref<4x10x10x16xf32, #tpu.memory_space<vmem>>, vector<1x8x8x16xf32>
    %181 = vector.shape_cast %180 : vector<1x8x8x16xf32> to vector<8x8x16xf32>
    %c0_218 = arith.constant 0 : index
    %c1_219 = arith.constant 1 : index
    %c2_220 = arith.constant 2 : index
    %c0_221 = arith.constant 0 : index
    %182 = vector.load %arg17[%c0_218, %c1_219, %c2_220, %c0_221] : memref<4x10x10x16xf32, #tpu.memory_space<vmem>>, vector<1x8x8x16xf32>
    %183 = vector.shape_cast %182 : vector<1x8x8x16xf32> to vector<8x8x16xf32>
    %c2_222 = arith.constant 2 : index
    %c1_223 = arith.constant 1 : index
    %c1_224 = arith.constant 1 : index
    %c0_225 = arith.constant 0 : index
    %184 = vector.load %arg17[%c2_222, %c1_223, %c1_224, %c0_225] : memref<4x10x10x16xf32, #tpu.memory_space<vmem>>, vector<1x8x8x16xf32>
    %185 = vector.shape_cast %184 : vector<1x8x8x16xf32> to vector<8x8x16xf32>
    %c3_226 = arith.constant 3 : index
    %c1_227 = arith.constant 1 : index
    %c1_228 = arith.constant 1 : index
    %c0_229 = arith.constant 0 : index
    %186 = vector.load %arg17[%c3_226, %c1_227, %c1_228, %c0_229] : memref<4x10x10x16xf32, #tpu.memory_space<vmem>>, vector<1x8x8x16xf32>
    %187 = vector.shape_cast %186 : vector<1x8x8x16xf32> to vector<8x8x16xf32>
    %c2_230 = arith.constant 2 : index
    %c1_231 = arith.constant 1 : index
    %c2_232 = arith.constant 2 : index
    %c0_233 = arith.constant 0 : index
    %188 = vector.load %arg17[%c2_230, %c1_231, %c2_232, %c0_233] : memref<4x10x10x16xf32, #tpu.memory_space<vmem>>, vector<1x8x8x16xf32>
    %189 = vector.shape_cast %188 : vector<1x8x8x16xf32> to vector<8x8x16xf32>
    %c0_234 = arith.constant 0 : index
    %c2_235 = arith.constant 2 : index
    %c1_236 = arith.constant 1 : index
    %c0_237 = arith.constant 0 : index
    %190 = vector.load %arg17[%c0_234, %c2_235, %c1_236, %c0_237] : memref<4x10x10x16xf32, #tpu.memory_space<vmem>>, vector<1x8x8x16xf32>
    %191 = vector.shape_cast %190 : vector<1x8x8x16xf32> to vector<8x8x16xf32>
    %c1_238 = arith.constant 1 : index
    %c2_239 = arith.constant 2 : index
    %c1_240 = arith.constant 1 : index
    %c0_241 = arith.constant 0 : index
    %192 = vector.load %arg17[%c1_238, %c2_239, %c1_240, %c0_241] : memref<4x10x10x16xf32, #tpu.memory_space<vmem>>, vector<1x8x8x16xf32>
    %193 = vector.shape_cast %192 : vector<1x8x8x16xf32> to vector<8x8x16xf32>
    %c0_242 = arith.constant 0 : index
    %c2_243 = arith.constant 2 : index
    %c2_244 = arith.constant 2 : index
    %c0_245 = arith.constant 0 : index
    %194 = vector.load %arg17[%c0_242, %c2_243, %c2_244, %c0_245] : memref<4x10x10x16xf32, #tpu.memory_space<vmem>>, vector<1x8x8x16xf32>
    %195 = vector.shape_cast %194 : vector<1x8x8x16xf32> to vector<8x8x16xf32>
    %196 = tpu.concatenate %179, %181, %183, %185, %187, %189, %191, %193, %195 in 2 : vector<8x8x16xf32>, vector<8x8x16xf32>, vector<8x8x16xf32>, vector<8x8x16xf32>, vector<8x8x16xf32>, vector<8x8x16xf32>, vector<8x8x16xf32>, vector<8x8x16xf32>, vector<8x8x16xf32> -> vector<8x8x144xf32>
    %197 = vector.shape_cast %196 : vector<8x8x144xf32> to vector<64x144xf32>
    %198 = tpu.concatenate %137, %157, %177, %197 in 0 : vector<64x144xf32>, vector<64x144xf32>, vector<64x144xf32>, vector<64x144xf32> -> vector<256x144xf32>
    %c0_246 = arith.constant 0 : index
    %c0_247 = arith.constant 0 : index
    %199 = vector.load %arg14[%c0_246, %c0_247] : memref<144x8xf32, #tpu.memory_space<vmem>>, vector<144x8xf32>
    %cst_248 = arith.constant dense<0.000000e+00> : vector<256x8xf32>
    %200 = tpu.matmul %198, %199, %cst_248 {dimension_numbers = #tpu.dot_dimension_numbers<[1], [0], [0], [1], [0, 0, 1, 1], [], []>} : vector<256x144xf32>, vector<144x8xf32>, vector<256x8xf32> -> vector<256x8xf32>
    %c0_249 = arith.constant 0 : index
    %c0_250 = arith.constant 0 : index
    %201 = vector.load %arg15[%c0_249, %c0_250] : memref<1x8xf32, #tpu.memory_space<vmem>>, vector<1x8xf32>
    %202 = vector.broadcast %201 : vector<1x8xf32> to vector<256x8xf32>
    %203 = arith.addf %200, %202 : vector<256x8xf32>
    %cst_251 = arith.constant 0.000000e+00 : f32
    %204 = vector.broadcast %cst_251 : f32 to vector<256x8xf32>
    %205 = arith.cmpf oge, %203, %204 : vector<256x8xf32>
    %cst_252 = arith.constant 2.000000e-01 : f32
    %206 = vector.broadcast %cst_252 : f32 to vector<256x8xf32>
    %207 = arith.mulf %206, %203 : vector<256x8xf32>
    %208 = arith.select %205, %203, %207 : vector<256x8xi1>, vector<256x8xf32>
    %209 = tpu.transpose %208, [1, 0] : vector<256x8xf32> -> vector<8x256xf32>
    %c0_253 = arith.constant 0 : index
    %c0_254 = arith.constant 0 : index
    %c0_255 = arith.constant 0 : index
    %210 = vector.load %arg16[%c0_253, %c0_254, %c0_255] : memref<1x8x256xf32, #tpu.memory_space<vmem>>, vector<1x8x256xf32>
    %211 = vector.shape_cast %210 : vector<1x8x256xf32> to vector<8x256xf32>
    %212 = vector.shape_cast %209 : vector<8x256xf32> to vector<1x8x256xf32>
    tpu.vector_store %arg16[%c0_253, %c0_254, %c0_255], %212 {strides = array<i32>} : memref<1x8x256xf32, #tpu.memory_space<vmem>>, vector<1x8x256xf32>,
    return
  }
  func.func @transform_0(%arg0: i32) -> (i32, i32, i32, i32) {
    %c0_i32 = arith.constant 0 : i32
    %c0_i32_0 = arith.constant 0 : i32
    %c0_i32_1 = arith.constant 0 : i32
    %c0_i32_2 = arith.constant 0 : i32
    return %arg0, %c0_i32, %c0_i32_0, %c0_i32_1 : i32, i32, i32, i32
  }
  func.func @transform_1(%arg0: i32) -> (i32, i32, i32, i32) {
    %c0_i32 = arith.constant 0 : i32
    %c0_i32_0 = arith.constant 0 : i32
    %c0_i32_1 = arith.constant 0 : i32
    %c0_i32_2 = arith.constant 0 : i32
    return %arg0, %c0_i32, %c0_i32_0, %c0_i32_1 : i32, i32, i32, i32
  }
  func.func @transform_2(%arg0: i32) -> (i32, i32, i32) {
    %c0_i32 = arith.constant 0 : i32
    %c0_i32_0 = arith.constant 0 : i32
    %c0_i32_1 = arith.constant 0 : i32
    %c0_i32_2 = arith.constant 0 : i32
    return %c0_i32, %c0_i32_0, %c0_i32_1 : i32, i32, i32
  }
  func.func @transform_3(%arg0: i32) -> (i32, i32) {
    %c0_i32 = arith.constant 0 : i32
    %c0_i32_0 = arith.constant 0 : i32
    %c0_i32_1 = arith.constant 0 : i32
    return %c0_i32, %c0_i32_0 : i32, i32
  }
  func.func @transform_4(%arg0: i32) -> (i32, i32) {
    %c0_i32 = arith.constant 0 : i32
    %c0_i32_0 = arith.constant 0 : i32
    %c0_i32_1 = arith.constant 0 : i32
    return %c0_i32, %c0_i32_0 : i32, i32
  }
  func.func @transform_5(%arg0: i32) -> (i32, i32) {
    %c0_i32 = arith.constant 0 : i32
    %c0_i32_0 = arith.constant 0 : i32
    %c0_i32_1 = arith.constant 0 : i32
    return %c0_i32, %c0_i32_0 : i32, i32
  }
  func.func @transform_6(%arg0: i32) -> (i32, i32) {
    %c0_i32 = arith.constant 0 : i32
    %c0_i32_0 = arith.constant 0 : i32
    %c0_i32_1 = arith.constant 0 : i32
    return %c0_i32, %c0_i32_0 : i32, i32
  }
  func.func @transform_7(%arg0: i32) -> (i32, i32) {
    %c0_i32 = arith.constant 0 : i32
    %c0_i32_0 = arith.constant 0 : i32
    %c0_i32_1 = arith.constant 0 : i32
    return %c0_i32, %c0_i32_0 : i32, i32
  }
  func.func @transform_8(%arg0: i32) -> (i32, i32) {
    %c0_i32 = arith.constant 0 : i32
    %c0_i32_0 = arith.constant 0 : i32
    %c0_i32_1 = arith.constant 0 : i32
    return %c0_i32, %c0_i32_0 : i32, i32
  }
  func.func @transform_9(%arg0: i32) -> (i32, i32) {
    %c0_i32 = arith.constant 0 : i32
    %c0_i32_0 = arith.constant 0 : i32
    %c0_i32_1 = arith.constant 0 : i32
    return %c0_i32, %c0_i32_0 : i32, i32
  }
  func.func @transform_10(%arg0: i32) -> (i32, i32) {
    %c0_i32 = arith.constant 0 : i32
    %c0_i32_0 = arith.constant 0 : i32
    %c0_i32_1 = arith.constant 0 : i32
    return %c0_i32, %c0_i32_0 : i32, i32
  }
  func.func @transform_11(%arg0: i32) -> (i32, i32) {
    %c0_i32 = arith.constant 0 : i32
    %c0_i32_0 = arith.constant 0 : i32
    %c0_i32_1 = arith.constant 0 : i32
    return %c0_i32, %c0_i32_0 : i32, i32
  }
  func.func @transform_12(%arg0: i32) -> (i32, i32) {
    %c0_i32 = arith.constant 0 : i32
    %c0_i32_0 = arith.constant 0 : i32
    %c0_i32_1 = arith.constant 0 : i32
    return %c0_i32, %c0_i32_0 : i32, i32
  }
  func.func @transform_13(%arg0: i32) -> (i32, i32) {
    %c0_i32 = arith.constant 0 : i32
    %c0_i32_0 = arith.constant 0 : i32
    %c0_i32_1 = arith.constant 0 : i32
    return %c0_i32, %c0_i32_0 : i32, i32
  }
  func.func @transform_14(%arg0: i32) -> (i32, i32) {
    %c0_i32 = arith.constant 0 : i32
    %c0_i32_0 = arith.constant 0 : i32
    %c0_i32_1 = arith.constant 0 : i32
    return %c0_i32, %c0_i32_0 : i32, i32
  }
  func.func @transform_15(%arg0: i32) -> (i32, i32, i32) {
    %c0_i32 = arith.constant 0 : i32
    %c0_i32_0 = arith.constant 0 : i32
    %c0_i32_1 = arith.constant 0 : i32
    return %arg0, %c0_i32, %c0_i32_0 : i32, i32, i32
  }
}

</mosaic_0001>

<bundles_post_ra>
// kernel: _lambda_.1
= control target key start
LH: loop header
LB: loop body
LE: loop exit
PB: predicated region body
PF: predicated region fallthrough
CT: control target
= control target key end

     0   :  { %s6886_s16 = smov 0   ;;  %s9548_s0 = inlined_call_operand.vmem [shape: f32[2,10,10,32], index: 0, kind: input, shape index: {}]   ;;  %s9549_s1 = inlined_call_operand.vmem [shape: f32[2,4,64,32], index: 1, kind: input, shape index: {}]   ;;  %s9550_s2 = inlined_call_operand.vmem [shape: f32[4,128,32], index: 2, kind: input, shape index: {}]   ;;  %s9551_s3 = inlined_call_operand.vmem [shape: f32[1,32], index: 3, kind: input, shape index: {}]   ;;  %s9552_s4 = inlined_call_operand.vmem [shape: f32[1,32], index: 4, kind: input, shape index: {}]   ;;  %s9553_s5 = inlined_call_operand.vmem [shape: f32[1,32], index: 5, kind: input, shape index: {}]   ;;  %s9554_s6 = inlined_call_operand.vmem [shape: f32[32,32], index: 6, kind: input, shape index: {}]   ;;  %s9555_s7 = inlined_call_operand.vmem [shape: f32[32,32], index: 7, kind: input, shape index: {}]   ;;  %s9556_s8 = inlined_call_operand.vmem [shape: f32[32,16], index: 8, kind: input, shape index: {}]   ;;  %s9557_s9 = inlined_call_operand.vmem [shape: f32[32,16], index: 9, kind: input, shape index: {}]   ;;  %s9558_s10 = inlined_call_operand.vmem [shape: f32[1,16], index: 10, kind: input, shape index: {}]   ;;  %s9559_s11 = inlined_call_operand.vmem [shape: f32[16,16], index: 11, kind: input, shape index: {}]   ;;  %s9560_s12 = inlined_call_operand.vmem [shape: f32[1,16], index: 12, kind: input, shape index: {}]   ;;  %s9561_s13 = inlined_call_operand.vmem [shape: f32[144,8], index: 13, kind: input, shape index: {}]   ;;  %s9562_s14 = inlined_call_operand.vmem [shape: f32[1,8], index: 14, kind: input, shape index: {}]   ;;  %s9563_s15 = inlined_call_operand.vmem [shape: f32[2,8,256], index: 15, kind: output, shape index: {}]  }
   0x1 LB: > { %s4972_s17 = sadd.s32 4294967295, %s6795_s16   ;;  %p4976_p0 = scmp.ge.s32.totalorder %s6795_s16, 1  ;;  %s6795_s16 = sphi %s6886_s16, %s25_s16  }
   0x2   : > { %p447_p1 = scmp.lt.s32.totalorder %s6795_s16, 3 }
   0x4   : > { %p448_p2 = pnand %p4976_p0, %p447_p1 }
   0x6   : > { %451 = sbr.rel (%p448_p2) target bundleno = 1596 (0x63c), region = 80 }
   0xd   : > { %p500_p3 = scmp.lt.s32.totalorder %s4972_s17, 1  ;;  %v712_v0 = vld [vmem:[%s9550_s2] sm:$0xff]  ;;  %v713_v1 = vld [vmem:[%s9550_s2 + $0x8] sm:$0xff]  ;;  %v714_v2 = vld [vmem:[%s9550_s2 + $0x10] sm:$0xff]  ;;  %s6797_s23 = smov 32   ;;  %vm685_vm0 = vcmask 261120  }
   0xe   : > { %v5756_v3 = vpack.c.bf16 %v713_v1, %v712_v0  ;;  %v715_v4 = vld [vmem:[%s9550_s2 + $0x18] sm:$0xff]  ;;  %v716_v6 = vld [vmem:[%s9550_s2 + $0x20] sm:$0xff]  ;;  %v717_v7 = vld [vmem:[%s9550_s2 + $0x28] sm:$0xff]  ;;  %s6798_s24 = smov 96   ;;  %s6799_s28 = smov 64   ;;  %vm694_vm1 = vcmask 523264  }
   0xf   : > { %s9706_s17 = smov (!%p500_p3, %s4972_s17), 1  ;;  %v5760_v5 = vpack.c.bf16 %v715_v4, %v714_v2  ;;  %v5764_v8 = vpack.c.bf16 %v717_v7, %v716_v6  ;;  %v718_v9 = vld [vmem:[%s9550_s2 + $0x30] sm:$0xff]  ;;  %v719_v10 = vld [vmem:[%s9550_s2 + $0x38] sm:$0xff]  ;;  %v720_v22 = vld [vmem:[%s9550_s2 + $0x40] sm:$0xff]  ;;  %vm703_vm2 = vcmask 785408   ;;  %s6801_s30 = smov 48  }
  0x10   : > { %5757 = vmatprep.subr.bf16.mxu0 %v5756_v3  ;;  %s5963_s7 = smul.u32 160, %s9706_s17  ;;  %v5768_v19 = vpack.c.bf16 %v719_v10, %v718_v9  ;;  %v721_v23 = vld [vmem:[%s9550_s2 + $0x48] sm:$0xff]  ;;  %v722_v30 = vld [vmem:[%s9550_s2 + $0x50] sm:$0xff]  ;;  %v723_v31 = vld [vmem:[%s9550_s2 + $0x58] sm:$0xff]  ;;  %s6803_s20 = smov 16  }
  0x11   : > { %5759 = vmatpush3.bf16.msra.mxu0 %v5756_v3  ;;  %v5772_v27 = vpack.c.bf16 %v721_v23, %v720_v22  ;;  %v5776_v35 = vpack.c.bf16 %v723_v31, %v722_v30  ;;  %v724_v38 = vld [vmem:[%s9550_s2 + $0x60] sm:$0xff]  ;;  %v725_v39 = vld [vmem:[%s9550_s2 + $0x68] sm:$0xff]  ;;  %v726_v45 = vld [vmem:[%s9550_s2 + $0x70] sm:$0xff]  ;;  %s6804_s21 = smov 112  }
  0x12   : > { %5761 = vmatprep.subr.bf16.mxu0 %v5760_v5  ;;  %s6918_s18 = scalar_lea.vmem %s9548_s0, %s5963_s7  ;;  %v5780_v42 = vpack.c.bf16 %v725_v39, %v724_v38  ;;  %v727_v46 = vld [vmem:[%s9550_s2 + $0x78] sm:$0xff]  ;;  %v5030_v53 = vld [vmem:[%s9550_s2 + $0x80] sm:$0xff]  ;;  %v5031_v54 = vld [vmem:[%s9550_s2 + $0x88] sm:$0xff]  ;;  %s5212_s7 = sshll.u32 %s9706_s17, 8 }
  0x13   : > { %v6927_v11 = vld [vmem:[%s6918_s18 + $0x1] sm:$0xff]  ;;  %v6930_v12 = vld [vmem:[%s6918_s18 + $0x11] sm:$0xff]  ;;  %v5784_v50 = vpack.c.bf16 %v727_v46, %v726_v45  ;;  %v7063_v57 = vpack.c.bf16 %v5031_v54, %v5030_v53  ;;  %s7468_s19 = scalar_lea.vmem %s9549_s1, %s5212_s7 }
  0x14   : > { %v6933_v13 = vld [vmem:[%s6918_s18 + $0x21] sm:$0xff]  ;;  %v5981_v14 = vpack.i.bf16 %v6930_v12, %v6927_v11  ;;  %v6942_v16 = vld [vmem:[%s6918_s18 + $0x10] sm:$0xff]  ;;  %v5073_v46 = vld [vmem:[%s9550_s2 + $0x1d8] sm:$0xff] }
  0x15   : > { %v6939_v15 = vpack.i.bf16 %v6933_v13, %v6930_v12  ;;  %v6945_v17 = vld [vmem:[%s6918_s18 + $0x20] sm:$0xff]  ;;  %v6948_v18 = vld [vmem:[%s6918_s18 + $0x31] sm:$0xff]  ;;  %5763 = vmatpush3.bf16.msra.mxu0 %v5760_v5  ;;  %v5063_v6 = vld [vmem:[%s9550_s2 + $0x188] sm:$0xff] }
  0x16   : > { %5765 = vmatprep.subr.bf16.mxu0 %v5764_v8  ;;  %5982 = vrot.lane.b32.xlu0 %v5981_v14, %s6797_s23  ;;  %v5986_v20 = vpack.i.bf16 %v6945_v17, %v6942_v16  ;;  %v6957_v21 = vpack.i.bf16 %v6948_v18, %v6933_v13  ;;  %v6966_v24 = vld [vmem:[%s6918_s18 + $0x30] sm:$0xff]  ;;  %v6969_v25 = vld [vmem:[%s6918_s18 + $0x40] sm:$0xff]  ;;  %v5071_v39 = vld [vmem:[%s9550_s2 + $0x1c8] sm:$0xff] }
  0x17   : > { %5992 = vrot.lane.b32.xlu1 %v6939_v15, %s6798_s24  ;;  %v6972_v26 = vld [vmem:[%s6918_s18 + $0x41] sm:$0xff]  ;;  %v6001_v28 = vpack.i.bf16 %v6969_v25, %v6966_v24  ;;  %v6990_v32 = vld [vmem:[%s6918_s18 + $0x51] sm:$0xff]  ;;  %v6106_v30 = vpack.i.bf16 %v6966_v24, %v6945_v17 }
  0x18   : > { %v6981_v29 = vpack.i.bf16 %v6972_v26, %v6948_v18  ;;  %v6993_v33 = vld [vmem:[%s6918_s18 + $0x50] sm:$0xff]  ;;  %v6996_v34 = vld [vmem:[%s6918_s18 + $0x60] sm:$0xff]  ;;  %v7003_v36 = vpack.i.bf16 %v6990_v32, %v6972_v26  ;;  %v5075_v53 = vld [vmem:[%s9550_s2 + $0x1e8] sm:$0xff] }
  0x19   : > { %5767 = vmatpush3.bf16.msra.mxu0 %v5764_v8  ;;  %v6016_v37 = vpack.i.bf16 %v6996_v34, %v6993_v33  ;;  %v7014_v40 = vld [vmem:[%s6918_s18 + $0x61] sm:$0xff]  ;;  %v7017_v41 = vld [vmem:[%s6918_s18 + $0x71] sm:$0xff] }
  0x1a   : > { %5769 = vmatprep.subr.bf16.mxu0 %v5768_v19  ;;  %5987 = vrot.lane.b32.xlu0 %v5986_v20, %s6799_s28  ;;  %v7024_v43 = vpack.i.bf16 %v7014_v40, %v6990_v32  ;;  %v7028_v44 = vpack.i.bf16 %v7017_v41, %v7014_v40  ;;  %v7037_v47 = vld [vmem:[%s6918_s18 + $0x70] sm:$0xff]  ;;  %v7040_v48 = vld [vmem:[%s6918_s18 + $0x80] sm:$0xff] }
  0x1b   : > { %5997 = vrot.lane.b32.xlu1 %v6957_v21, %s6797_s23  ;;  %v7043_v49 = vld [vmem:[%s6918_s18 + $0x81] sm:$0xff]  ;;  %v6031_v51 = vpack.i.bf16 %v7040_v48, %v7037_v47  ;;  %v532_v56 = vld [vmem:[%s6918_s18 + $0x12] sm:$0xff] }
  0x1c   : > { %v7053_v52 = vpack.i.bf16 %v7043_v49, %v7017_v41  ;;  %v531_v55 = vld [vmem:[%s6918_s18 + $0x2] sm:$0xff]  ;;  %v534_v60 = vld [vmem:[%s6918_s18 + $0x32] sm:$0xff] }
  0x1d   : > { %5771 = vmatpush3.bf16.msra.mxu0 %v5768_v19  ;;  %v6041_v58 = vpack.i.bf16 %v532_v56, %v531_v55  ;;  %v4999_v59 = vld [vmem:[%s6918_s18 + $0x22] sm:$0xff]  ;;  %v536_v1 = vld [vmem:[%s6918_s18 + $0x52] sm:$0xff] }
  0x1e   : > { %5773 = vmatprep.subr.bf16.mxu0 %v5772_v27  ;;  %6002 = vrot.lane.b32.xlu0 %v6001_v28, %s6799_s28  ;;  %v7074_v61 = vpack.i.bf16 %v4999_v59, %v532_v56  ;;  %v7076_v62 = vpack.i.bf16 %v534_v60, %v4999_v59  ;;  %v5001_v63 = vld [vmem:[%s6918_s18 + $0x42] sm:$0xff]  ;;  %v538_v4 = vld [vmem:[%s6918_s18 + $0x72] sm:$0xff] }
  0x1f   : > { %6007 = vrot.lane.b32.xlu1 %v6981_v29, %s6798_s24  ;;  %v7083_v0 = vpack.i.bf16 %v5001_v63, %v534_v60  ;;  %v7090_v2 = vpack.i.bf16 %v536_v1, %v5001_v63  ;;  %v5003_v3 = vld [vmem:[%s6918_s18 + $0x62] sm:$0xff]  ;;  %v5064_v14 = vld [vmem:[%s9550_s2 + $0x190] sm:$0xff]  ;;  %v5065_v19 = vld [vmem:[%s9550_s2 + $0x198] sm:$0xff] }
  0x20   : > { %v5062_v5 = vld [vmem:[%s9550_s2 + $0x180] sm:$0xff]  ;;  %v7104_v8 = vpack.i.bf16 %v5003_v3, %v536_v1  ;;  %v7106_v9 = vpack.i.bf16 %v538_v4, %v5003_v3  ;;  %v5856_v20 = vpack.c.bf16 %v5065_v19, %v5064_v14  ;;  %v5068_v31 = vld [vmem:[%s9550_s2 + $0x1b0] sm:$0xff]  ;;  %v5077_v59 = vld [vmem:[%s9550_s2 + $0x1f8] sm:$0xff] }
  0x21   : > { %5775 = vmatpush3.bf16.msra.mxu0 %v5772_v27  ;;  %v5852_v7 = vpack.c.bf16 %v5063_v6, %v5062_v5  ;;  %v7109_v10 = vld [vmem:[%s6918_s18 + $0x82] sm:$0xff]  ;;  %v5072_v45 = vld [vmem:[%s9550_s2 + $0x1d0] sm:$0xff]  ;;  %v5033_v6 = vld [vmem:[%s9550_s2 + $0x98] sm:$0xff] }
  0x22   : > { %5777 = vmatprep.subr.bf16.mxu0 %v5776_v35  ;;  %6012 = vrot.lane.b32.xlu0 %v7003_v36, %s6797_s23  ;;  %v7122_v22 = vpack.i.bf16 %v7109_v10, %v538_v4  ;;  %v5066_v23 = vld [vmem:[%s9550_s2 + $0x1a0] sm:$0xff]  ;;  %v5067_v27 = vld [vmem:[%s9550_s2 + $0x1a8] sm:$0xff]  ;;  %v5013_v55 = vld [vmem:[%s6918_s18 + $0x90] sm:$0xff] }
  0x23   : > { %6017 = vrot.lane.b32.xlu1 %v6016_v37, %s6799_s28  ;;  %5853 = vmatprep.subr.bf16.mxu1 %v5852_v7  ;;  %v5860_v28 = vpack.c.bf16 %v5067_v27, %v5066_v23  ;;  %v5070_v38 = vld [vmem:[%s9550_s2 + $0x1c0] sm:$0xff]  ;;  %v5021_v56 = vld [vmem:[%s6918_s18 + $0x91] sm:$0xff] }
  0x24   : > { %5855 = vmatpush3.bf16.msra.mxu1 %v5852_v7  ;;  %v6156_v63 = vpack.i.bf16 %v5021_v56, %v7043_v49  ;;  %v515_v1 = vld [vmem:[%s6918_s18] sm:$0xff]  ;;  %v5032_v5 = vld [vmem:[%s9550_s2 + $0x90] sm:$0xff] }
  0x25   : > { %5779 = vmatpush3.bf16.msra.mxu0 %v5776_v35  ;;  %5857 = vmatprep.subr.bf16.mxu1 %v5856_v20  ;;  %v5069_v35 = vld [vmem:[%s9550_s2 + $0x1b8] sm:$0xff]  ;;  %v5792_v23 = vpack.c.bf16 %v5033_v6, %v5032_v5  ;;  %v5038_v5 = vld [vmem:[%s9550_s2 + $0xc0] sm:$0xff]  ;;  %v5039_v6 = vld [vmem:[%s9550_s2 + $0xc8] sm:$0xff] }
  0x26   : > { %5781 = vmatprep.subr.bf16.mxu0 %v5780_v42  ;;  %6022 = vrot.lane.b32.xlu0 %v7024_v43, %s6798_s24  ;;  %v5864_v37 = vpack.c.bf16 %v5069_v35, %v5068_v31 }
  0x27   : > { %6027 = vrot.lane.b32.xlu1 %v7028_v44, %s6797_s23 }
  0x28   : > { %5859 = vmatpush3.bf16.msra.mxu1 %v5856_v20 }
  0x29   : > { %5783 = vmatpush3.bf16.msra.mxu0 %v5780_v42  ;;  %5861 = vmatprep.subr.bf16.mxu1 %v5860_v28  ;;  %v5868_v42 = vpack.c.bf16 %v5071_v39, %v5070_v38 }
  0x2a   : > { %5785 = vmatprep.subr.bf16.mxu0 %v5784_v50  ;;  %6032 = vrot.lane.b32.xlu0 %v6031_v51, %s6799_s28  ;;  %v5074_v51 = vld [vmem:[%s9550_s2 + $0x1e0] sm:$0xff] }
  0x2b   : > { %6037 = vrot.lane.b32.xlu1 %v7053_v52, %s6798_s24  ;;  %v5876_v54 = vpack.c.bf16 %v5075_v53, %v5074_v51 }
  0x2c   : > { %5863 = vmatpush3.bf16.msra.mxu1 %v5860_v28 }
  0x2d   : > { %5787 = vmatpush3.bf16.msra.mxu0 %v5784_v50  ;;  %5865 = vmatprep.subr.bf16.mxu1 %v5864_v37  ;;  %v5872_v50 = vpack.c.bf16 %v5073_v46, %v5072_v45  ;;  %v5034_v45 = vld [vmem:[%s9550_s2 + $0xa0] sm:$0xff]  ;;  %v5035_v46 = vld [vmem:[%s9550_s2 + $0xa8] sm:$0xff] }
  0x2e   : > { %5789 = vmatprep.subr.bf16.mxu0 %v7063_v57  ;;  %6042 = vrot.lane.b32.xlu0 %v6041_v58, %s6797_s23  ;;  %v5076_v58 = vld [vmem:[%s9550_s2 + $0x1f0] sm:$0xff]  ;;  %v5796_v56 = vpack.c.bf16 %v5035_v46, %v5034_v45 }
  0x2f   : > { %6047 = vrot.lane.b32.xlu1 %v6939_v15, %s6799_s28  ;;  %v5880_v60 = vpack.c.bf16 %v5077_v59, %v5076_v58 }
  0x30   : > { %5867 = vmatpush3.bf16.msra.mxu1 %v5864_v37 }
  0x31   : > { %5869 = vmatprep.subr.bf16.mxu1 %v5868_v42 }
  0x32   : > { %6052 = vrot.lane.b32.xlu0 %v7074_v61, %s6798_s24 }
  0x33   : > { %6057 = vrot.lane.b32.xlu1 %v7076_v62, %s6797_s23 }
  0x34   : > { %5871 = vmatpush3.bf16.msra.mxu1 %v5868_v42 }
  0x35   : > { %5873 = vmatprep.subr.bf16.mxu1 %v5872_v50 }
  0x36   : > { %6062 = vrot.lane.b32.xlu0 %v6981_v29, %s6799_s28 }
  0x37   : > { %6067 = vrot.lane.b32.xlu1 %v7083_v0, %s6798_s24 }
  0x38   : > { %5875 = vmatpush3.bf16.msra.mxu1 %v5872_v50 }
  0x39   : > { %5877 = vmatprep.subr.bf16.mxu1 %v5876_v54 }
  0x3a   : > { %6072 = vrot.lane.b32.xlu0 %v7090_v2, %s6797_s23 }
  0x3b   : > { %6077 = vrot.lane.b32.xlu1 %v7024_v43, %s6799_s28 }
  0x3c   : > { %5879 = vmatpush3.bf16.msra.mxu1 %v5876_v54 }
  0x3d   : > { %5881 = vmatprep.subr.bf16.mxu1 %v5880_v60 }
  0x3e   : > { %6082 = vrot.lane.b32.xlu0 %v7104_v8, %s6798_s24 }
  0x3f   : > { %6087 = vrot.lane.b32.xlu1 %v7106_v9, %s6797_s23 }
  0x40   : > { %5883 = vmatpush3.bf16.msra.mxu1 %v5880_v60 }
  0x42   : > { %6092 = vrot.lane.b32.xlu0 %v7053_v52, %s6799_s28 }
  0x43   : > { %6097 = vrot.lane.b32.xlu1 %v7122_v22, %s6798_s24 }
  0x46   : > { %6102 = vrot.lane.b32.xlu0 %v6939_v15, %s6797_s23  ;;  %v6121_v15 = vpack.i.bf16 %v6993_v33, %v6969_v25 }
  0x47   : > { %6107 = vrot.lane.b32.xlu1 %v6106_v30, %s6799_s28 }
  0x4a   : > { %6112 = vrot.lane.b32.xlu0 %v6957_v21, %s6798_s24 }
  0x4b   : > { %6117 = vrot.lane.b32.xlu1 %v6981_v29, %s6797_s23  ;;  %v6136_v29 = vpack.i.bf16 %v7037_v47, %v6996_v34 }
  0x4e   : > { %6122 = vrot.lane.b32.xlu0 %v6121_v15, %s6799_s28 }
  0x4f   : > { %6127 = vrot.lane.b32.xlu1 %v7003_v36, %s6798_s24 }
  0x52   : > { %6132 = vrot.lane.b32.xlu0 %v7024_v43, %s6797_s23  ;;  %v6151_v43 = vpack.i.bf16 %v5013_v55, %v7040_v48 }
  0x53   : > { %6137 = vrot.lane.b32.xlu1 %v6136_v29, %s6799_s28 }
  0x56   : > { %6142 = vrot.lane.b32.xlu0 %v7028_v44, %s6798_s24 }
  0x57   : > { %6147 = vrot.lane.b32.xlu1 %v7053_v52, %s6797_s23 }
  0x5a   : > { %6152 = vrot.lane.b32.xlu0 %v6151_v43, %s6799_s28 }
  0x5b   : > { %6157 = vrot.lane.b32.xlu1 %v6156_v63, %s6798_s24 }
  0x5e   : > { %6162 = vrot.lane.b32.xlu0 %v7074_v61, %s6797_s23 }
  0x5f   : > { %6167 = vrot.lane.b32.xlu1 %v6957_v21, %s6799_s28  ;;  %v5029_v21 = vld [vmem:[%s6918_s18 + $0x92] sm:$0xff] }
  0x60   : > { %v6216_v52 = vpack.i.bf16 %v5029_v21, %v7109_v10 }
  0x62   : > { %6172 = vrot.lane.b32.xlu0 %v7076_v62, %s6798_s24 }
  0x63   : > { %6177 = vrot.lane.b32.xlu1 %v7083_v0, %s6797_s23 }
  0x66   : > { %6182 = vrot.lane.b32.xlu0 %v7003_v36, %s6799_s28 }
  0x67   : > { %6187 = vrot.lane.b32.xlu1 %v7090_v2, %s6798_s24 }
  0x6a   : > { %6192 = vrot.lane.b32.xlu0 %v7104_v8, %s6797_s23 }
  0x6b   : > { %6197 = vrot.lane.b32.xlu1 %v7028_v44, %s6799_s28 }
  0x6e   : > { %6202 = vrot.lane.b32.xlu0 %v7106_v9, %s6798_s24 }
  0x6f   : > { %6207 = vrot.lane.b32.xlu1 %v7122_v22, %s6797_s23 }
  0x72   : > { %6212 = vrot.lane.b32.xlu0 %v6156_v63, %s6799_s28  ;;  %v5037_v63 = vld [vmem:[%s9550_s2 + $0xb8] sm:$0xff] }
  0x73   : > { %6217 = vrot.lane.b32.xlu1 %v6216_v52, %s6798_s24 }
  0x88   : > { %v5983_v36 = vpop.permute.xlu0 %5982 }
  0x89   : > { %v5993_v61 = vpop.permute.xlu1 %5992  ;;  %v5985_v62 = vunpack.i.h.bf16 %v5983_v36  ;;  %v5984_v0 = vunpack.i.l.bf16 %v5983_v36 }
  0x8a   : > { %v5995_v44 = vunpack.i.h.bf16 %v5993_v61  ;;  %v5994_v2 = vunpack.i.l.bf16 %v5993_v61 }
  0x8b   : > { %v686_v14 = vsel %vm685_vm0, %v515_v1, %v5984_v0  ;;  %v687_v19 = vsel %vm685_vm0, %v6942_v16, %v5985_v62 }
  0x8c   : > { %v5988_v3 = vpop.permute.xlu0 %5987 }
  0x8d   : > { %v5998_v4 = vpop.permute.xlu1 %5997  ;;  %v5990_v7 = vunpack.i.h.bf16 %v5988_v3  ;;  %v5989_v8 = vunpack.i.l.bf16 %v5988_v3 }
  0x8e   : > { %v6000_v9 = vunpack.i.h.bf16 %v5998_v4  ;;  %v5999_v10 = vunpack.i.l.bf16 %v5998_v4 }
  0x8f   : > { %v695_v20 = vsel %vm694_vm1, %v686_v14, %v5989_v8  ;;  %v696_v22 = vsel %vm694_vm1, %v687_v19, %v5990_v7  ;;  %v5804_v19 = vpack.c.bf16 %v5039_v6, %v5038_v5 }
  0x90   : > { %v6003_v27 = vpop.permute.xlu0 %6002  ;;  %v704_v30 = vsel %vm703_vm2, %v695_v20, %v5994_v2  ;;  %v705_v31 = vsel %vm703_vm2, %v696_v22, %v5995_v44  ;;  %v688_v35 = vsel %vm685_vm0, %v6945_v17, %v5999_v10  ;;  %v689_v37 = vsel %vm685_vm0, %v6966_v24, %v6000_v9 }
  0x91   : > { %v6008_v28 = vpop.permute.xlu1 %6007  ;;  %v6005_v38 = vunpack.i.h.bf16 %v6003_v27  ;;  %v6004_v39 = vunpack.i.l.bf16 %v6003_v27  ;;  %5448 = vmatprep.mubr.f32.mxu0 %v704_v30  ;;  %v5040_v30 = vld [vmem:[%s9550_s2 + $0xd0] sm:$0xff] }
  0x92   : > { %v6010_v42 = vunpack.i.h.bf16 %v6008_v28  ;;  %v6009_v15 = vunpack.i.l.bf16 %v6008_v28  ;;  %5449 = vmatmul.mubr.f32.vlgmr.msra.gmra.mrb[0].mxu0 %v705_v31  ;;  %v5041_v31 = vld [vmem:[%s9550_s2 + $0xd8] sm:$0xff] }
  0x93   : > { %5791 = vmatpush3.bf16.msra.mxu0 %v7063_v57  ;;  %v697_v50 = vsel %vm694_vm1, %v688_v35, %v6004_v39  ;;  %v698_v29 = vsel %vm694_vm1, %v689_v37, %v6005_v38  ;;  %v5036_v57 = vld [vmem:[%s9550_s2 + $0xb0] sm:$0xff]  ;;  %v5808_v45 = vpack.c.bf16 %v5041_v31, %v5040_v30 }
  0x94   : > { %v6013_v51 = vpop.permute.xlu0 %6012  ;;  %v706_v54 = vsel %vm703_vm2, %v697_v50, %v6009_v15  ;;  %5793 = vmatprep.subr.bf16.mxu0 %v5792_v23  ;;  %v707_v55 = vsel %vm703_vm2, %v698_v29, %v6010_v42  ;;  %v5800_v1 = vpack.c.bf16 %v5037_v63, %v5036_v57  ;;  %v5042_v29 = vld [vmem:[%s9550_s2 + $0xe0] sm:$0xff] }
  0x95   : > { %v6018_v53 = vpop.permute.xlu1 %6017  ;;  %v6015_v58 = vunpack.i.h.bf16 %v6013_v51  ;;  %v6014_v59 = vunpack.i.l.bf16 %v6013_v51  ;;  %5451 = vmatprep.mubr.f32.mxu0 %v706_v54  ;;  %v5043_v51 = vld [vmem:[%s9550_s2 + $0xe8] sm:$0xff] }
  0x96   : > { %v6020_v60 = vunpack.i.h.bf16 %v6018_v53  ;;  %v6019_v43 = vunpack.i.l.bf16 %v6018_v53  ;;  %5452 = vmatmul.mubr.f32.gmra.mrb[2].mxu0 %v707_v55 }
  0x97   : > { %5795 = vmatpush3.bf16.msra.mxu0 %v5792_v23  ;;  %v690_v21 = vsel %vm685_vm0, %v6969_v25, %v6014_v59  ;;  %v691_v52 = vsel %vm685_vm0, %v6993_v33, %v6015_v58 }
  0x98   : > { %v6023_v36 = vpop.permute.xlu0 %6022  ;;  %5797 = vmatprep.subr.bf16.mxu0 %v5796_v56  ;;  %v699_v62 = vsel %vm694_vm1, %v690_v21, %v6019_v43  ;;  %v700_v0 = vsel %vm694_vm1, %v691_v52, %v6020_v60  ;;  %v5044_v60 = vld [vmem:[%s9550_s2 + $0xf0] sm:$0xff]  ;;  %v5045_v43 = vld [vmem:[%s9550_s2 + $0xf8] sm:$0xff] }
  0x99   : > { %v6028_v61 = vpop.permute.xlu1 %6027  ;;  %v6025_v44 = vunpack.i.h.bf16 %v6023_v36  ;;  %v6024_v2 = vunpack.i.l.bf16 %v6023_v36  ;;  %v5816_v36 = vpack.c.bf16 %v5045_v43, %v5044_v60 }
  0x9a   : > { %v6030_v3 = vunpack.i.h.bf16 %v6028_v61  ;;  %v6029_v4 = vunpack.i.l.bf16 %v6028_v61 }
  0x9b   : > { %5799 = vmatpush3.bf16.msra.mxu0 %v5796_v56  ;;  %v708_v7 = vsel %vm703_vm2, %v699_v62, %v6024_v2  ;;  %v709_v8 = vsel %vm703_vm2, %v700_v0, %v6025_v44  ;;  %v5812_v56 = vpack.c.bf16 %v5043_v51, %v5042_v29  ;;  %v5046_v62 = vld [vmem:[%s9550_s2 + $0x100] sm:$0xff]  ;;  %v5047_v0 = vld [vmem:[%s9550_s2 + $0x108] sm:$0xff] }
  0x9c   : > { %v6033_v9 = vpop.permute.xlu0 %6032  ;;  %5454 = vmatprep.mubr.f32.mxu0 %v708_v7  ;;  %5801 = vmatprep.subr.bf16.mxu0 %v5800_v1  ;;  %v692_v14 = vsel %vm685_vm0, %v6996_v34, %v6029_v4  ;;  %v693_v20 = vsel %vm685_vm0, %v7037_v47, %v6030_v3  ;;  %v5820_v6 = vpack.c.bf16 %v5047_v0, %v5046_v62 }
  0x9d   : > { %v6038_v10 = vpop.permute.xlu1 %6037  ;;  %v6035_v22 = vunpack.i.h.bf16 %v6033_v9  ;;  %v6034_v23 = vunpack.i.l.bf16 %v6033_v9  ;;  %5455 = vmatmul.mubr.f32.gmra.mrb[4].mxu0 %v709_v8 }
  0x9e   : > { %v6040_v27 = vunpack.i.h.bf16 %v6038_v10  ;;  %v6039_v28 = vunpack.i.l.bf16 %v6038_v10 }
  0x9f   : > { %5803 = vmatpush3.bf16.msra.mxu0 %v5800_v1  ;;  %v701_v35 = vsel %vm694_vm1, %v692_v14, %v6034_v23  ;;  %v702_v37 = vsel %vm694_vm1, %v693_v20, %v6035_v22  ;;  %v5048_v14 = vld [vmem:[%s9550_s2 + $0x110] sm:$0xff] }
  0xa0   : > { %v6043_v38 = vpop.permute.xlu0 %6042  ;;  %v710_v42 = vsel %vm703_vm2, %v701_v35, %v6039_v28  ;;  %5805 = vmatprep.subr.bf16.mxu0 %v5804_v19  ;;  %v711_v15 = vsel %vm703_vm2, %v702_v37, %v6040_v27 }
  0xa1   : > { %v6048_v39 = vpop.permute.xlu1 %6047  ;;  %v6044_v46 = vunpack.i.l.bf16 %v6043_v38  ;;  %5457 = vmatprep.mubr.f32.mxu0 %v710_v42  ;;  %v6045_v57 = vunpack.i.h.bf16 %v6043_v38 }
  0xa2   : > { %v6049_v50 = vunpack.i.l.bf16 %v6048_v39  ;;  %5458 = vmatmul.mubr.f32.gmra.mrb[6].mxu0 %v711_v15  ;;  %v6050_v61 = vunpack.i.h.bf16 %v6048_v39 }
  0xa3   : > { %5807 = vmatpush3.bf16.msra.mxu0 %v5804_v19  ;;  %v921_v53 = vsel %vm685_vm0, %v6927_v11, %v6044_v46  ;;  %v922_v1 = vsel %vm685_vm0, %v6930_v12, %v6045_v57  ;;  %v5049_v19 = vld [vmem:[%s9550_s2 + $0x118] sm:$0xff]  ;;  %v5050_v46 = vld [vmem:[%s9550_s2 + $0x120] sm:$0xff] }
  0xa4   : > { %v6053_v54 = vpop.permute.xlu0 %6052  ;;  %5809 = vmatprep.subr.bf16.mxu0 %v5808_v45  ;;  %v929_v58 = vsel %vm694_vm1, %v921_v53, %v6049_v50  ;;  %v930_v10 = vsel %vm694_vm1, %v922_v1, %v6050_v61  ;;  %v5824_v38 = vpack.c.bf16 %v5049_v19, %v5048_v14  ;;  %v5051_v50 = vld [vmem:[%s9550_s2 + $0x128] sm:$0xff] }
  0xa5   : > { %v6058_v55 = vpop.permute.xlu1 %6057  ;;  %v6054_v59 = vunpack.i.l.bf16 %v6053_v54  ;;  %v6055_v3 = vunpack.i.h.bf16 %v6053_v54  ;;  %v5828_v60 = vpack.c.bf16 %v5051_v50, %v5050_v46 }
  0xa6   : > { %v6059_v11 = vunpack.i.l.bf16 %v6058_v55  ;;  %v6060_v44 = vunpack.i.h.bf16 %v6058_v55 }
  0xa7   : > { %5811 = vmatpush3.bf16.msra.mxu0 %v5808_v45  ;;  %v937_v63 = vsel %vm703_vm2, %v929_v58, %v6054_v59  ;;  %v938_v37 = vsel %vm703_vm2, %v930_v10, %v6055_v3  ;;  %v5055_v10 = vld [vmem:[%s9550_s2 + $0x148] sm:$0xff] }
  0xa8   : > { %v6063_v21 = vpop.permute.xlu0 %6062  ;;  %5813 = vmatprep.subr.bf16.mxu0 %v5812_v56  ;;  %5492 = vmatprep.mubr.f32.mxu0 %v937_v63  ;;  %v923_v7 = vsel %vm685_vm0, %v6933_v13, %v6059_v11  ;;  %v924_v28 = vsel %vm685_vm0, %v6948_v18, %v6060_v44 }
  0xa9   : > { %v6068_v52 = vpop.permute.xlu1 %6067  ;;  %v6064_v2 = vunpack.i.l.bf16 %v6063_v21  ;;  %v6065_v20 = vunpack.i.h.bf16 %v6063_v21 }
  0xaa   : > { %v6069_v22 = vunpack.i.l.bf16 %v6068_v52  ;;  %v6070_v39 = vunpack.i.h.bf16 %v6068_v52  ;;  %v5052_v52 = vld [vmem:[%s9550_s2 + $0x130] sm:$0xff] }
  0xab   : > { %5815 = vmatpush3.bf16.msra.mxu0 %v5812_v56  ;;  %v931_v27 = vsel %vm694_vm1, %v923_v7, %v6064_v2  ;;  %v932_v53 = vsel %vm694_vm1, %v924_v28, %v6065_v20 }
  0xac   : > { %v6073_v4 = vpop.permute.xlu0 %6072  ;;  %5817 = vmatprep.subr.bf16.mxu0 %v5816_v36  ;;  %v939_v51 = vsel %vm703_vm2, %v931_v27, %v6069_v22  ;;  %v940_v21 = vsel %vm703_vm2, %v932_v53, %v6070_v39 }
  0xad   : > { %v6078_v5 = vpop.permute.xlu1 %6077  ;;  %v6074_v8 = vunpack.i.l.bf16 %v6073_v4  ;;  %v6075_v23 = vunpack.i.h.bf16 %v6073_v4 }
  0xae   : > { %v6079_v9 = vunpack.i.l.bf16 %v6078_v5  ;;  %v6080_v29 = vunpack.i.h.bf16 %v6078_v5 }
  0xaf   : > { %5819 = vmatpush3.bf16.msra.mxu0 %v5816_v36  ;;  %v925_v30 = vsel %vm685_vm0, %v6972_v26, %v6074_v8  ;;  %v926_v55 = vsel %vm685_vm0, %v6990_v32, %v6075_v23  ;;  %v5053_v36 = vld [vmem:[%s9550_s2 + $0x138] sm:$0xff] }
  0xb0   : > { %v6083_v31 = vpop.permute.xlu0 %6082  ;;  %5821 = vmatprep.subr.bf16.mxu0 %v5820_v6  ;;  %v933_v45 = vsel %vm694_vm1, %v925_v30, %v6079_v9  ;;  %v934_v62 = vsel %vm694_vm1, %v926_v55, %v6080_v29  ;;  %v5832_v4 = vpack.c.bf16 %v5053_v36, %v5052_v52  ;;  %v5054_v9 = vld [vmem:[%s9550_s2 + $0x140] sm:$0xff]  ;;  %v5060_v29 = vld [vmem:[%s9550_s2 + $0x170] sm:$0xff] }
  0xb1   : > { %v6088_v35 = vpop.permute.xlu1 %6087  ;;  %v6084_v42 = vunpack.i.l.bf16 %v6083_v31  ;;  %v6085_v57 = vunpack.i.h.bf16 %v6083_v31  ;;  %v5836_v23 = vpack.c.bf16 %v5055_v10, %v5054_v9  ;;  %v5056_v31 = vld [vmem:[%s9550_s2 + $0x150] sm:$0xff] }
  0xb2   : > { %v6089_v15 = vunpack.i.l.bf16 %v6088_v35  ;;  %5493 = vmatmul.mubr.f32.vlgmr.msra.gmra.mrb[8].mxu0 %v938_v37  ;;  %v6090_v54 = vunpack.i.h.bf16 %v6088_v35  ;;  %v5057_v35 = vld [vmem:[%s9550_s2 + $0x158] sm:$0xff] }
  0xb3   : > { %5495 = vmatprep.mubr.f32.mxu0 %v939_v51  ;;  %5823 = vmatpush3.bf16.msra.mxu0 %v5820_v6  ;;  %v941_v59 = vsel %vm703_vm2, %v933_v45, %v6084_v42  ;;  %v942_v8 = vsel %vm703_vm2, %v934_v62, %v6085_v57  ;;  %v5840_v39 = vpack.c.bf16 %v5057_v35, %v5056_v31  ;;  %v5058_v42 = vld [vmem:[%s9550_s2 + $0x160] sm:$0xff]  ;;  %v5061_v51 = vld [vmem:[%s9550_s2 + $0x178] sm:$0xff] }
  0xb4   : > { %v6093_v56 = vpop.permute.xlu0 %6092  ;;  %5825 = vmatprep.subr.bf16.mxu0 %v5824_v38  ;;  %v927_v43 = vsel %vm685_vm0, %v7014_v40, %v6089_v15  ;;  %v928_v1 = vsel %vm685_vm0, %v7017_v41, %v6090_v54  ;;  %v5059_v15 = vld [vmem:[%s9550_s2 + $0x168] sm:$0xff] }
  0xb5   : > { %v6098_v58 = vpop.permute.xlu1 %6097  ;;  %v6094_v63 = vunpack.i.l.bf16 %v6093_v56  ;;  %v6095_v61 = vunpack.i.h.bf16 %v6093_v56  ;;  %v5844_v50 = vpack.c.bf16 %v5059_v15, %v5058_v42 }
  0xb6   : > { %v6099_v11 = vunpack.i.l.bf16 %v6098_v58  ;;  %5496 = vmatmul.mubr.f32.gmra.mrb[10].mxu0 %v940_v21  ;;  %v6100_v5 = vunpack.i.h.bf16 %v6098_v58 }
  0xb7   : > { %5498 = vmatprep.mubr.f32.mxu0 %v941_v59  ;;  %5827 = vmatpush3.bf16.msra.mxu0 %v5824_v38  ;;  %v935_v0 = vsel %vm694_vm1, %v927_v43, %v6094_v63  ;;  %v936_v14 = vsel %vm694_vm1, %v928_v1, %v6095_v61  ;;  %v5848_v59 = vpack.c.bf16 %v5061_v51, %v5060_v29 }
  0xb8   : > { %v6103_v44 = vpop.permute.xlu0 %6102  ;;  %5829 = vmatprep.subr.bf16.mxu0 %v5828_v60  ;;  %v943_v3 = vsel %vm703_vm2, %v935_v0, %v6099_v11  ;;  %v944_v30 = vsel %vm703_vm2, %v936_v14, %v6100_v5 }
  0xb9   : > { %v7344_v2 = vpop.permute.xlu1 %6107  ;;  %v6104_v6 = vunpack.i.l.bf16 %v6103_v44  ;;  %v6105_v53 = vunpack.i.h.bf16 %v6103_v44 }
  0xba   : > { %v6109_v7 = vunpack.i.l.bf16 %v7344_v2  ;;  %5499 = vmatmul.mubr.f32.gmra.mrb[12].mxu0 %v942_v8 }
  0xbb   : > { %5501 = vmatprep.mubr.f32.mxu0 %v943_v3  ;;  %5831 = vmatpush3.bf16.msra.mxu0 %v5828_v60  ;;  %v1155_v19 = vsel %vm685_vm0, %v6942_v16, %v6104_v6  ;;  %v6110_v60 = vunpack.i.h.bf16 %v7344_v2  ;;  %v1156_v63 = vsel %vm685_vm0, %v6945_v17, %v6105_v53 }
  0xbc   : > { %v7358_v20 = vpop.permute.xlu0 %6112  ;;  %5833 = vmatprep.subr.bf16.mxu0 %v5832_v4  ;;  %v1163_v27 = vsel %vm694_vm1, %v1155_v19, %v6109_v7 }
  0xbd   : > { %v6118_v22 = vpop.permute.xlu1 %6117  ;;  %v6114_v28 = vunpack.i.l.bf16 %v7358_v20  ;;  %v6115_v61 = vunpack.i.h.bf16 %v7358_v20  ;;  %v1164_v2 = vsel %vm694_vm1, %v1156_v63, %v6110_v60 }
  0xbe   : > { %5502 = vmatmul.mubr.f32.gmra.mrb[14].mxu0 %v944_v30  ;;  %v6120_v54 = vunpack.i.h.bf16 %v6118_v22  ;;  %v6119_v55 = vunpack.i.l.bf16 %v6118_v22 }
  0xbf   : > { %5835 = vmatpush3.bf16.msra.mxu0 %v5832_v4  ;;  %v1171_v16 = vsel %vm703_vm2, %v1163_v27, %v6114_v28  ;;  %v1172_v10 = vsel %vm703_vm2, %v1164_v2, %v6115_v61 }
  0xc0   : > { %v6123_v37 = vpop.permute.xlu0 %6122  ;;  %5837 = vmatprep.subr.bf16.mxu0 %v5836_v23  ;;  %5536 = vmatprep.mubr.f32.mxu0 %v1171_v16  ;;  %v1157_v11 = vsel %vm685_vm0, %v6966_v24, %v6119_v55  ;;  %v1158_v21 = vsel %vm685_vm0, %v6969_v25, %v6120_v54 }
  0xc1   : > { %v6128_v38 = vpop.permute.xlu1 %6127  ;;  %v6125_v43 = vunpack.i.h.bf16 %v6123_v37  ;;  %v6124_v57 = vunpack.i.l.bf16 %v6123_v37 }
  0xc2   : > { %v6130_v62 = vunpack.i.h.bf16 %v6128_v38  ;;  %v6129_v0 = vunpack.i.l.bf16 %v6128_v38 }
  0xc3   : > { %5839 = vmatpush3.bf16.msra.mxu0 %v5836_v23  ;;  %v1165_v17 = vsel %vm694_vm1, %v1157_v11, %v6124_v57  ;;  %v1166_v24 = vsel %vm694_vm1, %v1158_v21, %v6125_v43 }
  0xc4   : > { %v6133_v45 = vpop.permute.xlu0 %6132  ;;  %5841 = vmatprep.subr.bf16.mxu0 %v5840_v39  ;;  %v1173_v14 = vsel %vm703_vm2, %v1165_v17, %v6129_v0  ;;  %v1174_v19 = vsel %vm703_vm2, %v1166_v24, %v6130_v62 }
  0xc5   : > { %v6138_v46 = vpop.permute.xlu1 %6137  ;;  %v6135_v52 = vunpack.i.h.bf16 %v6133_v45  ;;  %v6134_v36 = vunpack.i.l.bf16 %v6133_v45 }
  0xc6   : > { %v6140_v3 = vunpack.i.h.bf16 %v6138_v46  ;;  %v6139_v4 = vunpack.i.l.bf16 %v6138_v46 }
  0xc7   : > { %5843 = vmatpush3.bf16.msra.mxu0 %v5840_v39  ;;  %v1159_v5 = vsel %vm685_vm0, %v6993_v33, %v6134_v36  ;;  %v1160_v6 = vsel %vm685_vm0, %v6996_v34, %v6135_v52 }
  0xc8   : > { %v7382_v56 = vpop.permute.xlu0 %6142  ;;  %5845 = vmatprep.subr.bf16.mxu0 %v5844_v50  ;;  %v1167_v34 = vsel %vm694_vm1, %v1159_v5, %v6139_v4  ;;  %v1168_v30 = vsel %vm694_vm1, %v1160_v6, %v6140_v3 }
  0xc9   : > { %v6148_v58 = vpop.permute.xlu1 %6147  ;;  %v6145_v28 = vunpack.i.h.bf16 %v7382_v56  ;;  %v6144_v33 = vunpack.i.l.bf16 %v7382_v56 }
  0xca   : > { %v6149_v25 = vunpack.i.l.bf16 %v6148_v58  ;;  %v6150_v7 = vunpack.i.h.bf16 %v6148_v58 }
  0xcb   : > { %5847 = vmatpush3.bf16.msra.mxu0 %v5844_v50  ;;  %v1176_v54 = vsel %vm703_vm2, %v1168_v30, %v6145_v28 }
  0xcc   : > { %v6153_v1 = vpop.permute.xlu0 %6152  ;;  %5849 = vmatprep.subr.bf16.mxu0 %v5848_v59  ;;  %v1161_v37 = vsel %vm685_vm0, %v7037_v47, %v6149_v25  ;;  %v1162_v46 = vsel %vm685_vm0, %v7040_v48, %v6150_v7 }
  0xcd   : > { %v7392_v44 = vpop.permute.xlu1 %6157  ;;  %v6154_v31 = vunpack.i.l.bf16 %v6153_v1  ;;  %v6155_v38 = vunpack.i.h.bf16 %v6153_v1 }
  0xce   : > { %v6159_v53 = vunpack.i.l.bf16 %v7392_v44  ;;  %v6160_v48 = vunpack.i.h.bf16 %v7392_v44 }
  0xcf   : > { %5851 = vmatpush3.bf16.msra.mxu0 %v5848_v59  ;;  %v1169_v56 = vsel %vm694_vm1, %v1161_v37, %v6154_v31  ;;  %v1170_v60 = vsel %vm694_vm1, %v1162_v46, %v6155_v38  ;;  %v1918_v46 = vld [vmem:[%s7468_s19 + $0x8] sm:$0xff] }
  0xd0   : > { %v6163_v8 = vpop.permute.xlu0 %6162  ;;  %v1177_v36 = vsel %vm703_vm2, %v1169_v56, %v6159_v53  ;;  %v1950_v53 = vld [vmem:[%s9556_s8 + $0x8] sm:$0xff]  ;;  %v1925_v56 = vld [vmem:[%s7468_s19 + $0x40] sm:$0xff] }
  0xd1   : > { %v6168_v9 = vpop.permute.xlu1 %6167  ;;  %v6165_v20 = vunpack.i.h.bf16 %v6163_v8  ;;  %v6164_v22 = vunpack.i.l.bf16 %v6163_v8 }
  0xd2   : > { %v6170_v23 = vunpack.i.h.bf16 %v6168_v9  ;;  %v6169_v27 = vunpack.i.l.bf16 %v6168_v9  ;;  %5537 = vmatmul.mubr.f32.vlgmr.msra.gmra.mrb[16].mxu0 %v1172_v10 }
  0xd3   : > { %5539 = vmatprep.mubr.f32.mxu0 %v1173_v14  ;;  %v1381_v35 = vsel %vm685_vm0, %v6930_v12, %v6164_v22  ;;  %v1382_v16 = vsel %vm685_vm0, %v6933_v13, %v6165_v20  ;;  %v1175_v13 = vsel %vm703_vm2, %v1167_v34, %v6144_v33 }
  0xd4   : > { %v6173_v39 = vpop.permute.xlu0 %6172  ;;  %v1389_v15 = vsel %vm694_vm1, %v1381_v35, %v6169_v27  ;;  %v1390_v45 = vsel %vm694_vm1, %v1382_v16, %v6170_v23 }
  0xd5   : > { %v6178_v42 = vpop.permute.xlu1 %6177  ;;  %v6175_v50 = vunpack.i.h.bf16 %v6173_v39  ;;  %v6174_v29 = vunpack.i.l.bf16 %v6173_v39  ;;  %v1955_v39 = vld [vmem:[%s9557_s9 + $0x10] sm:$0xff] }
  0xd6   : > { %v6180_v51 = vunpack.i.h.bf16 %v6178_v42  ;;  %v6179_v12 = vunpack.i.l.bf16 %v6178_v42  ;;  %5540 = vmatmul.mubr.f32.gmra.mrb[18].mxu0 %v1174_v19  ;;  %v1956_v42 = vld [vmem:[%s9557_s9 + $0x18] sm:$0xff] }
  0xd7   : > { %5542 = vmatprep.mubr.f32.mxu0 %v1175_v13  ;;  %v1397_v47 = vsel %vm703_vm2, %v1389_v15, %v6174_v29  ;;  %v1398_v55 = vsel %vm703_vm2, %v1390_v45, %v6175_v50  ;;  %v5888_v15 = vpack.c.bf16 %v1956_v42, %v1955_v39  ;;  %v1917_v45 = vld [vmem:[%s7468_s19] sm:$0xff]  ;;  %v1919_v50 = vld [vmem:[%s7468_s19 + $0x10] sm:$0xff]  ;;  %v1920_v29 = vld [vmem:[%s7468_s19 + $0x18] sm:$0xff] }
  0xd8   : > { %v6183_v58 = vpop.permute.xlu0 %6182  ;;  %5580 = vmatprep.mubr.f32.mxu1 %v1397_v47  ;;  %v1383_v43 = vsel %vm685_vm0, %v6948_v18, %v6179_v12  ;;  %v1384_v57 = vsel %vm685_vm0, %v6972_v26, %v6180_v51  ;;  %v1178_v18 = vsel %vm703_vm2, %v1170_v60, %v6160_v48  ;;  %v1921_v51 = vld [vmem:[%s7468_s19 + $0x20] sm:$0xff]  ;;  %v1922_v47 = vld [vmem:[%s7468_s19 + $0x28] sm:$0xff] }
  0xd9   : > { %v6188_v59 = vpop.permute.xlu1 %6187  ;;  %v6185_v63 = vunpack.i.h.bf16 %v6183_v58  ;;  %v6184_v11 = vunpack.i.l.bf16 %v6183_v58  ;;  %5581 = vmatmul.mubr.f32.vlgmr.msra.gmra.mrb[0].mxu1 %v1398_v55  ;;  %v1949_v12 = vld [vmem:[%s9556_s8] sm:$0xff]  ;;  %v1924_v55 = vld [vmem:[%s7468_s19 + $0x38] sm:$0xff]  ;;  %v1926_v48 = vld [vmem:[%s7468_s19 + $0x48] sm:$0xff] }
  0xda   : > { %v6190_v21 = vunpack.i.h.bf16 %v6188_v59  ;;  %v6189_v52 = vunpack.i.l.bf16 %v6188_v59  ;;  %5543 = vmatmul.mubr.f32.gmra.mrb[20].mxu0 %v1176_v54  ;;  %v5892_v13 = vpack.c.bf16 %v1950_v53, %v1949_v12  ;;  %v1923_v54 = vld [vmem:[%s7468_s19 + $0x30] sm:$0xff]  ;;  %v1928_v59 = vld [vmem:[%s7468_s19 + $0x58] sm:$0xff]  ;;  %v1929_v60 = vld [vmem:[%s7468_s19 + $0x60] sm:$0xff] }
  0xdb   : > { %5545 = vmatprep.mubr.f32.mxu0 %v1177_v36  ;;  %v1391_v61 = vsel %vm694_vm1, %v1383_v43, %v6184_v11  ;;  %v1392_v62 = vsel %vm694_vm1, %v1384_v57, %v6185_v63  ;;  %v1927_v58 = vld [vmem:[%s7468_s19 + $0x50] sm:$0xff]  ;;  %v1930_v43 = vld [vmem:[%s7468_s19 + $0x68] sm:$0xff]  ;;  %v1932_v63 = vld [vmem:[%s7468_s19 + $0x78] sm:$0xff] }
  0xdc   : > { %v6193_v0 = vpop.permute.xlu0 %6192  ;;  %v1399_v44 = vsel %vm703_vm2, %v1391_v61, %v6189_v52  ;;  %v1400_v26 = vsel %vm703_vm2, %v1392_v62, %v6190_v21  ;;  %v1931_v57 = vld [vmem:[%s7468_s19 + $0x70] sm:$0xff]  ;;  %v1933_v11 = vld [vmem:[%s7468_s19 + $0x80] sm:$0xff]  ;;  %v1934_v21 = vld [vmem:[%s7468_s19 + $0x88] sm:$0xff] }
  0xdd   : > { %v6198_v1 = vpop.permute.xlu1 %6197  ;;  %v6195_v2 = vunpack.i.h.bf16 %v6193_v0  ;;  %v6194_v17 = vunpack.i.l.bf16 %v6193_v0  ;;  %5583 = vmatprep.mubr.f32.mxu1 %v1399_v44  ;;  %v1935_v36 = vld [vmem:[%s7468_s19 + $0x90] sm:$0xff]  ;;  %v1936_v62 = vld [vmem:[%s7468_s19 + $0x98] sm:$0xff]  ;;  %v7519_v0 = vld [vmem:[%s9551_s3] ss:$0 sm:$0xff] }
  0xde   : > { %v6200_v24 = vunpack.i.h.bf16 %v6198_v1  ;;  %v6199_v3 = vunpack.i.l.bf16 %v6198_v1  ;;  %5546 = vmatmul.mubr.f32.gmra.mrb[22].mxu0 %v1178_v18  ;;  %5584 = vmatmul.mubr.f32.gmra.mrb[2].mxu1 %v1400_v26  ;;  %v1937_v18 = vld [vmem:[%s7468_s19 + $0xa0] sm:$0xff]  ;;  %v1938_v26 = vld [vmem:[%s7468_s19 + $0xa8] sm:$0xff] }
  0xdf   : > { %v1385_v4 = vsel %vm685_vm0, %v6990_v32, %v6194_v17  ;;  %v1386_v25 = vsel %vm685_vm0, %v7014_v40, %v6195_v2  ;;  %5600 = vmatprep.mubr.msk.f32.mxu0 %vm685_vm0, %v1917_v45  ;;  %v1946_v39 = vld [vmem:[%s7468_s19 + $0xe8] sm:$0xff] }
  0xe0   : > { %v6203_v5 = vpop.permute.xlu0 %6202  ;;  %v1393_v7 = vsel %vm694_vm1, %v1385_v4, %v6199_v3  ;;  %v1394_v8 = vsel %vm694_vm1, %v1386_v25, %v6200_v24  ;;  %v1939_v24 = vld [vmem:[%s7468_s19 + $0xb0] sm:$0xff]  ;;  %v1940_v3 = vld [vmem:[%s7468_s19 + $0xb8] sm:$0xff] }
  0xe1   : > { %v6208_v6 = vpop.permute.xlu1 %6207  ;;  %v6205_v9 = vunpack.i.h.bf16 %v6203_v5  ;;  %v6204_v10 = vunpack.i.l.bf16 %v6203_v5 }
  0xe2   : > { %v6210_v14 = vunpack.i.h.bf16 %v6208_v6  ;;  %v6209_v19 = vunpack.i.l.bf16 %v6208_v6 }
  0xe3   : > { %v1401_v20 = vsel %vm703_vm2, %v1393_v7, %v6204_v10  ;;  %v1402_v22 = vsel %vm703_vm2, %v1394_v8, %v6205_v9  ;;  %v1941_v8 = vld [vmem:[%s7468_s19 + $0xc0] sm:$0xff]  ;;  %v1942_v9 = vld [vmem:[%s7468_s19 + $0xc8] sm:$0xff] }
  0xe4   : > { %v6213_v23 = vpop.permute.xlu0 %6212  ;;  %5586 = vmatprep.mubr.f32.mxu1 %v1401_v20  ;;  %v1387_v40 = vsel %vm685_vm0, %v7017_v41, %v6209_v19  ;;  %v1388_v27 = vsel %vm685_vm0, %v7043_v49, %v6210_v14  ;;  %v1953_v41 = vld [vmem:[%s9557_s9] sm:$0xff]  ;;  %v1954_v49 = vld [vmem:[%s9557_s9 + $0x8] sm:$0xff] }
  0xe5   : > { %v6218_v32 = vpop.permute.xlu1 %6217  ;;  %v6215_v28 = vunpack.i.h.bf16 %v6213_v23  ;;  %v6214_v33 = vunpack.i.l.bf16 %v6213_v23  ;;  %5587 = vmatmul.mubr.f32.gmra.mrb[4].mxu1 %v1402_v22  ;;  %v5884_v38 = vpack.c.bf16 %v1954_v49, %v1953_v41  ;;  %v1945_v49 = vld [vmem:[%s7468_s19 + $0xe0] sm:$0xff] }
  0xe6   : > { %v6220_v34 = vunpack.i.h.bf16 %v6218_v32  ;;  %v6219_v30 = vunpack.i.l.bf16 %v6218_v32 }
  0xe7   : > { %v1395_v31 = vsel %vm694_vm1, %v1387_v40, %v6214_v33  ;;  %v1396_v35 = vsel %vm694_vm1, %v1388_v27, %v6215_v28  ;;  %5885 = vmatprep.subr.bf16.mxu0 %v5884_v38  ;;  %v1943_v28 = vld [vmem:[%s7468_s19 + $0xd0] sm:$0xff] }
  0xe8   : > { %v1403_v16 = vsel %vm703_vm2, %v1395_v31, %v6219_v30  ;;  %v1404_v37 = vsel %vm703_vm2, %v1396_v35, %v6220_v34  ;;  %5887 = vmatpush3.bf16.msra.mxu0 %v5884_v38  ;;  %v1944_v30 = vld [vmem:[%s7468_s19 + $0xd8] sm:$0xff] }
  0xe9   : > { %5589 = vmatprep.mubr.f32.mxu1 %v1403_v16  ;;  %5889 = vmatprep.subr.bf16.mxu0 %v5888_v15 }
  0xea   : > { %5590 = vmatmul.mubr.f32.gmra.mrb[6].mxu1 %v1404_v37 }
  0xec   : > { %5891 = vmatpush3.bf16.msra.mxu0 %v5888_v15 }
  0xed   : > { %5893 = vmatprep.subr.bf16.mxu0 %v5892_v13 }
  0xef   : > { %5601 = vmatmul.mubr.msk.f32.vlgmr.msra.gmra.mrb[24].mxu0 %vm685_vm0, %v1918_v46 }
  0xf0   : > { %5603 = vmatprep.mubr.msk.f32.mxu0 %vm685_vm0, %v1919_v50  ;;  %5895 = vmatpush3.bf16.msra.mxu0 %v5892_v13  ;;  %v1951_v50 = vld [vmem:[%s9556_s8 + $0x10] sm:$0xff] }
  0xf3   : > { %5604 = vmatmul.mubr.msk.f32.gmra.mrb[26].mxu0 %vm685_vm0, %v1920_v29  ;;  %v1952_v29 = vld [vmem:[%s9556_s8 + $0x18] sm:$0xff] }
  0xf4   : > { %5606 = vmatprep.mubr.msk.f32.mxu0 %vm685_vm0, %v1921_v51  ;;  %v5896_v13 = vpack.c.bf16 %v1952_v29, %v1951_v50 }
  0xf6   : > { %5897 = vmatprep.subr.bf16.mxu0 %v5896_v13 }
  0xf7   : > { %5607 = vmatmul.mubr.msk.f32.gmra.mrb[28].mxu0 %vm685_vm0, %v1922_v47  ;;  %v1947_v47 = vld [vmem:[%s7468_s19 + $0xf0] sm:$0xff] }
  0xf8   : > { %5609 = vmatprep.mubr.msk.f32.mxu0 %vm685_vm0, %v1923_v54  ;;  %v1948_v54 = vld [vmem:[%s7468_s19 + $0xf8] sm:$0xff]  ;;  %5899 = vmatpush3.bf16.msra.mxu0 %v5896_v13  ;;  %s6802_s19 = smov 80  }
  0xfb   : > { %5610 = vmatmul.mubr.msk.f32.gmra.mrb[30].mxu0 %vm685_vm0, %v1924_v55 }
  0xfc   : > { %5612 = vmatprep.mubr.msk.f32.mxu0 %vm685_vm0, %v1925_v56 }
  0xff   : > { %5613 = vmatmul.mubr.msk.f32.gmra.mrb[32].mxu0 %vm685_vm0, %v1926_v48 }
 0x100   : > { %5615 = vmatprep.mubr.msk.f32.mxu0 %vm685_vm0, %v1927_v58 }
 0x103   : > { %5616 = vmatmul.mubr.msk.f32.gmra.mrb[34].mxu0 %vm685_vm0, %v1928_v59 }
 0x104   : > { %5618 = vmatprep.mubr.msk.f32.mxu0 %vm685_vm0, %v1929_v60 }
 0x107   : > { %5619 = vmatmul.mubr.msk.f32.gmra.mrb[36].mxu0 %vm685_vm0, %v1930_v43 }
 0x108   : > { %5621 = vmatprep.mubr.msk.f32.mxu0 %vm685_vm0, %v1931_v57 }
 0x10b   : > { %5622 = vmatmul.mubr.msk.f32.gmra.mrb[38].mxu0 %vm685_vm0, %v1932_v63 }
 0x10c   : > { %5624 = vmatprep.mubr.msk.f32.mxu0 %vm685_vm0, %v1933_v11 }
 0x10f   : > { %5625 = vmatmul.mubr.msk.f32.gmra.mrb[40].mxu0 %vm685_vm0, %v1934_v21 }
 0x110   : > { %5627 = vmatprep.mubr.msk.f32.mxu0 %vm685_vm0, %v1935_v36 }
 0x113   : > { %5628 = vmatmul.mubr.msk.f32.gmra.mrb[42].mxu0 %vm685_vm0, %v1936_v62 }
 0x114   : > { %5630 = vmatprep.mubr.msk.f32.mxu0 %vm685_vm0, %v1937_v18 }
 0x117   : > { %5631 = vmatmul.mubr.msk.f32.gmra.mrb[44].mxu0 %vm685_vm0, %v1938_v26 }
 0x118   : > { %5633 = vmatprep.mubr.msk.f32.mxu0 %vm685_vm0, %v1939_v24 }
 0x11b   : > { %5634 = vmatmul.mubr.msk.f32.gmra.mrb[46].mxu0 %vm685_vm0, %v1940_v3 }
 0x11c   : > { %5636 = vmatprep.mubr.msk.f32.mxu0 %vm685_vm0, %v1941_v8 }
 0x11f   : > { %5637 = vmatmul.mubr.msk.f32.gmra.mrb[48].mxu0 %vm685_vm0, %v1942_v9 }
 0x120   : > { %5639 = vmatprep.mubr.msk.f32.mxu0 %vm685_vm0, %v1943_v28 }
 0x123   : > { %5640 = vmatmul.mubr.msk.f32.gmra.mrb[50].mxu0 %vm685_vm0, %v1944_v30 }
 0x124   : > { %5642 = vmatprep.mubr.msk.f32.mxu0 %vm685_vm0, %v1945_v49 }
 0x127   : > { %5643 = vmatmul.mubr.msk.f32.gmra.mrb[52].mxu0 %vm685_vm0, %v1946_v39 }
 0x128   : > { %5645 = vmatprep.mubr.msk.f32.mxu0 %vm685_vm0, %v1947_v47 }
 0x12b   : > { %5646 = vmatmul.mubr.msk.f32.gmra.mrb[54].mxu0 %vm685_vm0, %v1948_v54 }
 0x165   : > { %v5450_v52 = vpop.f32.mrb[0].mxu0 }
 0x166   : > { %v794_v61 = vpop.f32.mrb[1].mxu0  ;;  %v7526_v2 = vadd.f32 %v5450_v52, %v7519_v0 }
 0x167   : > { %v7529_v17 = vadd.f32 %v7519_v0, %v794_v61 }
 0x168   : > { %v1636_v25 = vmul.f32 %v7526_v2, %v7526_v2  ;;  %v1567_v10 = vsel %vm685_vm0, %v7526_v2, 0.0 }
 0x169   : > { %v5453_v1 = vpop.f32.mrb[2].mxu0  ;;  %v1635_v6 = vmul.f32 %v7529_v17, %v7529_v17  ;;  %v1566_v14 = vsel %vm685_vm0, %v7529_v17, 0.0 }
 0x16a   : > { %v804_v44 = vpop.f32.mrb[3].mxu0  ;;  %v1668_v20 = vsel %vm685_vm0, %v1636_v25, 0.0  ;;  %v7555_v23 = vadd.f32 %v5453_v1, %v7519_v0  ;;  %v1568_v33 = vadd.f32 %v1567_v10, %v1566_v14 }
 0x16b   : > { %v7535_v4 = vadd.f32 %v7519_v0, %v804_v44  ;;  %v1667_v22 = vsel %vm685_vm0, %v1635_v6, 0.0 }
 0x16c   : > { %v1669_v35 = vadd.f32 %v1668_v20, %v1667_v22  ;;  %v1638_v37 = vmul.f32 %v7555_v23, %v7555_v23  ;;  %v1571_v42 = vsel %vm685_vm0, %v7555_v23, 0.0 }
 0x16d   : > { %v1637_v19 = vmul.f32 %v7535_v4, %v7535_v4  ;;  %v1569_v32 = vsel %vm685_vm0, %v7535_v4, 0.0 }
 0x16e   : > { %v1570_v16 = vadd.f32 %v1569_v32, %v1568_v33  ;;  %v1672_v51 = vsel %vm685_vm0, %v1638_v37, 0.0 }
 0x16f   : > { %v1670_v31 = vsel %vm685_vm0, %v1637_v19, 0.0 }
 0x170   : > { %v5456_v5 = vpop.f32.mrb[4].mxu0  ;;  %v1671_v38 = vadd.f32 %v1670_v31, %v1669_v35  ;;  %v1572_v46 = vadd.f32 %v1571_v42, %v1570_v16 }
 0x171   : > { %v814_v7 = vpop.f32.mrb[5].mxu0  ;;  %v7577_v15 = vadd.f32 %v5456_v5, %v7519_v0 }
 0x172   : > { %v7560_v40 = vadd.f32 %v7519_v0, %v814_v7  ;;  %v1673_v56 = vadd.f32 %v1672_v51, %v1671_v38 }
 0x173   : > { %v1640_v48 = vmul.f32 %v7577_v15, %v7577_v15  ;;  %v1575_v59 = vsel %vm685_vm0, %v7577_v15, 0.0 }
 0x174   : > { %v1639_v41 = vmul.f32 %v7560_v40, %v7560_v40  ;;  %v1573_v45 = vsel %vm685_vm0, %v7560_v40, 0.0 }
 0x175   : > { %v5459_v27 = vpop.f32.mrb[6].mxu0  ;;  %v1574_v55 = vadd.f32 %v1573_v45, %v1572_v46  ;;  %v1676_v57 = vsel %vm685_vm0, %v1640_v48, 0.0 }
 0x176   : > { %v824_v34 = vpop.f32.mrb[7].mxu0  ;;  %v1674_v12 = vsel %vm685_vm0, %v1639_v41, 0.0  ;;  %v7605_v63 = vadd.f32 %v5459_v27, %v7519_v0 }
 0x177   : > { %v7591_v53 = vadd.f32 %v7519_v0, %v824_v34  ;;  %v1675_v58 = vadd.f32 %v1674_v12, %v1673_v56  ;;  %v1576_v43 = vadd.f32 %v1575_v59, %v1574_v55 }
 0x178   : > { %v1642_v1 = vmul.f32 %v7605_v63, %v7605_v63  ;;  %v1579_v26 = vsel %vm685_vm0, %v7605_v63, 0.0 }
 0x179   : > { %v1641_v60 = vmul.f32 %v7591_v53, %v7591_v53  ;;  %v1577_v11 = vsel %vm685_vm0, %v7591_v53, 0.0  ;;  %v1677_v21 = vadd.f32 %v1676_v57, %v1675_v58 }
 0x17a   : > { %v1578_v61 = vadd.f32 %v1577_v11, %v1576_v43  ;;  %v1680_v8 = vsel %vm685_vm0, %v1642_v1, 0.0 }
 0x17b   : > { %v1678_v52 = vsel %vm685_vm0, %v1641_v60, 0.0 }
 0x17c   : > { %v1679_v44 = vadd.f32 %v1678_v52, %v1677_v21  ;;  %v1580_v6 = vadd.f32 %v1579_v26, %v1578_v61 }
 0x17e   : > { %v1681_v19 = vadd.f32 %v1680_v8, %v1679_v44 }
 0x185   : > { %v5494_v36 = vpop.f32.mrb[8].mxu0 }
 0x186   : > { %v1028_v62 = vpop.f32.mrb[9].mxu0  ;;  %v7618_v24 = vadd.f32 %v5494_v36, %v7519_v0 }
 0x187   : > { %v7613_v18 = vadd.f32 %v7519_v0, %v1028_v62 }
 0x188   : > { %v1644_v20 = vmul.f32 %v7618_v24, %v7618_v24  ;;  %v1583_v28 = vsel %vm685_vm0, %v7618_v24, 0.0 }
 0x189   : > { %v1581_v3 = vsel %vm685_vm0, %v7613_v18, 0.0  ;;  %v1643_v25 = vmul.f32 %v7613_v18, %v7613_v18  ;;  %v5497_v5 = vpop.f32.mrb[10].mxu0 }
 0x18a   : > { %v1038_v7 = vpop.f32.mrb[11].mxu0  ;;  %v1582_v14 = vadd.f32 %v1581_v3, %v1580_v6  ;;  %v1684_v30 = vsel %vm685_vm0, %v1644_v20, 0.0  ;;  %v7637_v31 = vadd.f32 %v5497_v5, %v7519_v0 }
 0x18b   : > { %v1682_v9 = vsel %vm685_vm0, %v1643_v25, 0.0  ;;  %v7627_v10 = vadd.f32 %v7519_v0, %v1038_v7 }
 0x18c   : > { %v1683_v32 = vadd.f32 %v1682_v9, %v1681_v19  ;;  %v1584_v34 = vadd.f32 %v1583_v28, %v1582_v14  ;;  %v1646_v42 = vmul.f32 %v7637_v31, %v7637_v31  ;;  %v1587_v46 = vsel %vm685_vm0, %v7637_v31, 0.0 }
 0x18d   : > { %v5500_v22 = vpop.f32.mrb[12].mxu0  ;;  %v1645_v33 = vmul.f32 %v7627_v10, %v7627_v10  ;;  %v1585_v35 = vsel %vm685_vm0, %v7627_v10, 0.0 }
 0x18e   : > { %v1048_v27 = vpop.f32.mrb[13].mxu0  ;;  %v1685_v37 = vadd.f32 %v1684_v30, %v1683_v32  ;;  %v1586_v39 = vadd.f32 %v1585_v35, %v1584_v34  ;;  %v1688_v51 = vsel %vm685_vm0, %v1646_v42, 0.0  ;;  %v7653_v12 = vadd.f32 %v5500_v22, %v7519_v0 }
 0x18f   : > { %v1686_v49 = vsel %vm685_vm0, %v1645_v33, 0.0  ;;  %v7643_v38 = vadd.f32 %v7519_v0, %v1048_v27 }
 0x190   : > { %v1687_v45 = vadd.f32 %v1686_v49, %v1685_v37  ;;  %v1588_v29 = vadd.f32 %v1587_v46, %v1586_v39  ;;  %v1648_v48 = vmul.f32 %v7653_v12, %v7653_v12  ;;  %v1591_v59 = vsel %vm685_vm0, %v7653_v12, 0.0 }
 0x191   : > { %v5503_v16 = vpop.f32.mrb[14].mxu0  ;;  %v1647_v50 = vmul.f32 %v7643_v38, %v7643_v38  ;;  %v1589_v13 = vsel %vm685_vm0, %v7643_v38, 0.0 }
 0x192   : > { %v1058_v41 = vpop.f32.mrb[15].mxu0  ;;  %v1689_v47 = vadd.f32 %v1688_v51, %v1687_v45  ;;  %v1590_v56 = vadd.f32 %v1589_v13, %v1588_v29  ;;  %v1692_v57 = vsel %vm685_vm0, %v1648_v48, 0.0  ;;  %v7669_v11 = vadd.f32 %v5503_v16, %v7519_v0 }
 0x193   : > { %v1690_v54 = vsel %vm685_vm0, %v1647_v50, 0.0  ;;  %v7659_v55 = vadd.f32 %v7519_v0, %v1058_v41 }
 0x194   : > { %v1691_v58 = vadd.f32 %v1690_v54, %v1689_v47  ;;  %v1592_v43 = vadd.f32 %v1591_v59, %v1590_v56  ;;  %v1650_v62 = vmul.f32 %v7669_v11, %v7669_v11  ;;  %v1595_v25 = vsel %vm685_vm0, %v7669_v11, 0.0 }
 0x195   : > { %v1649_v60 = vmul.f32 %v7659_v55, %v7659_v55  ;;  %v1593_v21 = vsel %vm685_vm0, %v7659_v55, 0.0 }
 0x196   : > { %v1693_v52 = vadd.f32 %v1692_v57, %v1691_v58  ;;  %v1594_v61 = vadd.f32 %v1593_v21, %v1592_v43  ;;  %v1696_v7 = vsel %vm685_vm0, %v1650_v62, 0.0 }
 0x197   : > { %v1694_v36 = vsel %vm685_vm0, %v1649_v60, 0.0 }
 0x198   : > { %v1695_v44 = vadd.f32 %v1694_v36, %v1693_v52  ;;  %v1596_v6 = vadd.f32 %v1595_v25, %v1594_v61 }
 0x19a   : > { %v1697_v22 = vadd.f32 %v1696_v7, %v1695_v44 }
 0x1a5   : > { %v5538_v1 = vpop.f32.mrb[16].mxu0 }
 0x1a6   : > { %v7677_v26 = vadd.f32 %v5538_v1, %v7519_v0  ;;  %v1262_v3 = vpop.f32.mrb[17].mxu0 }
 0x1a7   : > { %v7682_v5 = vadd.f32 %v7519_v0, %v1262_v3 }
 0x1a8   : > { %v1652_v8 = vmul.f32 %v7677_v26, %v7677_v26  ;;  %v1599_v28 = vsel %vm685_vm0, %v7677_v26, 0.0 }
 0x1a9   : > { %v1597_v9 = vsel %vm685_vm0, %v7682_v5, 0.0  ;;  %v1651_v14 = vmul.f32 %v7682_v5, %v7682_v5  ;;  %v5541_v19 = vpop.f32.mrb[18].mxu0 }
 0x1aa   : > { %v1598_v20 = vadd.f32 %v1597_v9, %v1596_v6  ;;  %v7692_v32 = vadd.f32 %v5541_v19, %v7519_v0  ;;  %v1272_v27 = vpop.f32.mrb[19].mxu0  ;;  %v1700_v37 = vsel %vm685_vm0, %v1652_v8, 0.0 }
 0x1ab   : > { %v1698_v33 = vsel %vm685_vm0, %v1651_v14, 0.0  ;;  %v7698_v34 = vadd.f32 %v7519_v0, %v1272_v27 }
 0x1ac   : > { %v1699_v30 = vadd.f32 %v1698_v33, %v1697_v22  ;;  %v1600_v35 = vadd.f32 %v1599_v28, %v1598_v20  ;;  %v5582_v16 = vpop.f32.mrb[0].mxu1  ;;  %v1654_v41 = vmul.f32 %v7692_v32, %v7692_v32  ;;  %v1603_v13 = vsel %vm685_vm0, %v7692_v32, 0.0 }
 0x1ad   : > { %v1601_v49 = vsel %vm685_vm0, %v7698_v34, 0.0  ;;  %v1653_v39 = vmul.f32 %v7698_v34, %v7698_v34  ;;  %v5544_v42 = vpop.f32.mrb[20].mxu0  ;;  %v1488_v45 = vpop.f32.mrb[1].mxu1  ;;  %v7736_v7 = vadd.f32 %v5582_v16, %v7519_v0 }
 0x1ae   : > { %v1602_v46 = vadd.f32 %v1601_v49, %v1600_v35  ;;  %v1701_v50 = vadd.f32 %v1700_v37, %v1699_v30  ;;  %v7708_v29 = vadd.f32 %v5544_v42, %v7519_v0  ;;  %v1282_v51 = vpop.f32.mrb[21].mxu0  ;;  %v1704_v58 = vsel %vm685_vm0, %v1654_v41, 0.0 }
 0x1af   : > { %v1702_v47 = vsel %vm685_vm0, %v1653_v39, 0.0  ;;  %v7714_v54 = vadd.f32 %v7519_v0, %v1282_v51  ;;  %v7730_v25 = vadd.f32 %v7519_v0, %v1488_v45  ;;  %v1660_v39 = vmul.f32 %v7736_v7, %v7736_v7 }
 0x1b0   : > { %v1703_v56 = vadd.f32 %v1702_v47, %v1701_v50  ;;  %v1604_v48 = vadd.f32 %v1603_v13, %v1602_v46  ;;  %v1656_v59 = vmul.f32 %v7708_v29, %v7708_v29  ;;  %v1607_v44 = vsel %vm685_vm0, %v7708_v29, 0.0 }
 0x1b1   : > { %v1605_v60 = vsel %vm685_vm0, %v7714_v54, 0.0  ;;  %v1655_v43 = vmul.f32 %v7714_v54, %v7714_v54  ;;  %v5547_v57 = vpop.f32.mrb[22].mxu0  ;;  %v5585_v21 = vpop.f32.mrb[2].mxu1  ;;  %v1659_v33 = vmul.f32 %v7730_v25, %v7730_v25  ;;  %v1613_v42 = vsel %vm685_vm0, %v7730_v25, 0.0 }
 0x1b2   : > { %v1606_v52 = vadd.f32 %v1605_v60, %v1604_v48  ;;  %v1705_v36 = vadd.f32 %v1704_v58, %v1703_v56  ;;  %v7724_v61 = vadd.f32 %v5547_v57, %v7519_v0  ;;  %v1292_v62 = vpop.f32.mrb[23].mxu0  ;;  %v1498_v1 = vpop.f32.mrb[3].mxu1  ;;  %v1708_v14 = vsel %vm685_vm0, %v1656_v59, 0.0 }
 0x1b3   : > { %v1706_v3 = vsel %vm685_vm0, %v1655_v43, 0.0  ;;  %v7733_v6 = vadd.f32 %v7519_v0, %v1292_v62  ;;  %v7751_v16 = vadd.f32 %v7519_v0, %v1498_v1  ;;  %v7759_v46 = vadd.f32 %v5585_v21, %v7519_v0 }
 0x1b4   : > { %v1707_v8 = vadd.f32 %v1706_v3, %v1705_v36  ;;  %v1608_v9 = vadd.f32 %v1607_v44, %v1606_v52  ;;  %v1658_v19 = vmul.f32 %v7724_v61, %v7724_v61  ;;  %v1611_v30 = vsel %vm685_vm0, %v7724_v61, 0.0 }
 0x1b5   : > { %v1609_v20 = vsel %vm685_vm0, %v7733_v6, 0.0  ;;  %v1657_v22 = vmul.f32 %v7733_v6, %v7733_v6  ;;  %v1615_v47 = vsel %vm685_vm0, %v7736_v7, 0.0  ;;  %v1714_v56 = vsel %vm685_vm0, %v1659_v33, 0.0 }
 0x1b6   : > { %v1610_v27 = vadd.f32 %v1609_v20, %v1608_v9  ;;  %v1709_v28 = vadd.f32 %v1708_v14, %v1707_v8  ;;  %v1712_v45 = vsel %vm685_vm0, %v1658_v19, 0.0  ;;  %v1661_v48 = vmul.f32 %v7751_v16, %v7751_v16  ;;  %v2734_v8 = vld [vmem:[%s9559_s11] sm:$0xff]  ;;  %v2735_v9 = vld [vmem:[%s9559_s11 + $0x8] sm:$0xff] }
 0x1b7   : > { %v1710_v35 = vsel %vm685_vm0, %v1657_v22, 0.0  ;;  %v1716_v43 = vsel %vm685_vm0, %v1660_v39, 0.0  ;;  %v1662_v57 = vmul.f32 %v7759_v46, %v7759_v46  ;;  %v1617_v21 = vsel %vm685_vm0, %v7751_v16, 0.0 }
 0x1b8   : > { %v1612_v37 = vadd.f32 %v1611_v30, %v1610_v27  ;;  %v1711_v41 = vadd.f32 %v1710_v35, %v1709_v28  ;;  %v5588_v49 = vpop.f32.mrb[4].mxu1  ;;  %v1619_v62 = vsel %vm685_vm0, %v7759_v46, 0.0  ;;  %v1718_v14 = vsel %vm685_vm0, %v1661_v48, 0.0 }
 0x1b9   : > { %v1508_v50 = vpop.f32.mrb[5].mxu1  ;;  %v7775_v52 = vadd.f32 %v5588_v49, %v7519_v0  ;;  %v5900_v22 = vpack.c.bf16 %v2735_v9, %v2734_v8  ;;  %v1720_v33 = vsel %vm685_vm0, %v1662_v57, 0.0 }
 0x1ba   : > { %v1713_v51 = vadd.f32 %v1712_v45, %v1711_v41  ;;  %v1614_v13 = vadd.f32 %v1613_v42, %v1612_v37  ;;  %v7767_v58 = vadd.f32 %v7519_v0, %v1508_v50 }
 0x1bb   : > { %v1664_v30 = vmul.f32 %v7775_v52, %v7775_v52  ;;  %5901 = vmatprep.subr.bf16.mxu1 %v5900_v22  ;;  %v1623_v39 = vsel %vm685_vm0, %v7775_v52, 0.0 }
 0x1bc   : > { %v1616_v59 = vadd.f32 %v1615_v47, %v1614_v13  ;;  %v1715_v60 = vadd.f32 %v1714_v56, %v1713_v51  ;;  %v1663_v19 = vmul.f32 %v7767_v58, %v7767_v58  ;;  %v1621_v35 = vsel %vm685_vm0, %v7767_v58, 0.0  ;;  %5903 = vmatpush3.bf16.msra.mxu1 %v5900_v22 }
 0x1bd   : > { %v5591_v36 = vpop.f32.mrb[6].mxu1  ;;  %v1724_v13 = vsel %vm685_vm0, %v1664_v30, 0.0 }
 0x1be   : > { %v1618_v1 = vadd.f32 %v1617_v21, %v1616_v59  ;;  %v1717_v44 = vadd.f32 %v1716_v43, %v1715_v60  ;;  %v1518_v3 = vpop.f32.mrb[7].mxu1  ;;  %v7795_v37 = vadd.f32 %v5591_v36, %v7519_v0  ;;  %v1722_v42 = vsel %vm685_vm0, %v1663_v19, 0.0 }
 0x1bf   : > { %v1564_v20 = vadd.f32 %v7519_v0, %v1518_v3 }
 0x1c0   : > { %v1719_v27 = vadd.f32 %v1718_v14, %v1717_v44  ;;  %v1620_v28 = vadd.f32 %v1619_v62, %v1618_v1  ;;  %v1666_v47 = vmul.f32 %v7795_v37, %v7795_v37  ;;  %v1627_v59 = vsel %vm685_vm0, %v7795_v37, 0.0 }
 0x1c1   : > { %v1665_v45 = vmul.f32 %v1564_v20, %v1564_v20  ;;  %v1625_v0 = vsel %vm685_vm0, %v1564_v20, 0.0 }
 0x1c2   : > { %v1622_v41 = vadd.f32 %v1621_v35, %v1620_v28  ;;  %v1721_v49 = vadd.f32 %v1720_v33, %v1719_v27  ;;  %v1728_v21 = vsel %vm685_vm0, %v1666_v47, 0.0 }
 0x1c3   : > { %v1726_v60 = vsel %vm685_vm0, %v1665_v45, 0.0 }
 0x1c4   : > { %v1723_v50 = vadd.f32 %v1722_v42, %v1721_v49  ;;  %v1624_v51 = vadd.f32 %v1623_v39, %v1622_v41  ;;  %v1747_v42 = vlaneseq }
 0x1c6   : > { %v1626_v56 = vadd.f32 %v1625_v0, %v1624_v51  ;;  %v1725_v48 = vadd.f32 %v1724_v13, %v1723_v50  ;;  %v1748_v45 = vshrl.u32 %v1747_v42, 7  ;;  %v1742_v50 = vld [vmem:[%s9552_s4] sm:$0x1] }
 0x1c7   : > { %v1744_v0 = vld [vmem:[%s9553_s5] sm:$0x1] }
 0x1c8   : > { %v1628_v43 = vadd.f32 %v1627_v59, %v1626_v56  ;;  %v1727_v57 = vadd.f32 %v1726_v60, %v1725_v48  ;;  %v1749_v51 = vsub.s32 0, %v1748_v45 }
 0x1ca   : > { %v1629_v36 = vrot.slane %v1628_v43, 4  ;;  %v1729_v62 = vadd.f32 %v1728_v21, %v1727_v57 }
 0x1cc   : > { %v1630_v1 = vadd.f32 %v1629_v36, %v1628_v43  ;;  %v1730_v44 = vrot.slane %v1729_v62, 4 }
 0x1ce   : > { %v1631_v3 = vrot.slane %v1630_v1, 2  ;;  %v1731_v8 = vadd.f32 %v1730_v44, %v1729_v62 }
 0x1d0   : > { %v1632_v9 = vadd.f32 %v1631_v3, %v1630_v1  ;;  %v1732_v14 = vrot.slane %v1731_v8, 2 }
 0x1d2   : > { %v1633_v19 = vrot.slane %v1632_v9, 1  ;;  %v1733_v22 = vadd.f32 %v1732_v14, %v1731_v8 }
 0x1d4   : > { %v1634_v27 = vadd.f32 %v1633_v19, %v1632_v9  ;;  %v1734_v28 = vrot.slane %v1733_v22, 1 }
 0x1d6   : > { %v1735_v33 = vadd.f32 %v1734_v28, %v1733_v22  ;;  %v1736_v30 = vmul.f32 0.00390625, %v1634_v27 }
 0x1d8   : > { %v1737_v35 = vmul.f32 0.00390625, %v1735_v33  ;;  %v1738_v41 = vmul.f32 %v1736_v30, %v1736_v30 }
 0x1da   : > { %v1739_v49 = vsub.f32 %v1737_v35, %v1738_v41 }
 0x1dc   : > { %v1740_v39 = vadd.f32 1e-05, %v1739_v49 }
 0x1de   : > { %6766 = vrsqrt.f32 %v1740_v39 }
 0x1e8   : > { %v6767_v13 = vpop.eup %6766 }
 0x1e9   : > { %v1743_v47 = vmul.f32 %v6767_v13, %v1742_v50 }
 0x1eb   : > { %v1745_v56 = vmul.f32 %v1743_v47, %v1736_v30  ;;  %v1750_v48 = vrot.slane %v1743_v47, %v1749_v51 }
 0x1ed   : > { %v1746_v59 = vsub.f32 %v1744_v0, %v1745_v56  ;;  %v1781_v60 = vmul.f32 %v1750_v48, %v1564_v20  ;;  %v1751_v43 = vmul.f32 %v1750_v48, %v7529_v17  ;;  %v1752_v57 = vmul.f32 %v1750_v48, %v7526_v2 }
 0x1ee   : > { %v1753_v21 = vmul.f32 %v1750_v48, %v7535_v4  ;;  %v1754_v36 = vmul.f32 %v1750_v48, %v7555_v23  ;;  %v1755_v62 = vmul.f32 %v1750_v48, %v7560_v40  ;;  %v1756_v1 = vmul.f32 %v1750_v48, %v7577_v15 }
 0x1ef   : > { %v1787_v44 = vrot.slane %v1746_v59, %v1749_v51  ;;  %v1757_v3 = vmul.f32 %v1750_v48, %v7591_v53  ;;  %v1758_v8 = vmul.f32 %v1750_v48, %v7605_v63  ;;  %v1759_v9 = vmul.f32 %v1750_v48, %v7613_v18 }
 0x1f0   : > { %v1760_v20 = vmul.f32 %v1750_v48, %v7618_v24  ;;  %v1761_v17 = vmul.f32 %v1750_v48, %v7627_v10  ;;  %v1762_v2 = vmul.f32 %v1750_v48, %v7637_v31  ;;  %v1763_v4 = vmul.f32 %v1750_v48, %v7643_v38 }
 0x1f1   : > { %v7827_v23 = vadd.f32 %v1787_v44, %v1781_v60  ;;  %v1764_v40 = vmul.f32 %v1750_v48, %v7653_v12  ;;  %v1765_v15 = vmul.f32 %v1750_v48, %v7659_v55  ;;  %v1766_v53 = vmul.f32 %v1750_v48, %v7669_v11 }
 0x1f2   : > { %v1767_v63 = vmul.f32 %v1750_v48, %v7682_v5  ;;  %v1768_v18 = vmul.f32 %v1750_v48, %v7677_v26  ;;  %v1769_v24 = vmul.f32 %v1750_v48, %v7698_v34  ;;  %v1770_v10 = vmul.f32 %v1750_v48, %v7692_v32 }
 0x1f3   : > { %v1771_v31 = vmul.f32 %v1750_v48, %v7714_v54  ;;  %v1772_v38 = vmul.f32 %v1750_v48, %v7708_v29  ;;  %v1773_v14 = vmul.f32 %v1750_v48, %v7733_v6  ;;  %v1774_v12 = vmul.f32 %v1750_v48, %v7724_v61 }
 0x1f4   : > { %v1775_v55 = vmul.f32 %v1750_v48, %v7730_v25  ;;  %v1776_v11 = vmul.f32 %v1750_v48, %v7736_v7  ;;  %v1777_v5 = vmul.f32 %v1750_v48, %v7751_v16  ;;  %v1778_v26 = vmul.f32 %v1750_v48, %v7759_v46 }
 0x1f5   : > { %v1779_v34 = vmul.f32 %v1750_v48, %v7767_v58  ;;  %v1780_v32 = vmul.f32 %v1750_v48, %v7775_v52  ;;  %v1782_v54 = vmul.f32 %v1750_v48, %v7795_v37  ;;  %v1789_v19 = vadd.f32 %v1787_v44, %v1751_v43 }
 0x1f6   : > { %v1790_v29 = vadd.f32 %v1787_v44, %v1752_v57  ;;  %v1791_v22 = vadd.f32 %v1787_v44, %v1753_v21  ;;  %v1792_v6 = vadd.f32 %v1787_v44, %v1754_v36  ;;  %v1793_v27 = vadd.f32 %v1787_v44, %v1755_v62 }
 0x1f7   : > { %v1794_v61 = vadd.f32 %v1787_v44, %v1756_v1  ;;  %v1795_v28 = vadd.f32 %v1787_v44, %v1757_v3  ;;  %v1796_v25 = vadd.f32 %v1787_v44, %v1758_v8  ;;  %v1797_v33 = vadd.f32 %v1787_v44, %v1759_v9 }
 0x1f8   : > { %v7847_v7 = vadd.f32 %v1787_v44, %v1760_v20  ;;  %v7849_v16 = vadd.f32 %v1787_v44, %v1761_v17  ;;  %v7851_v46 = vadd.f32 %v1787_v44, %v1762_v2  ;;  %v7853_v58 = vadd.f32 %v1787_v44, %v1763_v4 }
 0x1f9   : > { %v7855_v52 = vadd.f32 %v1787_v44, %v1764_v40  ;;  %v7857_v37 = vadd.f32 %v1787_v44, %v1765_v15  ;;  %v7859_v30 = vadd.f32 %v1787_v44, %v1766_v53  ;;  %v7861_v35 = vadd.f32 %v1787_v44, %v1767_v63 }
 0x1fa   : > { %v7863_v41 = vadd.f32 %v1787_v44, %v1768_v18  ;;  %v7865_v49 = vadd.f32 %v1787_v44, %v1769_v24  ;;  %v7867_v39 = vadd.f32 %v1787_v44, %v1770_v10  ;;  %v7869_v42 = vadd.f32 %v1787_v44, %v1771_v31 }
 0x1fb   : > { %v7871_v45 = vadd.f32 %v1787_v44, %v1772_v38  ;;  %v7873_v50 = vadd.f32 %v1787_v44, %v1773_v14  ;;  %v7875_v51 = vadd.f32 %v1787_v44, %v1774_v12  ;;  %v7877_v13 = vadd.f32 %v1787_v44, %v1775_v55 }
 0x1fc   : > { %v7879_v47 = vadd.f32 %v1787_v44, %v1776_v11  ;;  %v7881_v0 = vadd.f32 %v1787_v44, %v1777_v5  ;;  %v7883_v56 = vadd.f32 %v1787_v44, %v1778_v26  ;;  %v7885_v48 = vadd.f32 %v1787_v44, %v1779_v34 }
 0x1fd   : > { %v7887_v59 = vadd.f32 %v1787_v44, %v1780_v32  ;;  %v7889_v60 = vadd.f32 %v1787_v44, %v1782_v54  ;;  %v1854_v43 = vmul.f32 0.2, %v1790_v29  ;;  %vm1821_vm3 = vcmp.ge.f32.partialorder %v1789_v19, 0.0 }
 0x1fe   : > { %v1853_v57 = vmul.f32 0.2, %v1789_v19  ;;  %vm1822_vm4 = vcmp.ge.f32.partialorder %v1790_v29, 0.0  ;;  %v1855_v21 = vmul.f32 0.2, %v1791_v22  ;;  %vm1823_vm5 = vcmp.ge.f32.partialorder %v1791_v22, 0.0 }
 0x1ff   : > { %v1886_v36 = vsel %vm1822_vm4, %v1790_v29, %v1854_v43  ;;  %v1856_v1 = vmul.f32 0.2, %v1792_v6  ;;  %vm1824_vm6 = vcmp.ge.f32.partialorder %v1792_v6, 0.0  ;;  %v1857_v8 = vmul.f32 0.2, %v1793_v27 }
 0x200   : > { %v1885_v62 = vsel %vm1821_vm3, %v1789_v19, %v1853_v57  ;;  %v1887_v3 = vsel %vm1823_vm5, %v1791_v22, %v1855_v21  ;;  %vm1825_vm7 = vcmp.ge.f32.partialorder %v1793_v27, 0.0  ;;  %v1858_v9 = vmul.f32 0.2, %v1794_v61 }
 0x201   : > { %5656 = vmatprep.mubr.msk.f32.mxu0 %vm685_vm0, %v1885_v62  ;;  %v1888_v44 = vsel %vm1824_vm6, %v1792_v6, %v1856_v1  ;;  %v1889_v20 = vsel %vm1825_vm7, %v1793_v27, %v1857_v8  ;;  %vm1826_vm8 = vcmp.ge.f32.partialorder %v1794_v61, 0.0  ;;  %v1859_v17 = vmul.f32 0.2, %v1795_v28 }
 0x202   : > { %5657 = vmatmul.mubr.msk.f32.vlgmr.msra.gmra.mrb[24].mxu0 %vm685_vm0, %v1886_v36  ;;  %vm1827_vm9 = vcmp.ge.f32.partialorder %v1795_v28, 0.0  ;;  %v1890_v2 = vsel %vm1826_vm8, %v1794_v61, %v1858_v9  ;;  %v1860_v4 = vmul.f32 0.2, %v1796_v25  ;;  %vm1828_vm10 = vcmp.ge.f32.partialorder %v1796_v25, 0.0  ;;  %v7995_v36 = vld [vmem:[%s9558_s10] ss:$0 sm:$0xff] }
 0x203   : > { %5659 = vmatprep.mubr.msk.f32.mxu0 %vm685_vm0, %v1887_v3  ;;  %v1891_v40 = vsel %vm1827_vm9, %v1795_v28, %v1859_v17  ;;  %v1861_v15 = vmul.f32 0.2, %v1797_v33  ;;  %vm1829_vm11 = vcmp.ge.f32.partialorder %v1797_v33, 0.0  ;;  %v1862_v63 = vmul.f32 0.2, %v7847_v7 }
 0x204   : > { %v1892_v53 = vsel %vm1828_vm10, %v1796_v25, %v1860_v4  ;;  %vm1830_vm12 = vcmp.ge.f32.partialorder %v7847_v7, 0.0  ;;  %v1863_v24 = vmul.f32 0.2, %v7849_v16  ;;  %vm1831_vm13 = vcmp.ge.f32.partialorder %v7849_v16, 0.0 }
 0x205   : > { %v1893_v18 = vsel %vm1829_vm11, %v1797_v33, %v1861_v15  ;;  %v1894_v10 = vsel %vm1830_vm12, %v7847_v7, %v1862_v63  ;;  %v1864_v31 = vmul.f32 0.2, %v7851_v46  ;;  %vm1832_vm14 = vcmp.ge.f32.partialorder %v7851_v46, 0.0 }
 0x206   : > { %5660 = vmatmul.mubr.msk.f32.gmra.mrb[26].mxu0 %vm685_vm0, %v1888_v44  ;;  %v1895_v38 = vsel %vm1831_vm13, %v7849_v16, %v1863_v24  ;;  %v1865_v14 = vmul.f32 0.2, %v7853_v58  ;;  %vm1833_vm15 = vcmp.ge.f32.partialorder %v7853_v58, 0.0  ;;  %v1866_v55 = vmul.f32 0.2, %v7855_v52 }
 0x207   : > { %5662 = vmatprep.mubr.msk.f32.mxu0 %vm685_vm0, %v1889_v20  ;;  %v1896_v12 = vsel %vm1832_vm14, %v7851_v46, %v1864_v31  ;;  %vm1834_vm3 = vcmp.ge.f32.partialorder %v7855_v52, 0.0  ;;  %v1867_v5 = vmul.f32 0.2, %v7857_v37  ;;  %vm1835_vm4 = vcmp.ge.f32.partialorder %v7857_v37, 0.0 }
 0x208   : > { %v1897_v11 = vsel %vm1833_vm15, %v7853_v58, %v1865_v14  ;;  %v1898_v26 = vsel %vm1834_vm3, %v7855_v52, %v1866_v55  ;;  %v1868_v34 = vmul.f32 0.2, %v7859_v30  ;;  %vm1836_vm5 = vcmp.ge.f32.partialorder %v7859_v30, 0.0 }
 0x209   : > { %v1899_v32 = vsel %vm1835_vm4, %v7857_v37, %v1867_v5  ;;  %v1869_v54 = vmul.f32 0.2, %v7861_v35  ;;  %vm1837_vm6 = vcmp.ge.f32.partialorder %v7861_v35, 0.0  ;;  %v1870_v29 = vmul.f32 0.2, %v7863_v41 }
 0x20a   : > { %5663 = vmatmul.mubr.msk.f32.gmra.mrb[28].mxu0 %vm685_vm0, %v1890_v2  ;;  %v1900_v19 = vsel %vm1836_vm5, %v7859_v30, %v1868_v34  ;;  %vm1838_vm7 = vcmp.ge.f32.partialorder %v7863_v41, 0.0  ;;  %v1871_v6 = vmul.f32 0.2, %v7865_v49  ;;  %vm1839_vm8 = vcmp.ge.f32.partialorder %v7865_v49, 0.0 }
 0x20b   : > { %5665 = vmatprep.mubr.msk.f32.mxu0 %vm685_vm0, %v1891_v40  ;;  %v1901_v22 = vsel %vm1837_vm6, %v7861_v35, %v1869_v54  ;;  %v1902_v27 = vsel %vm1838_vm7, %v7863_v41, %v1870_v29  ;;  %v1872_v61 = vmul.f32 0.2, %v7867_v39  ;;  %vm1840_vm9 = vcmp.ge.f32.partialorder %v7867_v39, 0.0 }
 0x20c   : > { %v1903_v28 = vsel %vm1839_vm8, %v7865_v49, %v1871_v6  ;;  %v1873_v25 = vmul.f32 0.2, %v7869_v42  ;;  %vm1841_vm10 = vcmp.ge.f32.partialorder %v7869_v42, 0.0  ;;  %v1874_v7 = vmul.f32 0.2, %v7871_v45 }
 0x20d   : > { %v1904_v33 = vsel %vm1840_vm9, %v7867_v39, %v1872_v61  ;;  %vm1842_vm11 = vcmp.ge.f32.partialorder %v7871_v45, 0.0  ;;  %v1875_v46 = vmul.f32 0.2, %v7873_v50  ;;  %vm1843_vm12 = vcmp.ge.f32.partialorder %v7873_v50, 0.0 }
 0x20e   : > { %5666 = vmatmul.mubr.msk.f32.gmra.mrb[30].mxu0 %vm685_vm0, %v1892_v53  ;;  %v1905_v16 = vsel %vm1841_vm10, %v7869_v42, %v1873_v25  ;;  %v1906_v58 = vsel %vm1842_vm11, %v7871_v45, %v1874_v7  ;;  %v1876_v52 = vmul.f32 0.2, %v7875_v51  ;;  %vm1844_vm13 = vcmp.ge.f32.partialorder %v7875_v51, 0.0 }
 0x20f   : > { %5668 = vmatprep.mubr.msk.f32.mxu0 %vm685_vm0, %v1893_v18  ;;  %v1907_v37 = vsel %vm1843_vm12, %v7873_v50, %v1875_v46  ;;  %v1877_v30 = vmul.f32 0.2, %v7877_v13  ;;  %vm1845_vm14 = vcmp.ge.f32.partialorder %v7877_v13, 0.0  ;;  %v1878_v41 = vmul.f32 0.2, %v7879_v47 }
 0x210   : > { %v1908_v35 = vsel %vm1844_vm13, %v7875_v51, %v1876_v52  ;;  %vm1846_vm15 = vcmp.ge.f32.partialorder %v7879_v47, 0.0  ;;  %v1879_v39 = vmul.f32 0.2, %v7881_v0  ;;  %vm1847_vm3 = vcmp.ge.f32.partialorder %v7881_v0, 0.0 }
 0x211   : > { %v1909_v49 = vsel %vm1845_vm14, %v7877_v13, %v1877_v30  ;;  %v1910_v42 = vsel %vm1846_vm15, %v7879_v47, %v1878_v41  ;;  %v1880_v45 = vmul.f32 0.2, %v7883_v56  ;;  %vm1848_vm4 = vcmp.ge.f32.partialorder %v7883_v56, 0.0 }
 0x212   : > { %5669 = vmatmul.mubr.msk.f32.gmra.mrb[32].mxu0 %vm685_vm0, %v1894_v10  ;;  %v1911_v50 = vsel %vm1847_vm3, %v7881_v0, %v1879_v39  ;;  %v1881_v51 = vmul.f32 0.2, %v7885_v48  ;;  %vm1849_vm5 = vcmp.ge.f32.partialorder %v7885_v48, 0.0  ;;  %v1882_v43 = vmul.f32 0.2, %v7887_v59 }
 0x213   : > { %5671 = vmatprep.mubr.msk.f32.mxu0 %vm685_vm0, %v1895_v38  ;;  %v1912_v13 = vsel %vm1848_vm4, %v7883_v56, %v1880_v45  ;;  %vm1850_vm6 = vcmp.ge.f32.partialorder %v7887_v59, 0.0  ;;  %v1883_v0 = vmul.f32 0.2, %v7827_v23  ;;  %vm1851_vm7 = vcmp.ge.f32.partialorder %v7827_v23, 0.0 }
 0x214   : > { %v1913_v47 = vsel %vm1849_vm5, %v7885_v48, %v1881_v51  ;;  %v1914_v57 = vsel %vm1850_vm6, %v7887_v59, %v1882_v43  ;;  %v1884_v21 = vmul.f32 0.2, %v7889_v60  ;;  %vm1852_vm8 = vcmp.ge.f32.partialorder %v7889_v60, 0.0 }
 0x215   : > { %v1915_v56 = vsel %vm1851_vm7, %v7827_v23, %v1883_v0  ;;  %vm2743_vm11 = vcmask 130048  }
 0x216   : > { %5672 = vmatmul.mubr.msk.f32.gmra.mrb[34].mxu0 %vm685_vm0, %v1896_v12  ;;  %v1916_v48 = vsel %vm1852_vm8, %v7889_v60, %v1884_v21 }
 0x217   : > { %5674 = vmatprep.mubr.msk.f32.mxu0 %vm685_vm0, %v1897_v11 }
 0x21a   : > { %5675 = vmatmul.mubr.msk.f32.gmra.mrb[36].mxu0 %vm685_vm0, %v1898_v26 }
 0x21b   : > { %5677 = vmatprep.mubr.msk.f32.mxu0 %vm685_vm0, %v1899_v32 }
 0x21e   : > { %5678 = vmatmul.mubr.msk.f32.gmra.mrb[38].mxu0 %vm685_vm0, %v1900_v19 }
 0x21f   : > { %5680 = vmatprep.mubr.msk.f32.mxu0 %vm685_vm0, %v1901_v22 }
 0x222   : > { %5681 = vmatmul.mubr.msk.f32.gmra.mrb[40].mxu0 %vm685_vm0, %v1902_v27 }
 0x223   : > { %5683 = vmatprep.mubr.msk.f32.mxu0 %vm685_vm0, %v1903_v28 }
 0x226   : > { %5684 = vmatmul.mubr.msk.f32.gmra.mrb[42].mxu0 %vm685_vm0, %v1904_v33 }
 0x227   : > { %5686 = vmatprep.mubr.msk.f32.mxu0 %vm685_vm0, %v1905_v16 }
 0x22a   : > { %5687 = vmatmul.mubr.msk.f32.gmra.mrb[44].mxu0 %vm685_vm0, %v1906_v58 }
 0x22b   : > { %5689 = vmatprep.mubr.msk.f32.mxu0 %vm685_vm0, %v1907_v37 }
 0x22e   : > { %5690 = vmatmul.mubr.msk.f32.gmra.mrb[46].mxu0 %vm685_vm0, %v1908_v35 }
 0x22f   : > { %5692 = vmatprep.mubr.msk.f32.mxu0 %vm685_vm0, %v1909_v49 }
 0x232   : > { %5693 = vmatmul.mubr.msk.f32.gmra.mrb[48].mxu0 %vm685_vm0, %v1910_v42 }
 0x233   : > { %5695 = vmatprep.mubr.msk.f32.mxu0 %vm685_vm0, %v1911_v50 }
 0x236   : > { %5696 = vmatmul.mubr.msk.f32.gmra.mrb[50].mxu0 %vm685_vm0, %v1912_v13 }
 0x237   : > { %5698 = vmatprep.mubr.msk.f32.mxu0 %vm685_vm0, %v1913_v47 }
 0x23a   : > { %5699 = vmatmul.mubr.msk.f32.gmra.mrb[52].mxu0 %vm685_vm0, %v1914_v57 }
 0x23b   : > { %5701 = vmatprep.mubr.msk.f32.mxu0 %vm685_vm0, %v1915_v56 }
 0x23e   : > { %5702 = vmatmul.mubr.msk.f32.gmra.mrb[54].mxu0 %vm685_vm0, %v1916_v48 }
 0x2d5   : > { %v5658_v59 = vpop.f32.mrb[24].mxu0 }
 0x2d6   : > { %v2607_v62 = vadd.f32 %v5658_v59, %v7995_v36  ;;  %v2440_v1 = vpop.f32.mrb[25].mxu0 }
 0x2d7   : > { %v2606_v3 = vadd.f32 %v7995_v36, %v2440_v1 }
 0x2d8   : > { %v2671_v23 = vmul.f32 0.2, %v2607_v62  ;;  %vm2639_vm9 = vcmp.ge.f32.partialorder %v2607_v62, 0.0 }
 0x2d9   : > { %vm2638_vm10 = vcmp.ge.f32.partialorder %v2606_v3, 0.0  ;;  %v2670_v8 = vmul.f32 0.2, %v2606_v3  ;;  %v5661_v44 = vpop.f32.mrb[26].mxu0 }
 0x2da   : > { %v2609_v60 = vadd.f32 %v5661_v44, %v7995_v36  ;;  %v2450_v9 = vpop.f32.mrb[27].mxu0  ;;  %v2703_v2 = vsel %vm2639_vm9, %v2607_v62, %v2671_v23 }
 0x2db   : > { %v2608_v20 = vadd.f32 %v7995_v36, %v2450_v9  ;;  %v2702_v17 = vsel %vm2638_vm10, %v2606_v3, %v2670_v8 }
 0x2dc   : > { %v2673_v4 = vmul.f32 0.2, %v2609_v60  ;;  %5708 = vmatprep.mubr.msk.f32.mxu1 %vm2743_vm11, %v2702_v17  ;;  %vm2641_vm12 = vcmp.ge.f32.partialorder %v2609_v60, 0.0 }
 0x2dd   : > { %vm2640_vm13 = vcmp.ge.f32.partialorder %v2608_v20, 0.0  ;;  %v2672_v40 = vmul.f32 0.2, %v2608_v20  ;;  %v5664_v15 = vpop.f32.mrb[28].mxu0  ;;  %5709 = vmatmul.mubr.msk.f32.vlgmr.msra.gmra.mrb[8].mxu1 %vm2743_vm11, %v2703_v2 }
 0x2de   : > { %v2611_v53 = vadd.f32 %v5664_v15, %v7995_v36  ;;  %v2460_v63 = vpop.f32.mrb[29].mxu0  ;;  %v2705_v31 = vsel %vm2641_vm12, %v2609_v60, %v2673_v4 }
 0x2df   : > { %v2610_v18 = vadd.f32 %v7995_v36, %v2460_v63  ;;  %v2704_v24 = vsel %vm2640_vm13, %v2608_v20, %v2672_v40 }
 0x2e0   : > { %v2675_v10 = vmul.f32 0.2, %v2611_v53  ;;  %5711 = vmatprep.mubr.msk.f32.mxu1 %vm2743_vm11, %v2704_v24  ;;  %vm2643_vm14 = vcmp.ge.f32.partialorder %v2611_v53, 0.0 }
 0x2e1   : > { %vm2642_vm15 = vcmp.ge.f32.partialorder %v2610_v18, 0.0  ;;  %v2674_v38 = vmul.f32 0.2, %v2610_v18  ;;  %v5667_v14 = vpop.f32.mrb[30].mxu0  ;;  %5712 = vmatmul.mubr.msk.f32.gmra.mrb[10].mxu1 %vm2743_vm11, %v2705_v31 }
 0x2e2   : > { %v2613_v12 = vadd.f32 %v5667_v14, %v7995_v36  ;;  %v2470_v55 = vpop.f32.mrb[31].mxu0  ;;  %v2707_v34 = vsel %vm2643_vm14, %v2611_v53, %v2675_v10 }
 0x2e3   : > { %v2612_v11 = vadd.f32 %v7995_v36, %v2470_v55  ;;  %v2706_v5 = vsel %vm2642_vm15, %v2610_v18, %v2674_v38 }
 0x2e4   : > { %v2677_v26 = vmul.f32 0.2, %v2613_v12  ;;  %5714 = vmatprep.mubr.msk.f32.mxu1 %vm2743_vm11, %v2706_v5  ;;  %vm2645_vm3 = vcmp.ge.f32.partialorder %v2613_v12, 0.0 }
 0x2e5   : > { %vm2644_vm4 = vcmp.ge.f32.partialorder %v2612_v11, 0.0  ;;  %v2676_v32 = vmul.f32 0.2, %v2612_v11  ;;  %v5670_v54 = vpop.f32.mrb[32].mxu0  ;;  %5715 = vmatmul.mubr.msk.f32.gmra.mrb[12].mxu1 %vm2743_vm11, %v2707_v34 }
 0x2e6   : > { %v2615_v19 = vadd.f32 %v5670_v54, %v7995_v36  ;;  %v2480_v29 = vpop.f32.mrb[33].mxu0  ;;  %v2709_v61 = vsel %vm2645_vm3, %v2613_v12, %v2677_v26 }
 0x2e7   : > { %v2614_v22 = vadd.f32 %v7995_v36, %v2480_v29  ;;  %v2708_v6 = vsel %vm2644_vm4, %v2612_v11, %v2676_v32 }
 0x2e8   : > { %v2679_v27 = vmul.f32 0.2, %v2615_v19  ;;  %5717 = vmatprep.mubr.msk.f32.mxu1 %vm2743_vm11, %v2708_v6  ;;  %vm2647_vm5 = vcmp.ge.f32.partialorder %v2615_v19, 0.0 }
 0x2e9   : > { %vm2646_vm6 = vcmp.ge.f32.partialorder %v2614_v22, 0.0  ;;  %v2678_v28 = vmul.f32 0.2, %v2614_v22  ;;  %v5673_v25 = vpop.f32.mrb[34].mxu0  ;;  %5718 = vmatmul.mubr.msk.f32.gmra.mrb[14].mxu1 %vm2743_vm11, %v2709_v61 }
 0x2ea   : > { %v2617_v33 = vadd.f32 %v5673_v25, %v7995_v36  ;;  %v2490_v7 = vpop.f32.mrb[35].mxu0  ;;  %v2711_v52 = vsel %vm2647_vm5, %v2615_v19, %v2679_v27 }
 0x2eb   : > { %v2616_v16 = vadd.f32 %v7995_v36, %v2490_v7  ;;  %v2710_v46 = vsel %vm2646_vm6, %v2614_v22, %v2678_v28 }
 0x2ec   : > { %v2681_v58 = vmul.f32 0.2, %v2617_v33  ;;  %5720 = vmatprep.mubr.msk.f32.mxu1 %vm2743_vm11, %v2710_v46  ;;  %vm2649_vm7 = vcmp.ge.f32.partialorder %v2617_v33, 0.0 }
 0x2ed   : > { %vm2648_vm8 = vcmp.ge.f32.partialorder %v2616_v16, 0.0  ;;  %v2680_v37 = vmul.f32 0.2, %v2616_v16  ;;  %v5676_v30 = vpop.f32.mrb[36].mxu0  ;;  %5721 = vmatmul.mubr.msk.f32.gmra.mrb[16].mxu1 %vm2743_vm11, %v2711_v52 }
 0x2ee   : > { %v2619_v35 = vadd.f32 %v5676_v30, %v7995_v36  ;;  %v2500_v41 = vpop.f32.mrb[37].mxu0  ;;  %v2713_v45 = vsel %vm2649_vm7, %v2617_v33, %v2681_v58 }
 0x2ef   : > { %v2618_v49 = vadd.f32 %v7995_v36, %v2500_v41  ;;  %v2712_v39 = vsel %vm2648_vm8, %v2616_v16, %v2680_v37 }
 0x2f0   : > { %v2683_v42 = vmul.f32 0.2, %v2619_v35  ;;  %5723 = vmatprep.mubr.msk.f32.mxu1 %vm2743_vm11, %v2712_v39  ;;  %vm2651_vm9 = vcmp.ge.f32.partialorder %v2619_v35, 0.0 }
 0x2f1   : > { %vm2650_vm10 = vcmp.ge.f32.partialorder %v2618_v49, 0.0  ;;  %v2682_v50 = vmul.f32 0.2, %v2618_v49  ;;  %v5679_v51 = vpop.f32.mrb[38].mxu0  ;;  %5724 = vmatmul.mubr.msk.f32.gmra.mrb[18].mxu1 %vm2743_vm11, %v2713_v45 }
 0x2f2   : > { %v2621_v13 = vadd.f32 %v5679_v51, %v7995_v36  ;;  %v2510_v43 = vpop.f32.mrb[39].mxu0  ;;  %v2715_v21 = vsel %vm2651_vm9, %v2619_v35, %v2683_v42 }
 0x2f3   : > { %v2620_v47 = vadd.f32 %v7995_v36, %v2510_v43  ;;  %v2714_v0 = vsel %vm2650_vm10, %v2618_v49, %v2682_v50 }
 0x2f4   : > { %v2685_v57 = vmul.f32 0.2, %v2621_v13  ;;  %5726 = vmatprep.mubr.msk.f32.mxu1 %vm2743_vm11, %v2714_v0  ;;  %vm2653_vm12 = vcmp.ge.f32.partialorder %v2621_v13, 0.0 }
 0x2f5   : > { %vm2652_vm13 = vcmp.ge.f32.partialorder %v2620_v47, 0.0  ;;  %v2684_v56 = vmul.f32 0.2, %v2620_v47  ;;  %v5682_v48 = vpop.f32.mrb[40].mxu0  ;;  %5727 = vmatmul.mubr.msk.f32.gmra.mrb[20].mxu1 %vm2743_vm11, %v2715_v21 }
 0x2f6   : > { %v2623_v59 = vadd.f32 %v5682_v48, %v7995_v36  ;;  %v2520_v62 = vpop.f32.mrb[41].mxu0  ;;  %v2717_v8 = vsel %vm2653_vm12, %v2621_v13, %v2685_v57 }
 0x2f7   : > { %v2622_v1 = vadd.f32 %v7995_v36, %v2520_v62  ;;  %v2716_v3 = vsel %vm2652_vm13, %v2620_v47, %v2684_v56 }
 0x2f8   : > { %v2687_v23 = vmul.f32 0.2, %v2623_v59  ;;  %5729 = vmatprep.mubr.msk.f32.mxu1 %vm2743_vm11, %v2716_v3  ;;  %vm2655_vm14 = vcmp.ge.f32.partialorder %v2623_v59, 0.0 }
 0x2f9   : > { %vm2654_vm15 = vcmp.ge.f32.partialorder %v2622_v1, 0.0  ;;  %v2686_v44 = vmul.f32 0.2, %v2622_v1  ;;  %v5685_v60 = vpop.f32.mrb[42].mxu0  ;;  %5730 = vmatmul.mubr.msk.f32.gmra.mrb[22].mxu1 %vm2743_vm11, %v2717_v8 }
 0x2fa   : > { %v2625_v9 = vadd.f32 %v5685_v60, %v7995_v36  ;;  %v2530_v20 = vpop.f32.mrb[43].mxu0  ;;  %v2719_v40 = vsel %vm2655_vm14, %v2623_v59, %v2687_v23 }
 0x2fb   : > { %v2624_v17 = vadd.f32 %v7995_v36, %v2530_v20  ;;  %v2718_v2 = vsel %vm2654_vm15, %v2622_v1, %v2686_v44  ;;  %v6800_v1 = vmov 0.0  }
 0x2fc   : > { %v2689_v4 = vmul.f32 0.2, %v2625_v9  ;;  %5732 = vmatprep.mubr.msk.f32.mxu1 %vm2743_vm11, %v2718_v2  ;;  %vm2657_vm3 = vcmp.ge.f32.partialorder %v2625_v9, 0.0  ;;  %3166 = vst.msk [vmem:[#allocation2 + $0x20] sm:$0xff] %vm2743_vm11, %v6800_v1  ;;  %3164 = vst.msk [vmem:[#allocation2 + $0x10] sm:$0xff] %vm2743_vm11, %v6800_v1 }
 0x2fd   : > { %vm2656_vm4 = vcmp.ge.f32.partialorder %v2624_v17, 0.0  ;;  %v2688_v15 = vmul.f32 0.2, %v2624_v17  ;;  %v5688_v53 = vpop.f32.mrb[44].mxu0  ;;  %5733 = vmatmul.mubr.msk.f32.gmra.mrb[24].mxu1 %vm2743_vm11, %v2719_v40  ;;  %3168 = vst.msk [vmem:[#allocation2 + $0x30] sm:$0xff] %vm2743_vm11, %v6800_v1  ;;  %3170 = vst.msk [vmem:[#allocation2 + $0x40] sm:$0xff] %vm2743_vm11, %v6800_v1 }
 0x2fe   : > { %v2627_v63 = vadd.f32 %v5688_v53, %v7995_v36  ;;  %v2540_v18 = vpop.f32.mrb[45].mxu0  ;;  %v2721_v38 = vsel %vm2657_vm3, %v2625_v9, %v2689_v4  ;;  %3172 = vst.msk [vmem:[#allocation2 + $0x50] sm:$0xff] %vm2743_vm11, %v6800_v1  ;;  %3174 = vst.msk [vmem:[#allocation2 + $0x60] sm:$0xff] %vm2743_vm11, %v6800_v1 }
 0x2ff   : > { %v2626_v24 = vadd.f32 %v7995_v36, %v2540_v18  ;;  %v2720_v10 = vsel %vm2656_vm4, %v2624_v17, %v2688_v15  ;;  %3176 = vst.msk [vmem:[#allocation2 + $0x70] sm:$0xff] %vm2743_vm11, %v6800_v1  ;;  %3178 = vst.msk [vmem:[#allocation2 + $0x80] sm:$0xff] %vm2743_vm11, %v6800_v1 }
 0x300   : > { %v2691_v31 = vmul.f32 0.2, %v2627_v63  ;;  %5735 = vmatprep.mubr.msk.f32.mxu1 %vm2743_vm11, %v2720_v10  ;;  %vm2659_vm5 = vcmp.ge.f32.partialorder %v2627_v63, 0.0  ;;  %3180 = vst.msk [vmem:[#allocation2 + $0x90] sm:$0xff] %vm2743_vm11, %v6800_v1  ;;  %3184 = vst.msk [vmem:[#allocation2 + $0xb0] sm:$0xff] %vm2743_vm11, %v6800_v1 }
 0x301   : > { %vm2658_vm6 = vcmp.ge.f32.partialorder %v2626_v24, 0.0  ;;  %v2690_v14 = vmul.f32 0.2, %v2626_v24  ;;  %v5691_v12 = vpop.f32.mrb[46].mxu0  ;;  %5736 = vmatmul.mubr.msk.f32.gmra.mrb[26].mxu1 %vm2743_vm11, %v2721_v38  ;;  %3186 = vst.msk [vmem:[#allocation2 + $0xc0] sm:$0xff] %vm2743_vm11, %v6800_v1  ;;  %3188 = vst.msk [vmem:[#allocation2 + $0xd0] sm:$0xff] %vm2743_vm11, %v6800_v1 }
 0x302   : > { %v2629_v55 = vadd.f32 %v5691_v12, %v7995_v36  ;;  %v2550_v11 = vpop.f32.mrb[47].mxu0  ;;  %v2723_v32 = vsel %vm2659_vm5, %v2627_v63, %v2691_v31  ;;  %vm3162_vm5 = vcmask 123904   ;;  %3190 = vst.msk [vmem:[#allocation2 + $0xe0] sm:$0xff] %vm2743_vm11, %v6800_v1  ;;  %3192 = vst.msk [vmem:[#allocation2 + $0xf0] sm:$0xff] %vm2743_vm11, %v6800_v1 }
 0x303   : > { %v2628_v5 = vadd.f32 %v7995_v36, %v2550_v11  ;;  %v2722_v26 = vsel %vm2658_vm6, %v2626_v24, %v2690_v14  ;;  %3167 = vst.msk [vmem:[#allocation2 + $0x28] sm:$0x3] %vm3162_vm5, %v6800_v1  ;;  %3165 = vst.msk [vmem:[#allocation2 + $0x18] sm:$0x3] %vm3162_vm5, %v6800_v1 }
 0x304   : > { %v2693_v34 = vmul.f32 0.2, %v2629_v55  ;;  %5738 = vmatprep.mubr.msk.f32.mxu1 %vm2743_vm11, %v2722_v26  ;;  %vm2661_vm7 = vcmp.ge.f32.partialorder %v2629_v55, 0.0  ;;  %3169 = vst.msk [vmem:[#allocation2 + $0x38] sm:$0x3] %vm3162_vm5, %v6800_v1 }
 0x305   : > { %vm2660_vm8 = vcmp.ge.f32.partialorder %v2628_v5, 0.0  ;;  %v2692_v54 = vmul.f32 0.2, %v2628_v5  ;;  %v5694_v19 = vpop.f32.mrb[48].mxu0  ;;  %5739 = vmatmul.mubr.msk.f32.gmra.mrb[28].mxu1 %vm2743_vm11, %v2723_v32  ;;  %3171 = vst.msk [vmem:[#allocation2 + $0x48] sm:$0x3] %vm3162_vm5, %v6800_v1 }
 0x306   : > { %v2631_v29 = vadd.f32 %v5694_v19, %v7995_v36  ;;  %v2560_v22 = vpop.f32.mrb[49].mxu0  ;;  %v2725_v28 = vsel %vm2661_vm7, %v2629_v55, %v2693_v34  ;;  %3173 = vst.msk [vmem:[#allocation2 + $0x58] sm:$0x3] %vm3162_vm5, %v6800_v1  ;;  %3175 = vst.msk [vmem:[#allocation2 + $0x68] sm:$0x3] %vm3162_vm5, %v6800_v1 }
 0x307   : > { %v2630_v6 = vadd.f32 %v7995_v36, %v2560_v22  ;;  %v2724_v27 = vsel %vm2660_vm8, %v2628_v5, %v2692_v54  ;;  %3177 = vst.msk [vmem:[#allocation2 + $0x78] sm:$0x3] %vm3162_vm5, %v6800_v1  ;;  %3179 = vst.msk [vmem:[#allocation2 + $0x88] sm:$0x3] %vm3162_vm5, %v6800_v1 }
 0x308   : > { %v2695_v61 = vmul.f32 0.2, %v2631_v29  ;;  %5741 = vmatprep.mubr.msk.f32.mxu1 %vm2743_vm11, %v2724_v27  ;;  %vm2663_vm9 = vcmp.ge.f32.partialorder %v2631_v29, 0.0  ;;  %3181 = vst.msk [vmem:[#allocation2 + $0x98] sm:$0x3] %vm3162_vm5, %v6800_v1 }
 0x309   : > { %vm2662_vm10 = vcmp.ge.f32.partialorder %v2630_v6, 0.0  ;;  %v2694_v25 = vmul.f32 0.2, %v2630_v6  ;;  %v5697_v33 = vpop.f32.mrb[50].mxu0  ;;  %5742 = vmatmul.mubr.msk.f32.gmra.mrb[30].mxu1 %vm2743_vm11, %v2725_v28  ;;  %3185 = vst.msk [vmem:[#allocation2 + $0xb8] sm:$0x3] %vm3162_vm5, %v6800_v1 }
 0x30a   : > { %v2633_v7 = vadd.f32 %v5697_v33, %v7995_v36  ;;  %v2570_v16 = vpop.f32.mrb[51].mxu0  ;;  %v2727_v37 = vsel %vm2663_vm9, %v2631_v29, %v2695_v61  ;;  %3187 = vst.msk [vmem:[#allocation2 + $0xc8] sm:$0x3] %vm3162_vm5, %v6800_v1  ;;  %3189 = vst.msk [vmem:[#allocation2 + $0xd8] sm:$0x3] %vm3162_vm5, %v6800_v1 }
 0x30b   : > { %v2632_v46 = vadd.f32 %v7995_v36, %v2570_v16  ;;  %v2726_v58 = vsel %vm2662_vm10, %v2630_v6, %v2694_v25  ;;  %3191 = vst.msk [vmem:[#allocation2 + $0xe8] sm:$0x3] %vm3162_vm5, %v6800_v1  ;;  %3193 = vst.msk [vmem:[#allocation2 + $0xf8] sm:$0x3] %vm3162_vm5, %v6800_v1 }
 0x30c   : > { %v2697_v52 = vmul.f32 0.2, %v2633_v7  ;;  %5744 = vmatprep.mubr.msk.f32.mxu1 %vm2743_vm11, %v2726_v58  ;;  %vm2665_vm12 = vcmp.ge.f32.partialorder %v2633_v7, 0.0  ;;  %3194 = vst.msk [vmem:[#allocation2 + $0x100] sm:$0xff] %vm2743_vm11, %v6800_v1  ;;  %3196 = vst.msk [vmem:[#allocation2 + $0x110] sm:$0xff] %vm2743_vm11, %v6800_v1 }
 0x30d   : > { %vm2664_vm13 = vcmp.ge.f32.partialorder %v2632_v46, 0.0  ;;  %v2696_v30 = vmul.f32 0.2, %v2632_v46  ;;  %v5700_v35 = vpop.f32.mrb[52].mxu0  ;;  %5745 = vmatmul.mubr.msk.f32.gmra.mrb[32].mxu1 %vm2743_vm11, %v2727_v37  ;;  %3195 = vst.msk [vmem:[#allocation2 + $0x108] sm:$0x3] %vm3162_vm5, %v6800_v1 }
 0x30e   : > { %v2635_v41 = vadd.f32 %v5700_v35, %v7995_v36  ;;  %v2580_v49 = vpop.f32.mrb[53].mxu0  ;;  %v2729_v50 = vsel %vm2665_vm12, %v2633_v7, %v2697_v52  ;;  %3197 = vst.msk [vmem:[#allocation2 + $0x118] sm:$0x3] %vm3162_vm5, %v6800_v1  ;;  %3199 = vst.msk [vmem:[#allocation2 + $0x128] sm:$0x3] %vm3162_vm5, %v6800_v1 }
 0x30f   : > { %v2634_v39 = vadd.f32 %v7995_v36, %v2580_v49  ;;  %v2728_v42 = vsel %vm2664_vm13, %v2632_v46, %v2696_v30  ;;  %3198 = vst.msk [vmem:[#allocation2 + $0x120] sm:$0xff] %vm2743_vm11, %v6800_v1  ;;  %3200 = vst.msk [vmem:[#allocation2 + $0x130] sm:$0xff] %vm2743_vm11, %v6800_v1 }
 0x310   : > { %v2699_v45 = vmul.f32 0.2, %v2635_v41  ;;  %5747 = vmatprep.mubr.msk.f32.mxu1 %vm2743_vm11, %v2728_v42  ;;  %vm2667_vm14 = vcmp.ge.f32.partialorder %v2635_v41, 0.0  ;;  %3201 = vst.msk [vmem:[#allocation2 + $0x138] sm:$0x3] %vm3162_vm5, %v6800_v1 }
 0x311   : > { %vm2666_vm15 = vcmp.ge.f32.partialorder %v2634_v39, 0.0  ;;  %v2698_v51 = vmul.f32 0.2, %v2634_v39  ;;  %v5703_v13 = vpop.f32.mrb[54].mxu0  ;;  %5748 = vmatmul.mubr.msk.f32.gmra.mrb[34].mxu1 %vm2743_vm11, %v2729_v50  ;;  %3202 = vst.msk [vmem:[#allocation2 + $0x140] sm:$0xff] %vm2743_vm11, %v6800_v1  ;;  %3204 = vst.msk [vmem:[#allocation2 + $0x150] sm:$0xff] %vm2743_vm11, %v6800_v1 }
 0x312   : > { %v2637_v43 = vadd.f32 %v5703_v13, %v7995_v36  ;;  %v2590_v47 = vpop.f32.mrb[55].mxu0  ;;  %v2731_v56 = vsel %vm2667_vm14, %v2635_v41, %v2699_v45  ;;  %3203 = vst.msk [vmem:[#allocation2 + $0x148] sm:$0x3] %vm3162_vm5, %v6800_v1  ;;  %3205 = vst.msk [vmem:[#allocation2 + $0x158] sm:$0x3] %vm3162_vm5, %v6800_v1 }
 0x313   : > { %v2636_v0 = vadd.f32 %v7995_v36, %v2590_v47  ;;  %v2730_v57 = vsel %vm2666_vm15, %v2634_v39, %v2698_v51  ;;  %3206 = vst.msk [vmem:[#allocation2 + $0x160] sm:$0xff] %vm2743_vm11, %v6800_v1  ;;  %3208 = vst.msk [vmem:[#allocation2 + $0x170] sm:$0xff] %vm2743_vm11, %v6800_v1  ;;  %v8208_v36 = vld [vmem:[%s9560_s12] ss:$0 sm:$0xff] }
 0x314   : > { %v2701_v21 = vmul.f32 0.2, %v2637_v43  ;;  %5750 = vmatprep.mubr.msk.f32.mxu1 %vm2743_vm11, %v2730_v57  ;;  %vm2669_vm3 = vcmp.ge.f32.partialorder %v2637_v43, 0.0  ;;  %3207 = vst.msk [vmem:[#allocation2 + $0x168] sm:$0x3] %vm3162_vm5, %v6800_v1 }
 0x315   : > { %vm2668_vm4 = vcmp.ge.f32.partialorder %v2636_v0, 0.0  ;;  %v2700_v48 = vmul.f32 0.2, %v2636_v0  ;;  %5751 = vmatmul.mubr.msk.f32.gmra.mrb[36].mxu1 %vm2743_vm11, %v2731_v56  ;;  %3209 = vst.msk [vmem:[#allocation2 + $0x178] sm:$0x3] %vm3162_vm5, %v6800_v1 }
 0x316   : > { %v2733_v62 = vsel %vm2669_vm3, %v2637_v43, %v2701_v21  ;;  %3210 = vst.msk [vmem:[#allocation2 + $0x180] sm:$0xff] %vm2743_vm11, %v6800_v1  ;;  %3212 = vst.msk [vmem:[#allocation2 + $0x190] sm:$0xff] %vm2743_vm11, %v6800_v1 }
 0x317   : > { %v2732_v59 = vsel %vm2668_vm4, %v2636_v0, %v2700_v48  ;;  %3211 = vst.msk [vmem:[#allocation2 + $0x188] sm:$0x3] %vm3162_vm5, %v6800_v1  ;;  %3213 = vst.msk [vmem:[#allocation2 + $0x198] sm:$0x3] %vm3162_vm5, %v6800_v1 }
 0x318   : > { %5753 = vmatprep.mubr.msk.f32.mxu1 %vm2743_vm11, %v2732_v59  ;;  %3214 = vst.msk [vmem:[#allocation2 + $0x1a0] sm:$0xff] %vm2743_vm11, %v6800_v1  ;;  %3216 = vst.msk [vmem:[#allocation2 + $0x1b0] sm:$0xff] %vm2743_vm11, %v6800_v1 }
 0x319   : > { %5754 = vmatmul.mubr.msk.f32.gmra.mrb[38].mxu1 %vm2743_vm11, %v2733_v62  ;;  %3215 = vst.msk [vmem:[#allocation2 + $0x1a8] sm:$0x3] %vm3162_vm5, %v6800_v1  ;;  %3217 = vst.msk [vmem:[#allocation2 + $0x1b8] sm:$0x3] %vm3162_vm5, %v6800_v1 }
 0x31a   : > { %3218 = vst.msk [vmem:[#allocation2 + $0x1c0] sm:$0xff] %vm2743_vm11, %v6800_v1  ;;  %3222 = vst.msk [vmem:[#allocation2 + $0x1e0] sm:$0xff] %vm2743_vm11, %v6800_v1 }
 0x31b   : > { %3219 = vst.msk [vmem:[#allocation2 + $0x1c8] sm:$0x3] %vm3162_vm5, %v6800_v1  ;;  %3223 = vst.msk [vmem:[#allocation2 + $0x1e8] sm:$0x3] %vm3162_vm5, %v6800_v1 }
 0x31c   : > { %3224 = vst.msk [vmem:[#allocation2 + $0x1f0] sm:$0xff] %vm2743_vm11, %v6800_v1  ;;  %3226 = vst.msk [vmem:[#allocation2 + $0x200] sm:$0xff] %vm2743_vm11, %v6800_v1 }
 0x31d   : > { %3225 = vst.msk [vmem:[#allocation2 + $0x1f8] sm:$0x3] %vm3162_vm5, %v6800_v1  ;;  %3227 = vst.msk [vmem:[#allocation2 + $0x208] sm:$0x3] %vm3162_vm5, %v6800_v1 }
 0x31e   : > { %3228 = vst.msk [vmem:[#allocation2 + $0x210] sm:$0xff] %vm2743_vm11, %v6800_v1  ;;  %3230 = vst.msk [vmem:[#allocation2 + $0x220] sm:$0xff] %vm2743_vm11, %v6800_v1 }
 0x31f   : > { %3229 = vst.msk [vmem:[#allocation2 + $0x218] sm:$0x3] %vm3162_vm5, %v6800_v1  ;;  %3231 = vst.msk [vmem:[#allocation2 + $0x228] sm:$0x3] %vm3162_vm5, %v6800_v1 }
 0x320   : > { %3232 = vst.msk [vmem:[#allocation2 + $0x230] sm:$0xff] %vm2743_vm11, %v6800_v1  ;;  %3234 = vst.msk [vmem:[#allocation2 + $0x240] sm:$0xff] %vm2743_vm11, %v6800_v1 }
 0x321   : > { %3233 = vst.msk [vmem:[#allocation2 + $0x238] sm:$0x3] %vm3162_vm5, %v6800_v1  ;;  %3235 = vst.msk [vmem:[#allocation2 + $0x248] sm:$0x3] %vm3162_vm5, %v6800_v1 }
 0x322   : > { %3236 = vst.msk [vmem:[#allocation2 + $0x250] sm:$0xff] %vm2743_vm11, %v6800_v1  ;;  %3238 = vst.msk [vmem:[#allocation2 + $0x260] sm:$0xff] %vm2743_vm11, %v6800_v1 }
 0x323   : > { %3237 = vst.msk [vmem:[#allocation2 + $0x258] sm:$0x3] %vm3162_vm5, %v6800_v1  ;;  %3239 = vst.msk [vmem:[#allocation2 + $0x268] sm:$0x3] %vm3162_vm5, %v6800_v1 }
 0x3b0   : > { %v5710_v3 = vpop.f32.mrb[8].mxu1 }
 0x3b1   : > { %v2912_v23 = vadd.f32 %v5710_v3, %v8208_v36  ;;  %v2906_v8 = vpop.f32.mrb[9].mxu1 }
 0x3b2   : > { %v2907_v44 = vadd.f32 %v8208_v36, %v2906_v8 }
 0x3b3   : > { %vm3066_vm6 = vcmp.ge.f32.partialorder %v2912_v23, 0.0  ;;  %v3098_v60 = vmul.f32 0.2, %v2912_v23 }
 0x3b4   : > { %vm3065_vm7 = vcmp.ge.f32.partialorder %v2907_v44, 0.0  ;;  %v3097_v9 = vmul.f32 0.2, %v2907_v44  ;;  %v5713_v20 = vpop.f32.mrb[10].mxu1 }
 0x3b5   : > { %v3130_v17 = vsel %vm3066_vm6, %v2912_v23, %v3098_v60  ;;  %v2922_v2 = vadd.f32 %v5713_v20, %v8208_v36  ;;  %v2916_v4 = vpop.f32.mrb[11].mxu1 }
 0x3b6   : > { %3244 = vst.msk [vmem:[#allocation2 + $0x21] sm:$0xff] %vm2743_vm11, %v3130_v17  ;;  %v3129_v40 = vsel %vm3065_vm7, %v2907_v44, %v3097_v9  ;;  %v2917_v15 = vadd.f32 %v8208_v36, %v2916_v4 }
 0x3b7   : > { %3243 = vst.msk [vmem:[#allocation2 + $0x11] sm:$0xff] %vm2743_vm11, %v3129_v40  ;;  %vm3068_vm8 = vcmp.ge.f32.partialorder %v2922_v2, 0.0  ;;  %v3100_v53 = vmul.f32 0.2, %v2922_v2 }
 0x3b8   : > { %vm3067_vm9 = vcmp.ge.f32.partialorder %v2917_v15, 0.0  ;;  %v3099_v63 = vmul.f32 0.2, %v2917_v15  ;;  %v5716_v18 = vpop.f32.mrb[12].mxu1 }
 0x3b9   : > { %v3132_v24 = vsel %vm3068_vm8, %v2922_v2, %v3100_v53  ;;  %v2932_v10 = vadd.f32 %v5716_v18, %v8208_v36  ;;  %v2926_v31 = vpop.f32.mrb[13].mxu1 }
 0x3ba   : > { %3246 = vst.msk [vmem:[#allocation2 + $0x41] sm:$0xff] %vm2743_vm11, %v3132_v24  ;;  %v3131_v38 = vsel %vm3067_vm9, %v2917_v15, %v3099_v63  ;;  %v2927_v14 = vadd.f32 %v8208_v36, %v2926_v31 }
 0x3bb   : > { %3245 = vst.msk [vmem:[#allocation2 + $0x31] sm:$0xff] %vm2743_vm11, %v3131_v38  ;;  %vm3070_vm10 = vcmp.ge.f32.partialorder %v2932_v10, 0.0  ;;  %v3102_v12 = vmul.f32 0.2, %v2932_v10 }
 0x3bc   : > { %vm3069_vm12 = vcmp.ge.f32.partialorder %v2927_v14, 0.0  ;;  %v3101_v55 = vmul.f32 0.2, %v2927_v14  ;;  %v5719_v11 = vpop.f32.mrb[14].mxu1 }
 0x3bd   : > { %v3134_v5 = vsel %vm3070_vm10, %v2932_v10, %v3102_v12  ;;  %v2942_v26 = vadd.f32 %v5719_v11, %v8208_v36  ;;  %v2936_v34 = vpop.f32.mrb[15].mxu1  ;;  %v3313_v32 = vld [vmem:[#allocation2 + $0x21] sm:$0xff] }
 0x3be   : > { %v3644_v54 = vld [vmem:[#allocation2 + $0x22] sm:$0xff]  ;;  %3248 = vst.msk [vmem:[#allocation2 + $0x61] sm:$0xff] %vm2743_vm11, %v3134_v5  ;;  %v3133_v19 = vsel %vm3069_vm12, %v2927_v14, %v3101_v55  ;;  %v2937_v29 = vadd.f32 %v8208_v36, %v2936_v34  ;;  %v3312_v22 = vld [vmem:[#allocation2 + $0x11] sm:$0xff] }
 0x3bf   : > { %v3643_v6 = vld [vmem:[#allocation2 + $0x12] sm:$0xff]  ;;  %3247 = vst.msk [vmem:[#allocation2 + $0x51] sm:$0xff] %vm2743_vm11, %v3133_v19  ;;  %vm3072_vm13 = vcmp.ge.f32.partialorder %v2942_v26, 0.0  ;;  %v3104_v27 = vmul.f32 0.2, %v2942_v26  ;;  %v6226_v61 = vpack.i.bf16 %v3313_v32, %v3312_v22 }
 0x3c0   : > { %v8224_v28 = vpack.i.bf16 %v3644_v54, %v3643_v6  ;;  %vm3071_vm14 = vcmp.ge.f32.partialorder %v2937_v29, 0.0  ;;  %v3103_v25 = vmul.f32 0.2, %v2937_v29  ;;  %v5722_v33 = vpop.f32.mrb[16].mxu1 }
 0x3c1   : > { %v3136_v7 = vsel %vm3072_vm13, %v2942_v26, %v3104_v27  ;;  %v2952_v16 = vadd.f32 %v5722_v33, %v8208_v36  ;;  %6227 = vrot.lane.b32.xlu1 %v6226_v61, %s6801_s30  ;;  %6222 = vrot.lane.b32.xlu0 %v6226_v61, %s6799_s28  ;;  %v2946_v46 = vpop.f32.mrb[17].mxu1  ;;  %v3646_v58 = vld [vmem:[#allocation2 + $0x42] sm:$0xff] }
 0x3c2   : > { %3250 = vst.msk [vmem:[#allocation2 + $0x81] sm:$0xff] %vm2743_vm11, %v3136_v7  ;;  %v3135_v52 = vsel %vm3071_vm14, %v2937_v29, %v3103_v25  ;;  %v2947_v37 = vadd.f32 %v8208_v36, %v2946_v46  ;;  %v3645_v30 = vld [vmem:[#allocation2 + $0x32] sm:$0xff]  ;;  %v8232_v42 = vld [vmem:[#allocation2 + $0x41] sm:$0xff] }
 0x3c3   : > { %3249 = vst.msk [vmem:[#allocation2 + $0x71] sm:$0xff] %vm2743_vm11, %v3135_v52  ;;  %vm3074_vm15 = vcmp.ge.f32.partialorder %v2952_v16, 0.0  ;;  %v3106_v35 = vmul.f32 0.2, %v2952_v16  ;;  %v3918_v41 = vld [vmem:[#allocation2 + $0x31] sm:$0xff]  ;;  %v8234_v45 = vpack.i.bf16 %v3646_v58, %v3645_v30 }
 0x3c4   : > { %vm3073_vm3 = vcmp.ge.f32.partialorder %v2947_v37, 0.0  ;;  %v3105_v49 = vmul.f32 0.2, %v2947_v37  ;;  %v5725_v39 = vpop.f32.mrb[18].mxu1  ;;  %v8242_v57 = vpack.i.bf16 %v3918_v41, %v3313_v32  ;;  %v6241_v48 = vpack.i.bf16 %v8232_v42, %v3918_v41 }
 0x3c5   : > { %v3138_v50 = vsel %vm3074_vm15, %v2952_v16, %v3106_v35  ;;  %v2962_v51 = vadd.f32 %v5725_v39, %v8208_v36  ;;  %6232 = vrot.lane.b32.xlu1 %v8224_v28, %s6802_s19  ;;  %6237 = vrot.lane.b32.xlu0 %v6226_v61, %s6803_s20  ;;  %v2956_v13 = vpop.f32.mrb[19].mxu1  ;;  %v3648_v43 = vld [vmem:[#allocation2 + $0x62] sm:$0xff] }
 0x3c6   : > { %3253 = vst.msk [vmem:[#allocation2 + $0xc1] sm:$0xff] %vm2743_vm11, %v3138_v50  ;;  %v3137_v47 = vsel %vm3073_vm3, %v2947_v37, %v3105_v49  ;;  %v2957_v0 = vadd.f32 %v8208_v36, %v2956_v13  ;;  %v3647_v21 = vld [vmem:[#allocation2 + $0x52] sm:$0xff]  ;;  %v8250_v23 = vld [vmem:[#allocation2 + $0x61] sm:$0xff] }
 0x3c7   : > { %3252 = vst.msk [vmem:[#allocation2 + $0xb1] sm:$0xff] %vm2743_vm11, %v3137_v47  ;;  %vm3076_vm4 = vcmp.ge.f32.partialorder %v2962_v51, 0.0  ;;  %v3108_v56 = vmul.f32 0.2, %v2962_v51  ;;  %v8246_v59 = vpack.i.bf16 %v3648_v43, %v3647_v21  ;;  %v8248_v3 = vld [vmem:[#allocation2 + $0x51] sm:$0xff] }
 0x3c8   : > { %vm3075_vm5 = vcmp.ge.f32.partialorder %v2957_v0, 0.0  ;;  %v3107_v62 = vmul.f32 0.2, %v2957_v0  ;;  %v5728_v1 = vpop.f32.mrb[20].mxu1  ;;  %v8261_v40 = vpack.i.bf16 %v8250_v23, %v8248_v3 }
 0x3c9   : > { %v3140_v8 = vsel %vm3076_vm4, %v2962_v51, %v3108_v56  ;;  %v2972_v44 = vadd.f32 %v5728_v1, %v8208_v36  ;;  %6257 = vrot.lane.b32.xlu0 %v8242_v57, %s6804_s21  ;;  %6242 = vrot.lane.b32.xlu1 %v6241_v48, %s6799_s28  ;;  %v2966_v60 = vpop.f32.mrb[21].mxu1  ;;  %v3650_v9 = vld [vmem:[#allocation2 + $0x82] sm:$0xff] }
 0x3ca   : > { %3255 = vst.msk [vmem:[#allocation2 + $0xe1] sm:$0xff] %vm2743_vm11, %v3140_v8  ;;  %v3139_v20 = vsel %vm3075_vm5, %v2957_v0, %v3107_v62  ;;  %v2967_v17 = vadd.f32 %v8208_v36, %v2966_v60  ;;  %v3649_v2 = vld [vmem:[#allocation2 + $0x72] sm:$0xff]  ;;  %v8282_v29 = vld [vmem:[#allocation2 + $0x81] sm:$0xff] }
 0x3cb   : > { %3254 = vst.msk [vmem:[#allocation2 + $0xd1] sm:$0xff] %vm2743_vm11, %v3139_v20  ;;  %vm3078_vm6 = vcmp.ge.f32.partialorder %v2972_v44, 0.0  ;;  %v3110_v4 = vmul.f32 0.2, %v2972_v44  ;;  %v8263_v15 = vpack.i.bf16 %v3650_v9, %v3649_v2  ;;  %v8280_v19 = vld [vmem:[#allocation2 + $0x71] sm:$0xff]  ;;  %9602 = vst [vmem:[#allocation3_spill] sm:$0xff] %v8282_v29 }
 0x3cc   : > { %vm3077_vm7 = vcmp.ge.f32.partialorder %v2967_v17, 0.0  ;;  %v3109_v53 = vmul.f32 0.2, %v2967_v17  ;;  %v5731_v63 = vpop.f32.mrb[22].mxu1  ;;  %v8297_v52 = vpack.i.bf16 %v8282_v29, %v8280_v19  ;;  %v4421_v8 = vld [vmem:[%s9561_s13] sm:$0xff]  ;;  %v6805_v9 = vmov 0.0|0.0  }
 0x3cd   : > { %v3142_v18 = vsel %vm3078_vm6, %v2972_v44, %v3110_v4  ;;  %v2982_v24 = vadd.f32 %v5731_v63, %v8208_v36  ;;  %6247 = vrot.lane.b32.xlu1 %v6241_v48, %s6801_s30  ;;  %6267 = vrot.lane.b32.xlu0 %v8261_v40, %s6799_s28  ;;  %v2976_v10 = vpop.f32.mrb[23].mxu1  ;;  %v8286_v61 = vld [vmem:[#allocation2 + $0xc0] sm:$0xff]  ;;  %v4422_v20 = vld [vmem:[%s9561_s13 + $0x8] sm:$0xff] }
 0x3ce   : > { %3257 = vst.msk [vmem:[#allocation2 + $0x101] sm:$0xff] %vm2743_vm11, %v3142_v18  ;;  %v3141_v31 = vsel %vm3077_vm7, %v2967_v17, %v3109_v53  ;;  %v2977_v38 = vadd.f32 %v8208_v36, %v2976_v10  ;;  %v8284_v27 = vld [vmem:[#allocation2 + $0xb0] sm:$0xff]  ;;  %v8301_v49 = vld [vmem:[#allocation2 + $0xc1] sm:$0xff]  ;;  %5904 = vmatprep.subr.bf16.mxu1 %v6805_v9  ;;  %v5905_v18 = vpack.c.bf16 %v4422_v20, %v4421_v8 }
 0x3cf   : > { %3256 = vst.msk [vmem:[#allocation2 + $0xf1] sm:$0xff] %vm2743_vm11, %v3141_v31  ;;  %vm3080_vm8 = vcmp.ge.f32.partialorder %v2982_v24, 0.0  ;;  %v3112_v14 = vmul.f32 0.2, %v2982_v24  ;;  %v6296_v37 = vpack.i.bf16 %v8286_v61, %v8284_v27  ;;  %v3320_v41 = vld [vmem:[#allocation2 + $0xb1] sm:$0xff]  ;;  %v4425_v20 = vld [vmem:[%s9561_s13 + $0x20] sm:$0xff] }
 0x3d0   : > { %vm3079_vm9 = vcmp.ge.f32.partialorder %v2977_v38, 0.0  ;;  %v3111_v12 = vmul.f32 0.2, %v2977_v38  ;;  %v5734_v55 = vpop.f32.mrb[24].mxu1  ;;  %v8311_v0 = vpack.i.bf16 %v8301_v49, %v3320_v41  ;;  %5906 = vmatpush1.bf16.msra.mxu1 %v5905_v18 }
 0x3d1   : > { %v3144_v11 = vsel %vm3080_vm8, %v2982_v24, %v3112_v14  ;;  %v2992_v5 = vadd.f32 %v5734_v55, %v8208_v36  ;;  %6252 = vrot.lane.b32.xlu1 %v8234_v45, %s6802_s19  ;;  %6272 = vrot.lane.b32.xlu0 %v8261_v40, %s6801_s30  ;;  %v2986_v26 = vpop.f32.mrb[25].mxu1  ;;  %v8330_v63 = vld [vmem:[#allocation2 + $0xe1] sm:$0xff] }
 0x3d2   : > { %3259 = vst.msk [vmem:[#allocation2 + $0x121] sm:$0xff] %vm2743_vm11, %v3144_v11  ;;  %v3143_v34 = vsel %vm3079_vm9, %v2977_v38, %v3111_v12  ;;  %v2987_v32 = vadd.f32 %v8208_v36, %v2986_v26  ;;  %v8328_v53 = vld [vmem:[#allocation2 + $0xd1] sm:$0xff]  ;;  %5907 = vmatprep.subr.bf16.mxu1 %v6805_v9 }
 0x3d3   : > { %3258 = vst.msk [vmem:[#allocation2 + $0x111] sm:$0xff] %vm2743_vm11, %v3143_v34  ;;  %vm3082_vm10 = vcmp.ge.f32.partialorder %v2992_v5, 0.0  ;;  %v3114_v54 = vmul.f32 0.2, %v2992_v5  ;;  %v8342_v55 = vpack.i.bf16 %v8330_v63, %v8328_v53  ;;  %v8344_v11 = vld [vmem:[#allocation2 + $0xd0] sm:$0xff] }
 0x3d4   : > { %vm3081_vm12 = vcmp.ge.f32.partialorder %v2987_v32, 0.0  ;;  %v3113_v22 = vmul.f32 0.2, %v2987_v32  ;;  %v5737_v6 = vpop.f32.mrb[26].mxu1 }
 0x3d5   : > { %v3146_v25 = vsel %vm3082_vm10, %v2992_v5, %v3114_v54  ;;  %v3002_v33 = vadd.f32 %v5737_v6, %v8208_v36  ;;  %6262 = vrot.lane.b32.xlu1 %v6241_v48, %s6803_s20  ;;  %6277 = vrot.lane.b32.xlu0 %v8246_v59, %s6802_s19  ;;  %v2996_v7 = vpop.f32.mrb[27].mxu1  ;;  %v8346_v5 = vld [vmem:[#allocation2 + $0xe0] sm:$0xff] }
 0x3d6   : > { %3262 = vst.msk [vmem:[#allocation2 + $0x161] sm:$0xff] %vm2743_vm11, %v3146_v25  ;;  %v3145_v16 = vsel %vm3081_vm12, %v2987_v32, %v3113_v22  ;;  %v2997_v46 = vadd.f32 %v8208_v36, %v2996_v7  ;;  %v8349_v32 = vld [vmem:[#allocation2 + $0xf0] sm:$0xff]  ;;  %v8351_v54 = vld [vmem:[#allocation2 + $0x100] sm:$0xff] }
 0x3d7   : > { %3261 = vst.msk [vmem:[#allocation2 + $0x151] sm:$0xff] %vm2743_vm11, %v3145_v16  ;;  %vm3084_vm13 = vcmp.ge.f32.partialorder %v3002_v33, 0.0  ;;  %v3116_v58 = vmul.f32 0.2, %v3002_v33 }
 0x3d8   : > { %vm3083_vm14 = vcmp.ge.f32.partialorder %v2997_v46, 0.0  ;;  %v3115_v30 = vmul.f32 0.2, %v2997_v46  ;;  %v5740_v35 = vpop.f32.mrb[28].mxu1 }
 0x3d9   : > { %v3148_v39 = vsel %vm3084_vm13, %v3002_v33, %v3116_v58  ;;  %v3012_v50 = vadd.f32 %v5740_v35, %v8208_v36  ;;  %6282 = vrot.lane.b32.xlu1 %v8297_v52, %s6799_s28  ;;  %6297 = vrot.lane.b32.xlu0 %v6296_v37, %s6801_s30  ;;  %v3006_v51 = vpop.f32.mrb[29].mxu1  ;;  %v4423_v33 = vld [vmem:[%s9561_s13 + $0x10] sm:$0xff]  ;;  %v6316_v37 = vpack.i.bf16 %v8346_v5, %v8344_v11  ;;  %v8387_v8 = vld [vmem:[#allocation2 + $0x121] sm:$0xff] }
 0x3da   : > { %3264 = vst.msk [vmem:[#allocation2 + $0x181] sm:$0xff] %vm2743_vm11, %v3148_v39  ;;  %v3147_v13 = vsel %vm3083_vm14, %v2997_v46, %v3115_v30  ;;  %v3007_v43 = vadd.f32 %v8208_v36, %v3006_v51  ;;  %v4424_v46 = vld [vmem:[%s9561_s13 + $0x18] sm:$0xff]  ;;  %v6336_v30 = vpack.i.bf16 %v8351_v54, %v8349_v32  ;;  %9603 = vst [vmem:[#allocation4_spill] sm:$0xff] %v8387_v8 }
 0x3db   : > { %3263 = vst.msk [vmem:[#allocation2 + $0x171] sm:$0xff] %vm2743_vm11, %v3147_v13  ;;  %vm3086_vm15 = vcmp.ge.f32.partialorder %v3012_v50, 0.0  ;;  %v3118_v47 = vmul.f32 0.2, %v3012_v50  ;;  %v8371_v39 = vld [vmem:[#allocation2 + $0xf1] sm:$0xff]  ;;  %v5908_v51 = vpack.c.bf16 %v4424_v46, %v4423_v33 }
 0x3dc   : > { %vm3085_vm3 = vcmp.ge.f32.partialorder %v3007_v43, 0.0  ;;  %v3117_v21 = vmul.f32 0.2, %v3007_v43  ;;  %v5743_v56 = vpop.f32.mrb[30].mxu1  ;;  %v8426_v33 = vld [vmem:[#allocation2 + $0x110] sm:$0xff] }
 0x3dd   : > { %v3150_v48 = vsel %vm3086_vm15, %v3012_v50, %v3118_v47  ;;  %v3022_v62 = vadd.f32 %v5743_v56, %v8208_v36  ;;  %6287 = vrot.lane.b32.xlu1 %v8297_v52, %s6801_s30  ;;  %6302 = vrot.lane.b32.xlu0 %v8311_v0, %s6802_s19  ;;  %v3016_v1 = vpop.f32.mrb[31].mxu1  ;;  %v8373_v50 = vld [vmem:[#allocation2 + $0x101] sm:$0xff]  ;;  %vm3592_vm15 = vcmask 392192  }
 0x3de   : > { %3266 = vst.msk [vmem:[#allocation2 + $0x1a1] sm:$0xff] %vm2743_vm11, %v3150_v48  ;;  %v3149_v44 = vsel %vm3085_vm3, %v3007_v43, %v3117_v21  ;;  %v3017_v60 = vadd.f32 %v8208_v36, %v3016_v1  ;;  %5909 = vmatpush1.bf16.msra.mxu1 %v5908_v51  ;;  %v8385_v1 = vld [vmem:[#allocation2 + $0x111] sm:$0xff]  ;;  %v8444_v51 = vld [vmem:[#allocation2 + $0x161] sm:$0xff]  ;;  %vm3609_vm3 = vcmask 654336  }
 0x3df   : > { %3265 = vst.msk [vmem:[#allocation2 + $0x191] sm:$0xff] %vm2743_vm11, %v3149_v44  ;;  %vm3088_vm4 = vcmp.ge.f32.partialorder %v3022_v62, 0.0  ;;  %v3120_v17 = vmul.f32 0.2, %v3022_v62  ;;  %5910 = vmatprep.subr.bf16.mxu1 %v6805_v9  ;;  %v8430_v46 = vld [vmem:[#allocation2 + $0x152] sm:$0xff]  ;;  %9605 = vst [vmem:[#allocation6_spill] sm:$0xff] %v8444_v51 }
 0x3e0   : > { %vm3087_vm5 = vcmp.ge.f32.partialorder %v3017_v60, 0.0  ;;  %v3119_v2 = vmul.f32 0.2, %v3017_v60  ;;  %v5746_v4 = vpop.f32.mrb[32].mxu1  ;;  %9604 = vst [vmem:[#allocation5_spill] sm:$0xff] %v8430_v46 }
 0x3e1   : > { %v3152_v24 = vsel %vm3088_vm4, %v3022_v62, %v3120_v17  ;;  %v3032_v10 = vadd.f32 %v5746_v4, %v8208_v36  ;;  %6292 = vrot.lane.b32.xlu1 %v8263_v15, %s6802_s19  ;;  %6307 = vrot.lane.b32.xlu0 %v8311_v0, %s6799_s28  ;;  %v3026_v31 = vpop.f32.mrb[33].mxu1  ;;  %v8383_v62 = vpack.i.bf16 %v8373_v50, %v8371_v39  ;;  %v4426_v17 = vld [vmem:[%s9561_s13 + $0x28] sm:$0xff]  ;;  %vm3626_vm4 = vcmask 916480  }
 0x3e2   : > { %3268 = vst.msk [vmem:[#allocation2 + $0x1c1] sm:$0xff] %vm2743_vm11, %v3152_v24  ;;  %v3151_v38 = vsel %vm3087_vm5, %v3017_v60, %v3119_v2  ;;  %v3027_v14 = vadd.f32 %v8208_v36, %v3026_v31  ;;  %v5911_v24 = vpack.c.bf16 %v4426_v17, %v4425_v20  ;;  %v8472_v20 = vld [vmem:[#allocation2 + $0x181] sm:$0xff]  ;;  %v4431_v17 = vld [vmem:[%s9561_s13 + $0x50] sm:$0xff] }
 0x3e3   : > { %3267 = vst.msk [vmem:[#allocation2 + $0x1b1] sm:$0xff] %vm2743_vm11, %v3151_v38  ;;  %vm3090_vm6 = vcmp.ge.f32.partialorder %v3032_v10, 0.0  ;;  %v3122_v12 = vmul.f32 0.2, %v3032_v10  ;;  %9609 = vst [vmem:[#allocation10_spill] sm:$0xff] %v8472_v20 }
 0x3e4   : > { %vm3089_vm7 = vcmp.ge.f32.partialorder %v3027_v14, 0.0  ;;  %v3121_v26 = vmul.f32 0.2, %v3027_v14  ;;  %v5749_v34 = vpop.f32.mrb[34].mxu1  ;;  %5912 = vmatpush1.bf16.msra.mxu1 %v5911_v24 }
 0x3e5   : > { %v3154_v22 = vsel %vm3090_vm6, %v3032_v10, %v3122_v12  ;;  %v3042_v6 = vadd.f32 %v5749_v34, %v8208_v36  ;;  %6312 = vrot.lane.b32.xlu1 %v8311_v0, %s6797_s23  ;;  %6327 = vrot.lane.b32.xlu0 %v8342_v55, %s6799_s28  ;;  %v3036_v25 = vpop.f32.mrb[35].mxu1  ;;  %v6331_v12 = vpack.i.bf16 %v8344_v11, %v8286_v61 }
 0x3e6   : > { %3271 = vst.msk [vmem:[#allocation2 + $0x201] sm:$0xff] %vm2743_vm11, %v3154_v22  ;;  %v3153_v7 = vsel %vm3089_vm7, %v3027_v14, %v3121_v26  ;;  %v3037_v16 = vadd.f32 %v8208_v36, %v3036_v25  ;;  %v8412_v26 = vpack.i.bf16 %v8387_v8, %v8385_v1  ;;  %v8416_v22 = vld [vmem:[#allocation2 + $0x151] sm:$0xff]  ;;  %5913 = vmatprep.subr.bf16.mxu1 %v6805_v9 }
 0x3e7   : > { %3270 = vst.msk [vmem:[#allocation2 + $0x1f1] sm:$0xff] %vm2743_vm11, %v3153_v7  ;;  %vm3092_vm8 = vcmp.ge.f32.partialorder %v3042_v6, 0.0  ;;  %v3124_v58 = vmul.f32 0.2, %v3042_v6  ;;  %v8428_v7 = vld [vmem:[#allocation2 + $0x120] sm:$0xff]  ;;  %v8487_v24 = vld [vmem:[#allocation2 + $0x191] sm:$0xff] }
 0x3e8   : > { %vm3091_vm9 = vcmp.ge.f32.partialorder %v3037_v16, 0.0  ;;  %v3123_v35 = vmul.f32 0.2, %v3037_v16  ;;  %v5752_v41 = vpop.f32.mrb[36].mxu1  ;;  %9610 = vst [vmem:[#allocation11_spill] sm:$0xff] %v8487_v24 }
 0x3e9   : > { %v3156_v13 = vsel %vm3092_vm8, %v3042_v6, %v3124_v58  ;;  %v3052_v43 = vadd.f32 %v5752_v41, %v8208_v36  ;;  %6317 = vrot.lane.b32.xlu1 %v6316_v37, %s6801_s30  ;;  %6337 = vrot.lane.b32.xlu0 %v6336_v30, %s6801_s30  ;;  %v3046_v47 = vpop.f32.mrb[37].mxu1  ;;  %v4427_v58 = vld [vmem:[%s9561_s13 + $0x30] sm:$0xff]  ;;  %v4428_v37 = vld [vmem:[%s9561_s13 + $0x38] sm:$0xff] }
 0x3ea   : > { %3273 = vst.msk [vmem:[#allocation2 + $0x221] sm:$0xff] %vm2743_vm11, %v3156_v13  ;;  %v3155_v21 = vsel %vm3091_vm9, %v3037_v16, %v3123_v35  ;;  %v3047_v56 = vadd.f32 %v8208_v36, %v3046_v47  ;;  %v3635_v16 = vld [vmem:[#allocation2 + $0x142] sm:$0xff]  ;;  %v5914_v30 = vpack.c.bf16 %v4428_v37, %v4427_v58  ;;  %v6351_v35 = vpack.i.bf16 %v8428_v7, %v8426_v33 }
 0x3eb   : > { %3272 = vst.msk [vmem:[#allocation2 + $0x211] sm:$0xff] %vm2743_vm11, %v3155_v21  ;;  %vm3094_vm10 = vcmp.ge.f32.partialorder %v3052_v43, 0.0  ;;  %v3126_v48 = vmul.f32 0.2, %v3052_v43  ;;  %v6376_v41 = vpack.i.bf16 %v8430_v46, %v3635_v16  ;;  %v4429_v13 = vld [vmem:[%s9561_s13 + $0x40] sm:$0xff]  ;;  %v8457_v47 = vpack.i.bf16 %v8444_v51, %v8416_v22  ;;  %v8514_v16 = vld [vmem:[#allocation2 + $0x1b2] sm:$0xff] }
 0x3ec   : > { %vm3093_vm12 = vcmp.ge.f32.partialorder %v3047_v56, 0.0  ;;  %v3125_v44 = vmul.f32 0.2, %v3047_v56  ;;  %v5755_v60 = vpop.f32.mrb[38].mxu1  ;;  %5915 = vmatpush1.bf16.msra.mxu1 %v5914_v30  ;;  %9613 = vst [vmem:[#allocation14_spill] sm:$0xff] %v8514_v16  ;;  %v8521_v58 = vld [vmem:[#allocation2 + $0x182] sm:$0xff] }
 0x3ed   : > { %v3158_v2 = vsel %vm3094_vm10, %v3052_v43, %v3126_v48  ;;  %v3062_v4 = vadd.f32 %v5755_v60, %v8208_v36  ;;  %6322 = vrot.lane.b32.xlu1 %v8342_v55, %s6802_s19  ;;  %6342 = vrot.lane.b32.xlu0 %v8383_v62, %s6802_s19  ;;  %v3056_v18 = vpop.f32.mrb[39].mxu1  ;;  %v4430_v43 = vld [vmem:[%s9561_s13 + $0x48] sm:$0xff]  ;;  %v8470_v60 = vld [vmem:[#allocation2 + $0x171] sm:$0xff]  ;;  %9614 = vst [vmem:[#allocation15_spill] sm:$0xff] %v8521_v58 }
 0x3ee   : > { %3275 = vst.msk [vmem:[#allocation2 + $0x241] sm:$0xff] %vm2743_vm11, %v3158_v2  ;;  %v3157_v10 = vsel %vm3093_vm12, %v3047_v56, %v3125_v44  ;;  %v3057_v31 = vadd.f32 %v8208_v36, %v3056_v18  ;;  %v8403_v38 = vld [vmem:[#allocation2 + $0x1f1] sm:$0xff]  ;;  %v8414_v36 = vld [vmem:[#allocation2 + $0x141] sm:$0xff]  ;;  %5916 = vmatprep.subr.bf16.mxu1 %v6805_v9  ;;  %v5917_v21 = vpack.c.bf16 %v4430_v43, %v4429_v13  ;;  %9608 = vst [vmem:[#allocation9_spill] sm:$0xff] %v8470_v60 }
 0x3ef   : > { %3274 = vst.msk [vmem:[#allocation2 + $0x231] sm:$0xff] %vm2743_vm11, %v3157_v10  ;;  %vm3096_vm13 = vcmp.ge.f32.partialorder %v3062_v4, 0.0  ;;  %v3128_v14 = vmul.f32 0.2, %v3062_v4  ;;  %5178 = vmatprep.mubr.msk.f32.mxu1 %vm2743_vm11, %v8403_v38  ;;  %v6366_v25 = vpack.i.bf16 %v8416_v22, %v8414_v36  ;;  %v8459_v56 = vld [vmem:[#allocation2 + $0x172] sm:$0xff]  ;;  %v8465_v48 = vld [vmem:[#allocation2 + $0x162] sm:$0xff]  ;;  %v8485_v18 = vpack.i.bf16 %v8472_v20, %v8470_v60 }
 0x3f0   : > { %vm3095_vm14 = vcmp.ge.f32.partialorder %v3057_v31, 0.0  ;;  %v3127_v34 = vmul.f32 0.2, %v3057_v31  ;;  %9606 = vst [vmem:[#allocation7_spill] sm:$0xff] %v8459_v56  ;;  %9607 = vst [vmem:[#allocation8_spill] sm:$0xff] %v8465_v48  ;;  %5918 = vmatpush1.bf16.msra.mxu1 %v5917_v21  ;;  %v6401_v44 = vpack.i.bf16 %v8459_v56, %v8465_v48  ;;  %v4432_v2 = vld [vmem:[%s9561_s13 + $0x58] sm:$0xff]  ;;  %v6391_v10 = vpack.i.bf16 %v8470_v60, %v8444_v51 }
 0x3f1   : > { %v3160_v6 = vsel %vm3096_vm13, %v3062_v4, %v3128_v14  ;;  %6332 = vrot.lane.b32.xlu1 %v6331_v12, %s6798_s24  ;;  %6362 = vrot.lane.b32.xlu0 %v8412_v26, %s6799_s28  ;;  %v5920_v4 = vpack.c.bf16 %v4432_v2, %v4431_v17  ;;  %v8498_v14 = vld [vmem:[#allocation2 + $0x1a1] sm:$0xff]  ;;  %v4436_v13 = vld [vmem:[%s9561_s13 + $0x78] sm:$0xff] }
 0x3f2   : > { %3277 = vst.msk [vmem:[#allocation2 + $0x261] sm:$0xff] %vm2743_vm11, %v3160_v6  ;;  %v3159_v11 = vsel %vm3095_vm14, %v3057_v31, %v3127_v34  ;;  %5919 = vmatprep.subr.bf16.mxu1 %v6805_v9  ;;  %v6411_v31 = vpack.i.bf16 %v8487_v24, %v8472_v20  ;;  %9611 = vst [vmem:[#allocation12_spill] sm:$0xff] %v8498_v14  ;;  %v4433_v12 = vld [vmem:[%s9561_s13 + $0x60] sm:$0xff]  ;;  %v4434_v34 = vld [vmem:[%s9561_s13 + $0x68] sm:$0xff] }
 0x3f3   : > { %3276 = vst.msk [vmem:[#allocation2 + $0x251] sm:$0xff] %vm2743_vm11, %v3159_v11  ;;  %v5923_v6 = vpack.c.bf16 %v4434_v34, %v4433_v12  ;;  %v8510_v11 = vpack.i.bf16 %v8498_v14, %v8487_v24  ;;  %v8523_v37 = vld [vmem:[#allocation2 + $0x1a2] sm:$0xff]  ;;  %v8535_v43 = vld [vmem:[#allocation2 + $0x1b1] sm:$0xff] }
 0x3f4   : > { %5921 = vmatpush1.bf16.msra.mxu1 %v5920_v4  ;;  %9615 = vst [vmem:[#allocation16_spill] sm:$0xff] %v8523_v37  ;;  %9616 = vst [vmem:[#allocation17_spill] sm:$0xff] %v8535_v43  ;;  %v3343_v21 = vld [vmem:[#allocation2 + $0x1c1] sm:$0xff]  ;;  %v8556_v34 = vld [vmem:[#allocation2 + $0x1f0] sm:$0xff] }
 0x3f5   : > { %6347 = vrot.lane.b32.xlu1 %v8383_v62, %s6799_s28  ;;  %6367 = vrot.lane.b32.xlu0 %v6366_v25, %s6803_s20  ;;  %v8512_v25 = vld [vmem:[#allocation2 + $0x192] sm:$0xff]  ;;  %v8540_v17 = vpack.i.bf16 %v3343_v21, %v8535_v43  ;;  %v4437_v2 = vld [vmem:[%s9561_s13 + $0x80] sm:$0xff]  ;;  %v4438_v4 = vld [vmem:[%s9561_s13 + $0x88] sm:$0xff] }
 0x3f6   : > { %5922 = vmatprep.subr.bf16.mxu1 %v6805_v9  ;;  %9612 = vst [vmem:[#allocation13_spill] sm:$0xff] %v8512_v25  ;;  %v6421_v30 = vpack.i.bf16 %v8512_v25, %v8521_v58  ;;  %v8614_v20 = vld [vmem:[#allocation2 + $0x241] sm:$0xff] }
 0x3f7   : > { %9627 = vst [vmem:[#allocation28_spill] sm:$0xff] %v8614_v20 }
 0x3f8   : > { %5924 = vmatpush1.bf16.msra.mxu1 %v5923_v6  ;;  %v8558_v6 = vld [vmem:[#allocation2 + $0x200] sm:$0xff] }
 0x3f9   : > { %6352 = vrot.lane.b32.xlu1 %v6351_v35, %s6801_s30  ;;  %6377 = vrot.lane.b32.xlu0 %v6376_v41, %s6797_s23  ;;  %v6441_v35 = vpack.i.bf16 %v8514_v16, %v8523_v37  ;;  %v4435_v41 = vld [vmem:[%s9561_s13 + $0x70] sm:$0xff]  ;;  %9617 = vst [vmem:[#allocation18_spill] sm:$0xff] %v8558_v6 }
 0x3fa   : > { %5925 = vmatprep.subr.bf16.mxu1 %v6805_v9  ;;  %v8632_v8 = vld [vmem:[#allocation2 + $0x250] sm:$0xff] }
 0x3fb   : > { %9628 = vst [vmem:[#allocation29_spill] sm:$0xff] %v8632_v8 }
 0x3fd   : > { %6357 = vrot.lane.b32.xlu1 %v8412_v26, %s6802_s19  ;;  %6382 = vrot.lane.b32.xlu0 %v8457_v47, %s6798_s24 }
 0x401   : > { %6372 = vrot.lane.b32.xlu1 %v8457_v47, %s6804_s21  ;;  %6402 = vrot.lane.b32.xlu0 %v6401_v44, %s6797_s23  ;;  %v5926_v44 = vpack.c.bf16 %v4436_v13, %v4435_v41  ;;  %v8573_v13 = vld [vmem:[#allocation2 + $0x211] sm:$0xff] }
 0x402   : > { %9619 = vst [vmem:[#allocation20_spill] sm:$0xff] %v8573_v13 }
 0x403   : > { %5927 = vmatpush1.bf16.msra.mxu1 %v5926_v44  ;;  %v8580_v44 = vld [vmem:[#allocation2 + $0x210] sm:$0xff] }
 0x404   : > { %5928 = vmatprep.subr.bf16.mxu1 %v6805_v9  ;;  %v6431_v9 = vpack.i.bf16 %v8535_v43, %v8498_v14  ;;  %9620 = vst [vmem:[#allocation21_spill] sm:$0xff] %v8580_v44  ;;  %v8609_v43 = vld [vmem:[#allocation2 + $0x251] sm:$0xff] }
 0x405   : > { %6387 = vrot.lane.b32.xlu1 %v8457_v47, %s6799_s28  ;;  %6407 = vrot.lane.b32.xlu0 %v8485_v18, %s6798_s24  ;;  %9626 = vst [vmem:[#allocation27_spill] sm:$0xff] %v8609_v43 }
 0x409   : > { %6392 = vrot.lane.b32.xlu1 %v6391_v10, %s6803_s20  ;;  %6412 = vrot.lane.b32.xlu0 %v6411_v31, %s6803_s20  ;;  %v3296_v10 = vld [vmem:[#allocation2 + $0x1e1] sm:$0xff]  ;;  %v5929_v31 = vpack.c.bf16 %v4438_v4, %v4437_v2  ;;  %v8588_v4 = vld [vmem:[#allocation2 + $0x231] sm:$0xff] }
 0x40a   : > { %v6451_v12 = vpack.i.bf16 %v8403_v38, %v3296_v10  ;;  %v8582_v2 = vld [vmem:[#allocation2 + $0x220] sm:$0xff]  ;;  %9622 = vst [vmem:[#allocation23_spill] sm:$0xff] %v8588_v4  ;;  %v8630_v60 = vpack.i.bf16 %v8614_v20, %v8588_v4 }
 0x40b   : > { %5930 = vmatpush1.bf16.msra.mxu1 %v5929_v31  ;;  %9621 = vst [vmem:[#allocation22_spill] sm:$0xff] %v8582_v2  ;;  %v8593_v10 = vld [vmem:[#allocation2 + $0x221] sm:$0xff] }
 0x40c   : > { %9623 = vst [vmem:[#allocation24_spill] sm:$0xff] %v8593_v10  ;;  %v6501_v31 = vpack.i.bf16 %v8588_v4, %v8593_v10 }
 0x40d   : > { %6397 = vrot.lane.b32.xlu1 %v8485_v18, %s6804_s21  ;;  %6417 = vrot.lane.b32.xlu0 %v8510_v11, %s6804_s21 }
 0x411   : > { %6422 = vrot.lane.b32.xlu1 %v6421_v30, %s6797_s23  ;;  %6442 = vrot.lane.b32.xlu0 %v6441_v35, %s6797_s23  ;;  %v6471_v30 = vpack.i.bf16 %v8558_v6, %v8556_v34  ;;  %v8564_v35 = vld [vmem:[#allocation2 + $0x201] sm:$0xff]  ;;  %v8697_v6 = vld [vmem:[#allocation2 + $0x91] sm:$0xff] }
 0x412   : > { %9618 = vst [vmem:[#allocation19_spill] sm:$0xff] %v8564_v35  ;;  %v8571_v41 = vpack.i.bf16 %v8564_v35, %v8403_v38  ;;  %v6481_v21 = vpack.i.bf16 %v8573_v13, %v8564_v35  ;;  %v6486_v38 = vpack.i.bf16 %v8582_v2, %v8580_v44  ;;  %v6586_v35 = vpack.i.bf16 %v8426_v33, %v8351_v54 }
 0x413   : > { %9633 = vst [vmem:[#allocation34_spill] sm:$0xff] %v8697_v6  ;;  %v8708_v33 = vpack.i.bf16 %v8280_v19, %v8250_v23 }
 0x415   : > { %6427 = vrot.lane.b32.xlu1 %v8510_v11, %s6798_s24  ;;  %6447 = vrot.lane.b32.xlu0 %v8540_v17, %s6798_s24 }
 0x419   : > { %6432 = vrot.lane.b32.xlu1 %v6431_v9, %s6803_s20  ;;  %6452 = vrot.lane.b32.xlu0 %v6451_v12, %s6797_s23  ;;  %v8597_v9 = vld [vmem:[#allocation2 + $0x230] sm:$0xff] }
 0x41a   : > { %9624 = vst [vmem:[#allocation25_spill] sm:$0xff] %v8597_v9 }
 0x41d   : > { %6437 = vrot.lane.b32.xlu1 %v8540_v17, %s6804_s21  ;;  %6457 = vrot.lane.b32.xlu0 %v6471_v30, %s6798_s24 }
 0x421   : > { %6467 = vrot.lane.b32.xlu1 %v8571_v41, %s6804_s21  ;;  %6462 = vrot.lane.b32.xlu0 %v6451_v12, %s6803_s20  ;;  %v8599_v12 = vld [vmem:[#allocation2 + $0x240] sm:$0xff] }
 0x422   : > { %9625 = vst [vmem:[#allocation26_spill] sm:$0xff] %v8599_v12  ;;  %v6506_v14 = vpack.i.bf16 %v8599_v12, %v8597_v9  ;;  %v3335_v9 = vld [vmem:[#allocation2 + $0x260] sm:$0xff] }
 0x425   : > { %6472 = vrot.lane.b32.xlu0 %v6471_v30, %s6801_s30  ;;  %6482 = vrot.lane.b32.xlu1 %v6481_v21, %s6797_s23  ;;  %v8605_v30 = vpack.i.bf16 %v8593_v10, %v8573_v13  ;;  %v6521_v10 = vpack.i.bf16 %v8609_v43, %v8614_v20  ;;  %v8642_v13 = vpack.i.bf16 %v3335_v9, %v8632_v8 }
 0x429   : > { %6477 = vrot.lane.b32.xlu0 %v8571_v41, %s6802_s19  ;;  %6487 = vrot.lane.b32.xlu1 %v6486_v38, %s6798_s24 }
 0x42d   : > { %6492 = vrot.lane.b32.xlu1 %v6481_v21, %s6803_s20  ;;  %6502 = vrot.lane.b32.xlu0 %v6501_v31, %s6797_s23 }
 0x431   : > { %6497 = vrot.lane.b32.xlu1 %v8605_v30, %s6804_s21  ;;  %6507 = vrot.lane.b32.xlu0 %v6506_v14, %s6798_s24 }
 0x433   : > { %v8616_v24 = vpop.permute.xlu1 %6227  ;;  %v8618_v21 = vpop.permute.xlu0 %6222 }
 0x435   : > { %6512 = vrot.lane.b32.xlu0 %v6501_v31, %s6803_s20  ;;  %6522 = vrot.lane.b32.xlu1 %v6521_v10, %s6797_s23 }
 0x437   : > { %v8624_v12 = vpop.permute.xlu1 %6232  ;;  %v8626_v51 = vpop.permute.xlu0 %6237 }
 0x439   : > { %6517 = vrot.lane.b32.xlu0 %v8630_v60, %s6804_s21  ;;  %6537 = vrot.lane.b32.xlu1 %v6486_v38, %s6801_s30  ;;  %v8654_v38 = vpack.i.bf16 %v8248_v3, %v8232_v42  ;;  %v6551_v3 = vpack.i.bf16 %v8349_v32, %v8346_v5 }
 0x43b   : > { %v8637_v2 = vpop.permute.xlu0 %6257  ;;  %v8639_v31 = vpop.permute.xlu1 %6242 }
 0x43c   : > { %9629 = vst [vmem:[#allocation30_spill] sm:$0xff] %v8637_v2 }
 0x43d   : > { %6527 = vrot.lane.b32.xlu0 %v8642_v13, %s6798_s24  ;;  %6547 = vrot.lane.b32.xlu1 %v8605_v30, %s6802_s19 }
 0x43f   : > { %v8648_v20 = vpop.permute.xlu1 %6247  ;;  %v8650_v4 = vpop.permute.xlu0 %6267 }
 0x441   : > { %6532 = vrot.lane.b32.xlu0 %v8342_v55, %s6797_s23  ;;  %6557 = vrot.lane.b32.xlu1 %v8654_v38, %s6804_s21 }
 0x443   : > { %v8660_v9 = vpop.permute.xlu1 %6252  ;;  %v8662_v2 = vpop.permute.xlu0 %6272 }
 0x445   : > { %6542 = vrot.lane.b32.xlu0 %v8485_v18, %s6799_s28  ;;  %6567 = vrot.lane.b32.xlu1 %v8383_v62, %s6797_s23 }
 0x447   : > { %v8668_v8 = vpop.permute.xlu1 %6262  ;;  %v8670_v42 = vpop.permute.xlu0 %6277 }
 0x448   : > { %9630 = vst [vmem:[#allocation31_spill] sm:$0xff] %v8668_v8 }
 0x449   : > { %6552 = vrot.lane.b32.xlu0 %v6551_v3, %s6798_s24  ;;  %6577 = vrot.lane.b32.xlu1 %v8510_v11, %s6799_s28 }
 0x44b   : > { %v8677_v16 = vpop.permute.xlu1 %6282  ;;  %v8679_v44 = vpop.permute.xlu0 %6297 }
 0x44d   : > { %6562 = vrot.lane.b32.xlu0 %v8261_v40, %s6803_s20  ;;  %6587 = vrot.lane.b32.xlu1 %v6586_v35, %s6798_s24 }
 0x44f   : > { %v8686_v8 = vpop.permute.xlu1 %6287  ;;  %v8688_v5 = vpop.permute.xlu0 %6302 }
 0x450   : > { %9631 = vst [vmem:[#allocation32_spill] sm:$0xff] %v8686_v8  ;;  %v3915_v8 = vld [vmem:[#allocation2 + $0x130] sm:$0xff] }
 0x451   : > { %6572 = vrot.lane.b32.xlu0 %v6506_v14, %s6801_s30  ;;  %6597 = vrot.lane.b32.xlu1 %v8297_v52, %s6803_s20  ;;  %v6621_v52 = vpack.i.bf16 %v8697_v6, %v8282_v29  ;;  %v8712_v14 = vld [vmem:[#allocation2 + $0x261] sm:$0xff] }
 0x452   : > { %9634 = vst [vmem:[#allocation35_spill] sm:$0xff] %v8712_v14 }
 0x453   : > { %v8693_v32 = vpop.permute.xlu1 %6292  ;;  %v8695_v3 = vpop.permute.xlu0 %6307 }
 0x454   : > { %9632 = vst [vmem:[#allocation33_spill] sm:$0xff] %v8693_v32  ;;  %v8723_v32 = vpack.i.bf16 %v8712_v14, %v8609_v43  ;;  %v6611_v43 = vpack.i.bf16 %v3915_v8, %v8428_v7 }
 0x455   : > { %6582 = vrot.lane.b32.xlu0 %v8630_v60, %s6802_s19  ;;  %6617 = vrot.lane.b32.xlu1 %v6521_v10, %s6803_s20 }
 0x457   : > { %v8702_v40 = vpop.permute.xlu1 %6312  ;;  %v8704_v54 = vpop.permute.xlu0 %6327 }
 0x459   : > { %6592 = vrot.lane.b32.xlu0 %v8708_v33, %s6804_s21  ;;  %6622 = vrot.lane.b32.xlu1 %v6621_v52, %s6804_s21 }
 0x45b   : > { %v8717_v35 = vpop.permute.xlu1 %6317  ;;  %v8719_v10 = vpop.permute.xlu0 %6337 }
 0x45d   : > { %6602 = vrot.lane.b32.xlu0 %v8412_v26, %s6797_s23  ;;  %6632 = vrot.lane.b32.xlu1 %v8723_v32, %s6804_s21 }
 0x45f   : > { %v8729_v23 = vpop.permute.xlu1 %6322  ;;  %v8731_v19 = vpop.permute.xlu0 %6342 }
 0x461   : > { %6607 = vrot.lane.b32.xlu0 %v8540_v17, %s6799_s28  ;;  %6637 = vrot.lane.b32.xlu1 %v8224_v28, %s6797_s23 }
 0x463   : > { %v8737_v52 = vpop.permute.xlu1 %6332  ;;  %v8739_v14 = vpop.permute.xlu0 %6362 }
 0x464   : > { %9635 = vst [vmem:[#allocation36_spill] sm:$0xff] %v8737_v52  ;;  %9636 = vst [vmem:[#allocation37_spill] sm:$0xff] %v8739_v14  ;;  %v6320_v52 = vunpack.i.h.bf16 %v8717_v35 }
 0x465   : > { %6612 = vrot.lane.b32.xlu0 %v6611_v43, %s6798_s24  ;;  %6647 = vrot.lane.b32.xlu1 %v8571_v41, %s6799_s28 }
 0x467   : > { %v8745_v6 = vpop.permute.xlu1 %6347  ;;  %v8747_v29 = vpop.permute.xlu0 %6367 }
 0x469   : > { %6627 = vrot.lane.b32.xlu0 %v8311_v0, %s6803_s20  ;;  %6657 = vrot.lane.b32.xlu1 %v8242_v57, %s6798_s24  ;;  %v6651_v0 = vpack.i.bf16 %v8465_v48, %v8430_v46  ;;  %v6239_v48 = vunpack.i.l.bf16 %v8626_v51  ;;  %v6314_v46 = vunpack.i.l.bf16 %v8702_v40 }
 0x46b   : > { %v8753_v28 = vpop.permute.xlu1 %6352  ;;  %v8755_v14 = vpop.permute.xlu0 %6377 }
 0x46d   : > { %6642 = vrot.lane.b32.xlu0 %v8457_v47, %s6801_s30  ;;  %6667 = vrot.lane.b32.xlu1 %v8342_v55, %s6803_s20  ;;  %v6661_v47 = vpack.i.bf16 %v8328_v53, %v8301_v49  ;;  %v6696_v49 = vpack.i.bf16 %v8521_v58, %v8459_v56 }
 0x46f   : > { %v8761_v8 = vpop.permute.xlu1 %6357  ;;  %v8763_v7 = vpop.permute.xlu0 %6382 }
 0x471   : > { %6652 = vrot.lane.b32.xlu0 %v6651_v0, %s6802_s19  ;;  %6677 = vrot.lane.b32.xlu1 %v8485_v18, %s6801_s30 }
 0x473   : > { %v8770_v57 = vpop.permute.xlu1 %6372  ;;  %v8772_v43 = vpop.permute.xlu0 %6402 }
 0x475   : > { %6662 = vrot.lane.b32.xlu0 %v6661_v47, %s6804_s21  ;;  %6687 = vrot.lane.b32.xlu1 %v8642_v13, %s6801_s30  ;;  %v6240_v47 = vunpack.i.h.bf16 %v8626_v51  ;;  %v6304_v51 = vunpack.i.l.bf16 %v8688_v5 }
 0x477   : > { %v8779_v55 = vpop.permute.xlu1 %6387  ;;  %v8781_v41 = vpop.permute.xlu0 %6407 }
 0x479   : > { %6672 = vrot.lane.b32.xlu0 %v8234_v45, %s6797_s23  ;;  %6692 = vrot.lane.b32.xlu1 %v8723_v32, %s6802_s19  ;;  %v6706_v45 = vpack.i.bf16 %v8371_v39, %v8330_v63  ;;  %v6300_v63 = vunpack.i.h.bf16 %v8679_v44  ;;  %v3279_v39 = vld [vmem:[#allocation2 + $0x1e0] sm:$0xff] }
 0x47b   : > { %v8787_v18 = vpop.permute.xlu1 %6392  ;;  %v8789_v0 = vpop.permute.xlu0 %6412 }
 0x47d   : > { %6682 = vrot.lane.b32.xlu0 %v8605_v30, %s6799_s28  ;;  %6697 = vrot.lane.b32.xlu1 %v6696_v49, %s6802_s19  ;;  %v6731_v49 = vpack.i.bf16 %v8523_v37, %v8512_v25  ;;  %v4118_v37 = vsel %vm2743_vm11, %v8286_v61, %v6240_v47  ;;  %v6370_v61 = vunpack.i.h.bf16 %v8747_v29 }
 0x47f   : > { %v8796_v53 = vpop.permute.xlu1 %6397  ;;  %v8798_v13 = vpop.permute.xlu0 %6417  ;;  %v3577_v56 = vsel %vm2743_vm11, %v8556_v34, %v6370_v61 }
 0x481   : > { %6702 = vrot.lane.b32.xlu0 %v8654_v38, %s6798_s24  ;;  %6707 = vrot.lane.b32.xlu1 %v6706_v45, %s6804_s21  ;;  %v6315_v45 = vunpack.i.h.bf16 %v8702_v40  ;;  %v6305_v40 = vunpack.i.h.bf16 %v8688_v5 }
 0x483   : > { %v8807_v58 = vpop.permute.xlu1 %6422  ;;  %v8809_v30 = vpop.permute.xlu0 %6442 }
 0x484   : > { %9637 = vst [vmem:[#allocation38_spill] sm:$0xff] %v8809_v30  ;;  %v4117_v30 = vsel %vm2743_vm11, %v8284_v27, %v6239_v48  ;;  %v6369_v48 = vunpack.i.l.bf16 %v8747_v29  ;;  %v6319_v27 = vunpack.i.l.bf16 %v8717_v35  ;;  %v9653_v35 = vld [vmem:[#allocation25_spill] sm:$0xff] }
 0x485   : > { %6712 = vrot.lane.b32.xlu0 %v8383_v62, %s6803_s20  ;;  %6717 = vrot.lane.b32.xlu1 %v8246_v59, %s6797_s23  ;;  %v6299_v59 = vunpack.i.l.bf16 %v8679_v44  ;;  %v8867_v44 = vsel %vm685_vm0, %v4117_v30, %v6314_v46 }
 0x486   : > { %v3576_v29 = vsel %vm2743_vm11, %v3279_v39, %v6369_v48  ;;  %v6324_v39 = vunpack.i.l.bf16 %v8729_v23 }
 0x487   : > { %v8837_v62 = vpop.permute.xlu1 %6427  ;;  %v8839_v47 = vpop.permute.xlu0 %6447 }
 0x488   : > { %9638 = vst [vmem:[#allocation39_spill] sm:$0xff] %v8839_v47  ;;  %v8864_v47 = vsel %vm685_vm0, %v4118_v37, %v6315_v45  ;;  %v6379_v37 = vunpack.i.l.bf16 %v8755_v14 }
 0x489   : > { %6722 = vrot.lane.b32.xlu0 %v8510_v11, %s6801_s30  ;;  %6727 = vrot.lane.b32.xlu1 %v8630_v60, %s6799_s28 }
 0x48b   : > { %v8861_v38 = vpop.permute.xlu1 %6432  ;;  %v6453_v60 = vpop.permute.xlu0 %6452 }
 0x48c   : > { %v6455_v5 = vunpack.i.h.bf16 %v6453_v60  ;;  %v6454_v25 = vunpack.i.l.bf16 %v6453_v60  ;;  %v6325_v60 = vunpack.i.h.bf16 %v8729_v23 }
 0x48d   : > { %6732 = vrot.lane.b32.xlu0 %v6731_v49, %s6802_s19  ;;  %6737 = vrot.lane.b32.xlu1 %v8708_v33, %s6798_s24 }
 0x48e   : > { %v3584_v30 = vsel %vm685_vm0, %v3576_v29, %v6454_v25  ;;  %v3585_v45 = vsel %vm685_vm0, %v3577_v56, %v6455_v5  ;;  %v6380_v29 = vunpack.i.h.bf16 %v8755_v14  ;;  %v9639_v5 = vunpack.i.l.bf16 %v8618_v21 }
 0x48f   : > { %v3593_v48 = vsel %vm3592_vm15, %v3584_v30, %v6299_v59  ;;  %v3594_v34 = vsel %vm3592_vm15, %v3585_v45, %v6300_v63  ;;  %v8885_v49 = vpop.permute.xlu1 %6437  ;;  %v6458_v61 = vpop.permute.xlu0 %6457  ;;  %v9640_v63 = vpack.i.bf16 %v8385_v1, %v8373_v50  ;;  %v9641_v30 = vunpack.i.h.bf16 %v8618_v21 }
 0x490   : > { %v6459_v25 = vunpack.i.l.bf16 %v6458_v61  ;;  %v3601_v59 = vsel %vm694_vm1, %v3593_v48, %v9639_v5  ;;  %v6385_v56 = vunpack.i.h.bf16 %v8763_v7  ;;  %v6460_v33 = vunpack.i.h.bf16 %v6458_v61 }
 0x491   : > { %6742 = vrot.lane.b32.xlu0 %v9640_v63, %s6804_s21  ;;  %6747 = vrot.lane.b32.xlu1 %v8412_v26, %s6803_s20  ;;  %v3602_v45 = vsel %vm694_vm1, %v3594_v34, %v9641_v30  ;;  %v3610_v11 = vsel %vm3609_vm3, %v3601_v59, %v6304_v51  ;;  %v6374_v48 = vunpack.i.l.bf16 %v8770_v57  ;;  %v6394_v5 = vunpack.i.l.bf16 %v8787_v18 }
 0x492   : > { %v3618_v50 = vsel %vm703_vm2, %v3610_v11, %v6459_v25  ;;  %v3611_v21 = vsel %vm3609_vm3, %v3602_v45, %v6305_v40  ;;  %v6384_v34 = vunpack.i.l.bf16 %v8763_v7  ;;  %v6395_v14 = vunpack.i.h.bf16 %v8787_v18  ;;  %v9642_v25 = vld [vmem:[#allocation18_spill] sm:$0xff] }
 0x493   : > { %v8910_v1 = vpop.permute.xlu1 %6467  ;;  %v6463_v26 = vpop.permute.xlu0 %6462  ;;  %v6375_v61 = vunpack.i.h.bf16 %v8770_v57  ;;  %v6405_v51 = vunpack.i.h.bf16 %v8772_v43  ;;  %v6404_v59 = vunpack.i.l.bf16 %v8772_v43  ;;  %v3627_v46 = vsel %vm3626_vm4, %v3618_v50, %v6374_v48  ;;  %v9643_v50 = vld [vmem:[#allocation19_spill] sm:$0xff]  ;;  %v9659_v7 = vld [vmem:[#allocation34_spill] sm:$0xff] }
 0x494   : > { %v6465_v63 = vunpack.i.h.bf16 %v6463_v26  ;;  %v6464_v30 = vunpack.i.l.bf16 %v6463_v26  ;;  %v6415_v40 = vunpack.i.h.bf16 %v8789_v0  ;;  %4583 = vmatmul.mubr.f32.vlgmr.msra.gmra.mrb[40].mxu1 %v3627_v46  ;;  %v3619_v11 = vsel %vm703_vm2, %v3611_v21, %v6460_v33 }
 0x495   : > { %6752 = vrot.lane.b32.xlu0 %v8263_v15, %s6797_s23  ;;  %6757 = vrot.lane.b32.xlu1 %v8540_v17, %s6801_s30  ;;  %v3578_v45 = vsel %vm2743_vm11, %v9642_v25, %v6394_v5  ;;  %v6414_v48 = vunpack.i.l.bf16 %v8789_v0  ;;  %v6410_v5 = vunpack.i.h.bf16 %v8781_v41  ;;  %v3628_v0 = vsel %vm3626_vm4, %v3619_v11, %v6375_v61 }
 0x496   : > { %v3852_v18 = vsel %vm2743_vm11, %v8416_v22, %v6465_v63  ;;  %v3851_v57 = vsel %vm2743_vm11, %v8414_v36, %v6464_v30  ;;  %5179 = vmatprep.mubr.msk.f32.mxu1 %vm2743_vm11, %v9643_v50  ;;  %v9644_v63 = vld [vmem:[#allocation21_spill] sm:$0xff]  ;;  %v9647_v30 = vunpack.i.l.bf16 %v8616_v24  ;;  %v6409_v25 = vunpack.i.l.bf16 %v8781_v41 }
 0x497   : > { %v3860_v15 = vsel %vm685_vm0, %v3852_v18, %v6380_v29  ;;  %v3859_v17 = vsel %vm685_vm0, %v3851_v57, %v6379_v37  ;;  %v8936_v26 = vpop.permute.xlu0 %6472  ;;  %v6483_v22 = vpop.permute.xlu1 %6482  ;;  %v3579_v36 = vsel %vm2743_vm11, %v9644_v63, %v6395_v14  ;;  %v9645_v29 = vld [vmem:[#allocation3_spill] sm:$0xff]  ;;  %v9646_v37 = vld [vmem:[#allocation14_spill] sm:$0xff]  ;;  %v9648_v14 = vunpack.i.h.bf16 %v8616_v24 }
 0x498   : > { %v6475_v46 = vunpack.i.h.bf16 %v8936_v26  ;;  %v6485_v33 = vunpack.i.h.bf16 %v6483_v22  ;;  %v6484_v21 = vunpack.i.l.bf16 %v6483_v22  ;;  %v3867_v18 = vsel %vm3592_vm15, %v3859_v17, %v9647_v30  ;;  %4588 = vmatmul.mubr.f32.gmra.mrb[42].mxu1 %v3628_v0  ;;  %v9654_v30 = vld [vmem:[#allocation4_spill] sm:$0xff] }
 0x499   : > { %4321 = vrot.lane.b32.xlu0 %v9645_v29, %s6798_s24  ;;  %4297 = vrot.lane.b32.xlu1 %v9646_v37, %s6802_s19  ;;  %v3868_v57 = vsel %vm3592_vm15, %v3860_v15, %v9648_v14  ;;  %v9649_v15 = vld [vmem:[#allocation20_spill] sm:$0xff]  ;;  %v9650_v63 = vunpack.i.l.bf16 %v8695_v3  ;;  %v9656_v14 = vunpack.i.h.bf16 %v8639_v31 }
 0x49a   : > { %v8956_v50 = vsel %vm3592_vm15, %v8864_v47, %v6475_v46  ;;  %v3586_v61 = vsel %vm685_vm0, %v3578_v45, %v6484_v21  ;;  %v3587_v11 = vsel %vm685_vm0, %v3579_v36, %v6485_v33  ;;  %5180 = vmatprep.mubr.msk.f32.mxu1 %vm2743_vm11, %v9649_v15  ;;  %v9651_v36 = vunpack.i.h.bf16 %v8695_v3  ;;  %v9652_v33 = vld [vmem:[#allocation22_spill] sm:$0xff] }
 0x49b   : > { %v3595_v22 = vsel %vm3592_vm15, %v3586_v61, %v6319_v27  ;;  %v3596_v24 = vsel %vm3592_vm15, %v3587_v11, %v6320_v52  ;;  %v8968_v17 = vpop.permute.xlu0 %6477  ;;  %v6488_v47 = vpop.permute.xlu1 %6487  ;;  %v3875_v45 = vsel %vm694_vm1, %v3867_v18, %v9650_v63  ;;  %v3580_v27 = vsel %vm2743_vm11, %v9652_v33, %v6414_v48 }
 0x49c   : > { %v3876_v46 = vsel %vm694_vm1, %v3868_v57, %v9651_v36  ;;  %v3581_v52 = vsel %vm2743_vm11, %v9653_v35, %v6415_v40  ;;  %v6400_v21 = vunpack.i.h.bf16 %v8796_v53  ;;  %v6489_v0 = vunpack.i.l.bf16 %v6488_v47  ;;  %v9660_v35 = vld [vmem:[#allocation9_spill] sm:$0xff] }
 0x49d   : > { %v6490_v29 = vunpack.i.h.bf16 %v6488_v47  ;;  %6762 = vrot.lane.b32.xlu0 %v8723_v32, %s6799_s28  ;;  %4353 = vrot.lane.b32.xlu1 %v9654_v30, %s6804_s21  ;;  %v9655_v3 = vunpack.i.l.bf16 %v8639_v31  ;;  %v3604_v48 = vsel %vm694_vm1, %v3596_v24, %v9656_v14  ;;  %v9657_v40 = vunpack.i.l.bf16 %v8624_v12  ;;  %v9661_v30 = vld [vmem:[#allocation6_spill] sm:$0xff]  ;;  %s5213_s28 = sshll.u32 %s9706_s17, 4 }
 0x49e   : > { %v3613_v32 = vsel %vm3609_vm3, %v3604_v48, %v6325_v60  ;;  %v6399_v24 = vunpack.i.l.bf16 %v8796_v53  ;;  %v6419_v15 = vunpack.i.l.bf16 %v8798_v13  ;;  %v6434_v53 = vunpack.i.l.bf16 %v8861_v38  ;;  %v9030_v48 = vld [vmem:[#allocation2 + $0x131] sm:$0xff]  ;;  %s514_s20 = scalar_lea.vmem %s9563_s15, %s5213_s28 }
 0x49f   : > { %v3603_v18 = vsel %vm694_vm1, %v3595_v22, %v9655_v3  ;;  %v3883_v57 = vsel %vm3609_vm3, %v3875_v45, %v9657_v40  ;;  %v9658_v22 = vunpack.i.h.bf16 %v8624_v12  ;;  %v6493_v47 = vpop.permute.xlu1 %6492  ;;  %v6503_v63 = vpop.permute.xlu0 %6502  ;;  %v9014_v12 = vld [vmem:[#allocation2 + $0x1c2] sm:$0xff] }
 0x4a0   : > { %v3612_v61 = vsel %vm3609_vm3, %v3603_v18, %v6324_v39  ;;  %v9001_v11 = vsel %vm703_vm2, %v3883_v57, %v6384_v34  ;;  %v6495_v60 = vunpack.i.h.bf16 %v6493_v47  ;;  %v6494_v39 = vunpack.i.l.bf16 %v6493_v47 }
 0x4a1   : > { %v3884_v31 = vsel %vm3609_vm3, %v3876_v46, %v9658_v22  ;;  %v3620_v45 = vsel %vm703_vm2, %v3612_v61, %v6489_v0  ;;  %v6505_v34 = vunpack.i.h.bf16 %v6503_v63  ;;  %v6504_v36 = vunpack.i.l.bf16 %v6503_v63  ;;  %4299 = vrot.lane.b32.xlu0 %v9014_v12, %s6802_s19  ;;  %4323 = vrot.lane.b32.xlu1 %v9659_v7, %s6798_s24 }
 0x4a2   : > { %v9012_v23 = vsel %vm703_vm2, %v3884_v31, %v6385_v56  ;;  %v6425_v46 = vunpack.i.h.bf16 %v8807_v58  ;;  %v3629_v33 = vsel %vm3626_vm4, %v3620_v45, %v6399_v24  ;;  %v3621_v56 = vsel %vm703_vm2, %v3613_v32, %v6490_v29 }
 0x4a3   : > { %v3854_v0 = vsel %vm2743_vm11, %v9660_v35, %v6495_v60  ;;  %v3853_v3 = vsel %vm2743_vm11, %v9661_v30, %v6494_v39  ;;  %v3588_v18 = vsel %vm685_vm0, %v3580_v27, %v6504_v36  ;;  %v3589_v14 = vsel %vm685_vm0, %v3581_v52, %v6505_v34  ;;  %4593 = vmatmul.mubr.f32.gmra.mrb[44].mxu1 %v3629_v33  ;;  %v9664_v52 = vld [vmem:[#allocation24_spill] sm:$0xff]  ;;  %v9046_v22 = vpop.permute.xlu1 %6497  ;;  %v6508_v31 = vpop.permute.xlu0 %6507 }
 0x4a4   : > { %v3862_v40 = vsel %vm685_vm0, %v3854_v0, %v6405_v51  ;;  %v3861_v29 = vsel %vm685_vm0, %v3853_v3, %v6404_v59  ;;  %v9662_v57 = vunpack.i.l.bf16 %v8719_v10  ;;  %v9663_v32 = vunpack.i.h.bf16 %v8719_v10  ;;  %5181 = vmatprep.mubr.msk.f32.mxu1 %vm2743_vm11, %v9664_v52  ;;  %v9674_v3 = vld [vmem:[#allocation23_spill] sm:$0xff]  ;;  %v9677_v52 = vld [vmem:[#allocation29_spill] sm:$0xff] }
 0x4a5   : > { %v6435_v51 = vunpack.i.h.bf16 %v8861_v38  ;;  %v6510_v24 = vunpack.i.h.bf16 %v6508_v31  ;;  %v6509_v43 = vunpack.i.l.bf16 %v6508_v31  ;;  %v3630_v59 = vsel %vm3626_vm4, %v3621_v56, %v6400_v21  ;;  %4355 = vrot.lane.b32.xlu0 %v9030_v48, %s6804_s21 }
 0x4a6   : > { %v3597_v61 = vsel %vm3592_vm15, %v3588_v18, %v9662_v57  ;;  %v3598_v27 = vsel %vm3592_vm15, %v3589_v14, %v9663_v32  ;;  %v9665_v47 = vunpack.i.l.bf16 %v8650_v4  ;;  %v9666_v63 = vunpack.i.h.bf16 %v8650_v4 }
 0x4a7   : > { %v9667_v60 = vunpack.i.l.bf16 %v8648_v20  ;;  %v9668_v38 = vunpack.i.h.bf16 %v8648_v20  ;;  %4598 = vmatmul.mubr.f32.gmra.mrb[46].mxu1 %v3630_v59  ;;  %v9669_v21 = vunpack.i.l.bf16 %v8731_v19  ;;  %v9670_v33 = vunpack.i.h.bf16 %v8731_v19  ;;  %v9673_v20 = vld [vmem:[#allocation26_spill] sm:$0xff]  ;;  %v9080_v18 = vpop.permute.xlu0 %6512  ;;  %v6523_v14 = vpop.permute.xlu1 %6522 }
 0x4a8   : > { %v3605_v10 = vsel %vm694_vm1, %v3597_v61, %v9665_v47  ;;  %v3606_v45 = vsel %vm694_vm1, %v3598_v27, %v9666_v63  ;;  %v9671_v4 = vunpack.i.l.bf16 %v8704_v54  ;;  %v9672_v35 = vunpack.i.h.bf16 %v8704_v54  ;;  %5182 = vmatprep.mubr.msk.f32.mxu1 %vm2743_vm11, %v9674_v3  ;;  %v9685_v3 = vld [vmem:[#allocation27_spill] sm:$0xff] }
 0x4a9   : > { %v3869_v39 = vsel %vm3592_vm15, %v3861_v29, %v9667_v60  ;;  %v3870_v34 = vsel %vm3592_vm15, %v3862_v40, %v9668_v38  ;;  %v3614_v36 = vsel %vm3609_vm3, %v3605_v10, %v9669_v21  ;;  %v3615_v7 = vsel %vm3609_vm3, %v3606_v45, %v9670_v33 }
 0x4aa   : > { %v3877_v56 = vsel %vm694_vm1, %v3869_v39, %v9671_v4  ;;  %v3878_v0 = vsel %vm694_vm1, %v3870_v34, %v9672_v35  ;;  %v3582_v30 = vsel %vm2743_vm11, %v9673_v20, %v6434_v53  ;;  %v3622_v19 = vsel %vm703_vm2, %v3614_v36, %v6509_v43  ;;  %v9681_v39 = vld [vmem:[#allocation28_spill] sm:$0xff] }
 0x4ab   : > { %v9675_v40 = vunpack.i.l.bf16 %v8660_v9  ;;  %v9676_v57 = vunpack.i.h.bf16 %v8660_v9  ;;  %v6474_v61 = vunpack.i.l.bf16 %v8936_v26  ;;  %v6515_v53 = vunpack.i.h.bf16 %v9080_v18  ;;  %v9678_v26 = vld [vmem:[#allocation11_spill] sm:$0xff]  ;;  %v9119_v38 = vpop.permute.xlu0 %6517  ;;  %v9121_v34 = vpop.permute.xlu1 %6537 }
 0x4ac   : > { %v6525_v32 = vunpack.i.h.bf16 %v6523_v14  ;;  %v6524_v27 = vunpack.i.l.bf16 %v6523_v14  ;;  %v3583_v31 = vsel %vm2743_vm11, %v9677_v52, %v6435_v51  ;;  %v3631_v59 = vsel %vm3626_vm4, %v3622_v19, %v6419_v15 }
 0x4ad   : > { %v3885_v29 = vsel %vm3609_vm3, %v3877_v56, %v9675_v40  ;;  %v3886_v54 = vsel %vm3609_vm3, %v3878_v0, %v9676_v57  ;;  %v3856_v47 = vsel %vm2743_vm11, %v9678_v26, %v6515_v53  ;;  %4603 = vmatmul.mubr.f32.gmra.mrb[48].mxu1 %v3631_v59  ;;  %v3623_v15 = vsel %vm703_vm2, %v3615_v7, %v6510_v24  ;;  %v9687_v59 = vld [vmem:[#allocation36_spill] sm:$0xff] }
 0x4ae   : > { %v9097_v43 = vsel %vm703_vm2, %v3885_v29, %v6409_v25  ;;  %v9102_v9 = vsel %vm703_vm2, %v3886_v54, %v6410_v5  ;;  %v3590_v10 = vsel %vm685_vm0, %v3582_v30, %v6524_v27  ;;  %v3591_v63 = vsel %vm685_vm0, %v3583_v31, %v6525_v32  ;;  %5183 = vmatprep.mubr.msk.f32.mxu1 %vm2743_vm11, %v9681_v39 }
 0x4af   : > { %v6420_v51 = vunpack.i.h.bf16 %v8798_v13  ;;  %v3864_v25 = vsel %vm685_vm0, %v3856_v47, %v6425_v46  ;;  %v9679_v45 = vunpack.i.l.bf16 %v8753_v28  ;;  %v9680_v5 = vunpack.i.h.bf16 %v8753_v28  ;;  %v6528_v14 = vpop.permute.xlu0 %6527  ;;  %v9145_v19 = vpop.permute.xlu1 %6547 }
 0x4b0   : > { %v6350_v24 = vunpack.i.h.bf16 %v8745_v6  ;;  %v6360_v13 = vunpack.i.h.bf16 %v8761_v8  ;;  %v6390_v46 = vunpack.i.h.bf16 %v8779_v55  ;;  %v4133_v21 = vsel %vm3592_vm15, %v8867_v44, %v6474_v61 }
 0x4b1   : > { %v3599_v41 = vsel %vm3592_vm15, %v3590_v10, %v9679_v45  ;;  %v3600_v60 = vsel %vm3592_vm15, %v3591_v63, %v9680_v5  ;;  %v6389_v28 = vunpack.i.l.bf16 %v8779_v55  ;;  %v6480_v36 = vunpack.i.h.bf16 %v8968_v17 }
 0x4b2   : > { %v3632_v33 = vsel %vm3626_vm4, %v3623_v15, %v6420_v51  ;;  %v9682_v7 = vunpack.i.h.bf16 %v8677_v16  ;;  %v6479_v56 = vunpack.i.l.bf16 %v8968_v17  ;;  %v9683_v35 = vunpack.i.l.bf16 %v8677_v16 }
 0x4b3   : > { %4608 = vmatmul.mubr.f32.gmra.mrb[50].mxu1 %v3632_v33  ;;  %v9684_v44 = vunpack.i.h.bf16 %v8662_v2  ;;  %v6359_v30 = vunpack.i.l.bf16 %v8761_v8  ;;  %v4141_v16 = vsel %vm694_vm1, %v4133_v21, %v6389_v28  ;;  %v4142_v40 = vsel %vm694_vm1, %v8956_v50, %v6390_v46  ;;  %v9165_v10 = vpop.permute.xlu0 %6532  ;;  %v9167_v63 = vpop.permute.xlu1 %6557  ;;  %v9689_v46 = vld [vmem:[#allocation10_spill] sm:$0xff]  ;;  %v9690_v21 = vld [vmem:[#allocation5_spill] sm:$0xff] }
 0x4b4   : > { %v3608_v4 = vsel %vm694_vm1, %v3600_v60, %v9682_v7  ;;  %v3607_v0 = vsel %vm694_vm1, %v3599_v41, %v9683_v35  ;;  %5184 = vmatprep.mubr.msk.f32.mxu1 %vm2743_vm11, %v9685_v3  ;;  %v6430_v29 = vunpack.i.h.bf16 %v8837_v62  ;;  %v6530_v57 = vunpack.i.h.bf16 %v6528_v14  ;;  %v9688_v41 = vld [vmem:[#allocation35_spill] sm:$0xff] }
 0x4b5   : > { %v3617_v20 = vsel %vm3609_vm3, %v3608_v4, %v6360_v13  ;;  %v3872_v55 = vsel %vm3592_vm15, %v3864_v25, %v9684_v44  ;;  %v6529_v54 = vunpack.i.l.bf16 %v6528_v14  ;;  %v6439_v61 = vunpack.i.l.bf16 %v8885_v49 }
 0x4b6   : > { %v3880_v17 = vsel %vm694_vm1, %v3872_v55, %v6350_v24  ;;  %v3616_v8 = vsel %vm3609_vm3, %v3607_v0, %v6359_v30  ;;  %v9686_v53 = vunpack.i.h.bf16 %v8670_v42  ;;  %v4149_v31 = vsel %vm3609_vm3, %v4141_v16, %v6479_v56  ;;  %v9691_v0 = vld [vmem:[#allocation8_spill] sm:$0xff]  ;;  %v9693_v16 = vld [vmem:[#allocation15_spill] sm:$0xff] }
 0x4b7   : > { %v3624_v27 = vsel %vm703_vm2, %v3616_v8, %v6529_v54  ;;  %v4150_v50 = vsel %vm3609_vm3, %v4142_v40, %v6480_v36  ;;  %v6335_v26 = vunpack.i.h.bf16 %v9687_v59  ;;  %v6334_v47 = vunpack.i.l.bf16 %v9687_v59  ;;  %v9181_v39 = vpop.permute.xlu0 %6542  ;;  %v9183_v24 = vpop.permute.xlu1 %6567  ;;  %v9697_v59 = vld [vmem:[#allocation17_spill] sm:$0xff] }
 0x4b8   : > { %v3888_v32 = vsel %vm3609_vm3, %v3880_v17, %v9686_v53  ;;  %v3633_v15 = vsel %vm3626_vm4, %v3624_v27, %v6439_v61  ;;  %v3625_v51 = vsel %vm703_vm2, %v3617_v20, %v6530_v57  ;;  %v6440_v25 = vunpack.i.h.bf16 %v8885_v49  ;;  %v9694_v53 = vld [vmem:[#allocation38_spill] sm:$0xff] }
 0x4b9   : > { %v9159_v52 = vsel %vm703_vm2, %v3888_v32, %v6430_v29  ;;  %4613 = vmatmul.mubr.f32.gmra.mrb[52].mxu1 %v3633_v15  ;;  %v6514_v45 = vunpack.i.l.bf16 %v9080_v18  ;;  %v9176_v5 = vsel %vm703_vm2, %v4149_v31, %v6334_v47  ;;  %v9179_v60 = vsel %vm703_vm2, %v4150_v50, %v6335_v26  ;;  %v9695_v31 = vld [vmem:[#allocation13_spill] sm:$0xff] }
 0x4ba   : > { %5185 = vmatprep.mubr.msk.f32.mxu1 %vm2743_vm11, %v9688_v41  ;;  %v3634_v13 = vsel %vm3626_vm4, %v3625_v51, %v6440_v25  ;;  %v6469_v49 = vunpack.i.l.bf16 %v8910_v1  ;;  %v6424_v28 = vunpack.i.l.bf16 %v8807_v58  ;;  %v6274_v56 = vunpack.i.l.bf16 %v8662_v2  ;;  %v9692_v2 = vld [vmem:[#allocation7_spill] sm:$0xff] }
 0x4bb   : > { %v3855_v18 = vsel %vm2743_vm11, %v9689_v46, %v6514_v45  ;;  %v9192_v36 = vpop.permute.xlu0 %6552  ;;  %v9194_v33 = vpop.permute.xlu1 %6577  ;;  %v6470_v35 = vunpack.i.h.bf16 %v8910_v1  ;;  %v6499_v30 = vunpack.i.l.bf16 %v9046_v22  ;;  %v6279_v3 = vunpack.i.l.bf16 %v8670_v42 }
 0x4bc   : > { %v3899_v7 = vsel %vm3626_vm4, %v9001_v11, %v6469_v49  ;;  %v3863_v4 = vsel %vm685_vm0, %v3855_v18, %v6424_v28  ;;  %v6349_v11 = vunpack.i.l.bf16 %v8745_v6  ;;  %v6500_v6 = vunpack.i.h.bf16 %v9046_v22  ;;  %v9699_v49 = vld [vmem:[#allocation33_spill] sm:$0xff] }
 0x4bd   : > { %4618 = vmatmul.mubr.f32.gmra.mrb[54].mxu1 %v3634_v13  ;;  %v3900_v44 = vsel %vm3626_vm4, %v9012_v23, %v6470_v35  ;;  %v3871_v55 = vsel %vm3592_vm15, %v3863_v4, %v6274_v56  ;;  %v3901_v23 = vsel %vm3626_vm4, %v9097_v43, %v6499_v30  ;;  %v6429_v29 = vunpack.i.l.bf16 %v8837_v62  ;;  %v9696_v62 = vld [vmem:[#allocation32_spill] sm:$0xff]  ;;  %v9700_v18 = vld [vmem:[#allocation37_spill] sm:$0xff] }
 0x4be   : > { %5186 = vmatprep.mubr.msk.f32.mxu1 %vm2743_vm11, %v9690_v21  ;;  %v3879_v1 = vsel %vm694_vm1, %v3871_v55, %v6349_v11  ;;  %v3902_v54 = vsel %vm3626_vm4, %v9102_v9, %v6500_v6  ;;  %v6445_v22 = vunpack.i.h.bf16 %v9694_v53  ;;  %v6444_v32 = vunpack.i.l.bf16 %v9694_v53  ;;  %v9698_v9 = vld [vmem:[#allocation12_spill] sm:$0xff] }
 0x4bf   : > { %v9203_v20 = vpop.permute.xlu0 %6562  ;;  %v9205_v58 = vpop.permute.xlu1 %6587  ;;  %v3887_v40 = vsel %vm3609_vm3, %v3879_v1, %v6279_v3  ;;  %v6519_v27 = vunpack.i.l.bf16 %v9119_v38  ;;  %v6290_v50 = vunpack.i.h.bf16 %v9696_v62  ;;  %v6289_v15 = vunpack.i.l.bf16 %v9696_v62  ;;  %v9701_v56 = vld [vmem:[#allocation16_spill] sm:$0xff] }
 0x4c0   : > { %v3895_v43 = vsel %vm703_vm2, %v3887_v40, %v6429_v29  ;;  %v6295_v46 = vunpack.i.h.bf16 %v9699_v49  ;;  %v6365_v21 = vunpack.i.h.bf16 %v9700_v18  ;;  %v6364_v28 = vunpack.i.l.bf16 %v9700_v18 }
 0x4c1   : > { %4623 = vmatmul.mubr.f32.gmra.mrb[56].mxu1 %v3899_v7  ;;  %v3903_v13 = vsel %vm3626_vm4, %v3895_v43, %v6519_v27  ;;  %v6294_v7 = vunpack.i.l.bf16 %v9699_v49  ;;  %v6520_v4 = vunpack.i.h.bf16 %v9119_v38  ;;  %v6534_v53 = vunpack.i.l.bf16 %v9165_v10 }
 0x4c2   : > { %5187 = vmatprep.mubr.msk.f32.mxu1 %vm2743_vm11, %v9691_v0 }
 0x4c3   : > { %v9216_v14 = vpop.permute.xlu0 %6572  ;;  %v9218_v17 = vpop.permute.xlu1 %6597  ;;  %v3904_v38 = vsel %vm3626_vm4, %v9159_v52, %v6520_v4 }
 0x4c5   : > { %4628 = vmatmul.mubr.f32.gmra.mrb[58].mxu1 %v3900_v44  ;;  %v9702_v44 = vld [vmem:[#allocation39_spill] sm:$0xff] }
 0x4c6   : > { %5188 = vmatprep.mubr.msk.f32.mxu1 %vm2743_vm11, %v9692_v2  ;;  %v6450_v55 = vunpack.i.h.bf16 %v9702_v44  ;;  %v6449_v2 = vunpack.i.l.bf16 %v9702_v44  ;;  %v6771_v44 = vld [vmem:[#allocation2 + $0xd1] sm:$0xff] }
 0x4c7   : > { %v9227_v57 = vpop.permute.xlu0 %6582  ;;  %v6618_v42 = vpop.permute.xlu1 %6617 }
 0x4c8   : > { %v6620_v61 = vunpack.i.h.bf16 %v6618_v42  ;;  %v6619_v8 = vunpack.i.l.bf16 %v6618_v42 }
 0x4c9   : > { %4633 = vmatmul.mubr.f32.gmra.mrb[60].mxu1 %v3901_v23 }
 0x4ca   : > { %5189 = vmatprep.mubr.msk.f32.mxu1 %vm2743_vm11, %v9693_v16  ;;  %v3858_v26 = vsel %vm2743_vm11, %v9697_v59, %v6620_v61  ;;  %v3857_v47 = vsel %vm2743_vm11, %v9698_v9, %v6619_v8  ;;  %v9704_v9 = vld [vmem:[#allocation30_spill] sm:$0xff] }
 0x4cb   : > { %v3866_v51 = vsel %vm685_vm0, %v3858_v26, %v6445_v22  ;;  %v3865_v25 = vsel %vm685_vm0, %v3857_v47, %v6444_v32  ;;  %v9245_v45 = vpop.permute.xlu0 %6592  ;;  %v9247_v41 = vpop.permute.xlu1 %6622  ;;  %v6768_v22 = vld [vmem:[#allocation2 + $0xd0] sm:$0xff]  ;;  %v6544_v26 = vunpack.i.l.bf16 %v9181_v39  ;;  %v6539_v47 = vunpack.i.l.bf16 %v9121_v34 }
 0x4cc   : > { %v3873_v35 = vsel %vm3592_vm15, %v3865_v25, %v6289_v15  ;;  %v3874_v0 = vsel %vm3592_vm15, %v3866_v51, %v6290_v50  ;;  %v6535_v50 = vunpack.i.h.bf16 %v9165_v10  ;;  %v6769_v15 = vld [vmem:[#allocation2 + $0xc1] sm:$0xff]  ;;  %v6260_v51 = vunpack.i.h.bf16 %v9704_v9 }
 0x4cd   : > { %4638 = vmatmul.mubr.f32.gmra.mrb[62].mxu1 %v3902_v54  ;;  %v3881_v11 = vsel %vm694_vm1, %v3873_v35, %v6364_v28  ;;  %v3882_v30 = vsel %vm694_vm1, %v3874_v0, %v6365_v21  ;;  %v9703_v54 = vld [vmem:[#allocation31_spill] sm:$0xff]  ;;  %v6564_v10 = vunpack.i.l.bf16 %v9203_v20  ;;  %v6540_v35 = vunpack.i.h.bf16 %v9121_v34 }
 0x4ce   : > { %5190 = vmatprep.mubr.msk.f32.mxu1 %vm2743_vm11, %v9695_v31  ;;  %v3889_v23 = vsel %vm3609_vm3, %v3881_v11, %v6294_v7  ;;  %v3890_v6 = vsel %vm3609_vm3, %v3882_v30, %v6295_v46  ;;  %v6264_v61 = vunpack.i.l.bf16 %v9703_v54  ;;  %v6770_v25 = vld [vmem:[#allocation2 + $0xe0] sm:$0xff]  ;;  %v6545_v7 = vunpack.i.h.bf16 %v9181_v39  ;;  %v6772_v39 = vld [vmem:[#allocation2 + $0xf0] sm:$0xff] }
 0x4cf   : > { %v9263_v1 = vpop.permute.xlu0 %6602  ;;  %v6633_v3 = vpop.permute.xlu1 %6632  ;;  %v3897_v40 = vsel %vm703_vm2, %v3889_v23, %v6449_v2  ;;  %v3898_v29 = vsel %vm703_vm2, %v3890_v6, %v6450_v55  ;;  %v6549_v0 = vunpack.i.l.bf16 %v9145_v19  ;;  %v6565_v55 = vunpack.i.h.bf16 %v9203_v20 }
 0x4d0   : > { %v6634_v16 = vunpack.i.l.bf16 %v6633_v3  ;;  %v6635_v8 = vunpack.i.h.bf16 %v6633_v3  ;;  %v4119_v32 = vsel %vm2743_vm11, %v6768_v22, %v6264_v61  ;;  %v4121_v30 = vsel %vm2743_vm11, %v6772_v39, %v6564_v10 }
 0x4d1   : > { %4643 = vmatmul.mubr.f32.gmra.mrb[64].mxu1 %v3903_v13  ;;  %v4127_v59 = vsel %vm685_vm0, %v4119_v32, %v6534_v53  ;;  %v6574_v2 = vunpack.i.l.bf16 %v9216_v14  ;;  %v6569_v20 = vunpack.i.l.bf16 %v9183_v24  ;;  %v6555_v6 = vunpack.i.h.bf16 %v9192_v36 }
 0x4d2   : > { %5191 = vmatprep.mubr.msk.f32.mxu1 %vm2743_vm11, %v9701_v56  ;;  %v3905_v42 = vsel %vm3626_vm4, %v3897_v40, %v6634_v16  ;;  %v3906_v62 = vsel %vm3626_vm4, %v3898_v29, %v6635_v8  ;;  %v4135_v49 = vsel %vm3592_vm15, %v4127_v59, %v6539_v47  ;;  %v6554_v56 = vunpack.i.l.bf16 %v9192_v36  ;;  %v6773_v29 = vld [vmem:[#allocation2 + $0xe1] sm:$0xff] }
 0x4d3   : > { %v9275_v43 = vpop.permute.xlu0 %6607  ;;  %v9277_v52 = vpop.permute.xlu1 %6637  ;;  %v4143_v4 = vsel %vm694_vm1, %v4135_v49, %v6544_v26  ;;  %v6550_v16 = vunpack.i.h.bf16 %v9145_v19  ;;  %v6559_v40 = vunpack.i.l.bf16 %v9167_v63  ;;  %v6575_v8 = vunpack.i.h.bf16 %v9216_v14 }
 0x4d4   : > { %v4129_v53 = vsel %vm685_vm0, %v4121_v30, %v6569_v20  ;;  %v6560_v59 = vunpack.i.h.bf16 %v9167_v63  ;;  %v6594_v49 = vunpack.i.l.bf16 %v9245_v45 }
 0x4d5   : > { %4648 = vmatmul.mubr.f32.gmra.mrb[66].mxu1 %v3904_v38  ;;  %v4151_v38 = vsel %vm3609_vm3, %v4143_v4, %v6549_v0  ;;  %v4137_v36 = vsel %vm3592_vm15, %v4129_v53, %v6574_v2  ;;  %v6776_v4 = vld [vmem:[#allocation2 + $0x110] sm:$0xff]  ;;  %v6777_v0 = vld [vmem:[#allocation2 + $0x101] sm:$0xff]  ;;  %v6609_v2 = vunpack.i.l.bf16 %v9275_v43 }
 0x4d6   : > { %5192 = vmatprep.mubr.msk.f32.mxu1 %vm2743_vm11, %v9646_v37  ;;  %v6265_v37 = vunpack.i.h.bf16 %v9703_v54  ;;  %v6774_v54 = vld [vmem:[#allocation2 + $0x100] sm:$0xff] }
 0x4d7   : > { %v9284_v27 = vpop.permute.xlu0 %6612  ;;  %v9286_v31 = vpop.permute.xlu1 %6647  ;;  %v4122_v61 = vsel %vm2743_vm11, %v6774_v54, %v6565_v55  ;;  %v6778_v55 = vld [vmem:[#allocation2 + $0x120] sm:$0xff]  ;;  %v6779_v54 = vld [vmem:[#allocation2 + $0x111] sm:$0xff] }
 0x4d8   : > { %v4120_v13 = vsel %vm2743_vm11, %v6770_v25, %v6265_v37  ;;  %v6584_v37 = vunpack.i.l.bf16 %v9227_v57  ;;  %v6614_v53 = vunpack.i.l.bf16 %v9284_v27 }
 0x4d9   : > { %4653 = vmatmul.mubr.f32.gmra.mrb[68].mxu1 %v3905_v42  ;;  %v4128_v28 = vsel %vm685_vm0, %v4120_v13, %v6535_v50  ;;  %v6570_v42 = vunpack.i.h.bf16 %v9183_v24  ;;  %v6579_v24 = vunpack.i.l.bf16 %v9194_v33  ;;  %v6599_v50 = vunpack.i.l.bf16 %v9218_v17 }
 0x4da   : > { %5193 = vmatprep.mubr.msk.f32.mxu1 %vm2743_vm11, %v9014_v12  ;;  %v6259_v12 = vunpack.i.l.bf16 %v9704_v9  ;;  %v4136_v11 = vsel %vm3592_vm15, %v4128_v28, %v6540_v35  ;;  %v6604_v9 = vunpack.i.l.bf16 %v9263_v1  ;;  %v6580_v13 = vunpack.i.h.bf16 %v9194_v33 }
 0x4db   : > { %v9299_v46 = vpop.permute.xlu0 %6627  ;;  %v9301_v18 = vpop.permute.xlu1 %6657  ;;  %v4144_v23 = vsel %vm694_vm1, %v4136_v11, %v6545_v7  ;;  %v4130_v26 = vsel %vm685_vm0, %v4122_v61, %v6570_v42  ;;  %v4145_v25 = vsel %vm694_vm1, %v4137_v36, %v6579_v24  ;;  %v6589_v7 = vunpack.i.l.bf16 %v9205_v58 }
 0x4dc   : > { %v4165_v21 = vsel %vm3626_vm4, %v9176_v5, %v6259_v12  ;;  %v4166_v5 = vsel %vm3626_vm4, %v9179_v60, %v6260_v51  ;;  %v4159_v60 = vsel %vm703_vm2, %v4151_v38, %v6554_v56  ;;  %v6775_v12 = vld [vmem:[#allocation2 + $0xf1] sm:$0xff]  ;;  %v4138_v47 = vsel %vm3592_vm15, %v4130_v26, %v6575_v8 }
 0x4dd   : > { %4658 = vmatmul.mubr.f32.gmra.mrb[70].mxu1 %v3906_v62  ;;  %v4167_v32 = vsel %vm3626_vm4, %v4159_v60, %v6559_v40  ;;  %v4152_v62 = vsel %vm3609_vm3, %v4144_v23, %v6550_v16  ;;  %v6585_v51 = vunpack.i.h.bf16 %v9227_v57  ;;  %v4153_v28 = vsel %vm3609_vm3, %v4145_v25, %v6584_v37  ;;  %v6780_v37 = vld [vmem:[#allocation2 + $0x11] sm:$0xff] }
 0x4de   : > { %5194 = vmatprep.mubr.msk.f32.mxu1 %vm2743_vm11, %v6769_v15  ;;  %v4160_v14 = vsel %vm703_vm2, %v4152_v62, %v6555_v6  ;;  %v6600_v15 = vunpack.i.h.bf16 %v9218_v17  ;;  %v4123_v17 = vsel %vm2743_vm11, %v6776_v4, %v6599_v50  ;;  %v6605_v57 = vunpack.i.h.bf16 %v9263_v1 }
 0x4df   : > { %v9318_v3 = vpop.permute.xlu0 %6642  ;;  %v9320_v34 = vpop.permute.xlu1 %6667  ;;  %v4131_v33 = vsel %vm685_vm0, %v4123_v17, %v6604_v9  ;;  %v4161_v39 = vsel %vm703_vm2, %v4153_v28, %v6589_v7  ;;  %v6595_v1 = vunpack.i.h.bf16 %v9245_v45  ;;  %v6629_v38 = vunpack.i.l.bf16 %v9299_v46  ;;  %v6781_v9 = vld [vmem:[#allocation2 + $0x21] sm:$0xff] }
 0x4e0   : > { %v4169_v6 = vsel %vm3626_vm4, %v4161_v39, %v6594_v49  ;;  %v6590_v60 = vunpack.i.h.bf16 %v9205_v58  ;;  %v6610_v8 = vunpack.i.h.bf16 %v9275_v43  ;;  %v6624_v26 = vunpack.i.l.bf16 %v9247_v41  ;;  %v6783_v39 = vld [vmem:[#allocation2 + $0x31] sm:$0xff] }
 0x4e1   : > { %4663 = vmatmul.mubr.f32.gmra.mrb[72].mxu1 %v4165_v21  ;;  %v4168_v21 = vsel %vm3626_vm4, %v4160_v14, %v6560_v59  ;;  %v6639_v14 = vunpack.i.l.bf16 %v9277_v52  ;;  %v6640_v25 = vunpack.i.h.bf16 %v9277_v52  ;;  %v6649_v17 = vunpack.i.l.bf16 %v9286_v31 }
 0x4e2   : > { %5195 = vmatprep.mubr.msk.f32.mxu1 %vm2743_vm11, %v6771_v44  ;;  %v4146_v44 = vsel %vm694_vm1, %v4138_v47, %v6580_v13  ;;  %v6645_v47 = vunpack.i.h.bf16 %v9318_v3  ;;  %v6615_v13 = vunpack.i.h.bf16 %v9284_v27 }
 0x4e3   : > { %v9336_v22 = vpop.permute.xlu0 %6652  ;;  %v9338_v19 = vpop.permute.xlu1 %6677  ;;  %v4154_v30 = vsel %vm3609_vm3, %v4146_v44, %v6585_v51  ;;  %v6650_v44 = vunpack.i.h.bf16 %v9286_v31  ;;  %v6659_v31 = vunpack.i.l.bf16 %v9301_v18 }
 0x4e4   : > { %v4162_v58 = vsel %vm703_vm2, %v4154_v30, %v6590_v60  ;;  %v6654_v28 = vunpack.i.l.bf16 %v9336_v22 }
 0x4e5   : > { %4668 = vmatmul.mubr.f32.gmra.mrb[74].mxu1 %v4166_v5  ;;  %v4124_v5 = vsel %vm2743_vm11, %v6778_v55, %v6600_v15  ;;  %v4170_v50 = vsel %vm3626_vm4, %v4162_v58, %v6595_v1  ;;  %v6782_v15 = vld [vmem:[#allocation2 + $0x121] sm:$0xff]  ;;  %v6660_v55 = vunpack.i.h.bf16 %v9301_v18 }
 0x4e6   : > { %5196 = vmatprep.mubr.msk.f32.mxu1 %vm2743_vm11, %v6773_v29  ;;  %v4132_v16 = vsel %vm685_vm0, %v4124_v5, %v6605_v57  ;;  %v6630_v29 = vunpack.i.h.bf16 %v9299_v46  ;;  %v6644_v46 = vunpack.i.l.bf16 %v9318_v3 }
 0x4e7   : > { %v9355_v63 = vpop.permute.xlu0 %6662  ;;  %v6688_v10 = vpop.permute.xlu1 %6687 }
 0x4e8   : > { %v6689_v56 = vunpack.i.l.bf16 %v6688_v10  ;;  %v6690_v35 = vunpack.i.h.bf16 %v6688_v10  ;;  %v6664_v30 = vunpack.i.l.bf16 %v9355_v63  ;;  %v6665_v18 = vunpack.i.h.bf16 %v9355_v63  ;;  %v4174_v63 = vld [vmem:[#allocation2 + $0x32] sm:$0xff] }
 0x4e9   : > { %4673 = vmatmul.mubr.f32.gmra.mrb[76].mxu1 %v4167_v32  ;;  %v4365_v32 = vsel %vm2743_vm11, %v6780_v37, %v6629_v38 }
 0x4ea   : > { %5197 = vmatprep.mubr.msk.f32.mxu1 %vm2743_vm11, %v6775_v12  ;;  %v4139_v11 = vsel %vm3592_vm15, %v4131_v33, %v6689_v56  ;;  %v4140_v42 = vsel %vm3592_vm15, %v4132_v16, %v6690_v35  ;;  %v4366_v12 = vsel %vm2743_vm11, %v6781_v9, %v6630_v29  ;;  %v4373_v49 = vsel %vm685_vm0, %v4365_v32, %v6639_v14 }
 0x4eb   : > { %v9372_v23 = vpop.permute.xlu0 %6672  ;;  %v6693_v20 = vpop.permute.xlu1 %6692  ;;  %v4147_v61 = vsel %vm694_vm1, %v4139_v11, %v6609_v2  ;;  %v4148_v59 = vsel %vm694_vm1, %v4140_v42, %v6610_v8  ;;  %v4381_v10 = vsel %vm3592_vm15, %v4373_v49, %v6644_v46  ;;  %v4374_v52 = vsel %vm685_vm0, %v4366_v12, %v6640_v25  ;;  %v6785_v12 = vld [vmem:[#allocation2 + $0x51] sm:$0xff]  ;;  %v4175_v49 = vld [vmem:[#allocation2 + $0x42] sm:$0xff] }
 0x4ec   : > { %v6694_v40 = vunpack.i.l.bf16 %v6693_v20  ;;  %v6695_v45 = vunpack.i.h.bf16 %v6693_v20  ;;  %v6674_v27 = vunpack.i.l.bf16 %v9372_v23  ;;  %v6625_v56 = vunpack.i.h.bf16 %v9247_v41 }
 0x4ed   : > { %4678 = vmatmul.mubr.f32.gmra.mrb[78].mxu1 %v4168_v21  ;;  %v6669_v21 = vunpack.i.l.bf16 %v9320_v34  ;;  %v4382_v33 = vsel %vm3592_vm15, %v4374_v52, %v6645_v47  ;;  %v6670_v35 = vunpack.i.h.bf16 %v9320_v34  ;;  %v6675_v5 = vunpack.i.h.bf16 %v9372_v23  ;;  %v4173_v23 = vld [vmem:[#allocation2 + $0x22] sm:$0xff] }
 0x4ee   : > { %5198 = vmatprep.mubr.msk.f32.mxu1 %vm2743_vm11, %v6777_v0  ;;  %v4155_v36 = vsel %vm3609_vm3, %v4147_v61, %v6694_v40  ;;  %v4156_v51 = vsel %vm3609_vm3, %v4148_v59, %v6695_v45  ;;  %v6655_v0 = vunpack.i.h.bf16 %v9336_v22  ;;  %v4389_v11 = vsel %vm694_vm1, %v4381_v10, %v6649_v17 }
 0x4ef   : > { %v9387_v62 = vpop.permute.xlu0 %6682  ;;  %v9389_v24 = vpop.permute.xlu1 %6697  ;;  %v4163_v43 = vsel %vm703_vm2, %v4155_v36, %v6614_v53  ;;  %v4164_v57 = vsel %vm703_vm2, %v4156_v51, %v6615_v13  ;;  %v4367_v41 = vsel %vm2743_vm11, %v6783_v39, %v6669_v21  ;;  %v4390_v20 = vsel %vm694_vm1, %v4382_v33, %v6650_v44 }
 0x4f0   : > { %v4171_v4 = vsel %vm3626_vm4, %v4163_v43, %v6624_v26  ;;  %v4172_v22 = vsel %vm3626_vm4, %v4164_v57, %v6625_v56  ;;  %v4375_v2 = vsel %vm685_vm0, %v4367_v41, %v6674_v27  ;;  %v6684_v38 = vunpack.i.l.bf16 %v9387_v62 }
 0x4f1   : > { %4683 = vmatmul.mubr.f32.gmra.mrb[80].mxu1 %v4169_v6  ;;  %v6784_v6 = vld [vmem:[#allocation2 + $0x41] sm:$0xff]  ;;  %v6680_v16 = vunpack.i.h.bf16 %v9338_v19  ;;  %v6679_v40 = vunpack.i.l.bf16 %v9338_v19  ;;  %v4398_v29 = vsel %vm3609_vm3, %v4390_v20, %v6655_v0  ;;  %v6685_v45 = vunpack.i.h.bf16 %v9387_v62 }
 0x4f2   : > { %5199 = vmatprep.mubr.msk.f32.mxu1 %vm2743_vm11, %v6779_v54  ;;  %v4368_v60 = vsel %vm2743_vm11, %v6784_v6, %v6670_v35  ;;  %v6699_v8 = vunpack.i.l.bf16 %v9389_v24  ;;  %v6700_v62 = vunpack.i.h.bf16 %v9389_v24 }
 0x4f3   : > { %v9406_v7 = vpop.permute.xlu0 %6702  ;;  %v9408_v3 = vpop.permute.xlu1 %6707  ;;  %v4376_v42 = vsel %vm685_vm0, %v4368_v60, %v6675_v5  ;;  %v4383_v61 = vsel %vm3592_vm15, %v4375_v2, %v6679_v40 }
 0x4f4   : > { %v4391_v37 = vsel %vm694_vm1, %v4383_v61, %v6684_v38  ;;  %v6704_v32 = vunpack.i.l.bf16 %v9406_v7  ;;  %v4384_v46 = vsel %vm3592_vm15, %v4376_v42, %v6680_v16  ;;  %v6709_v9 = vunpack.i.l.bf16 %v9408_v3  ;;  %v4177_v38 = vld [vmem:[#allocation2 + $0x62] sm:$0xff] }
 0x4f5   : > { %4688 = vmatmul.mubr.f32.gmra.mrb[82].mxu1 %v4170_v50  ;;  %v4406_v50 = vsel %vm703_vm2, %v4398_v29, %v6660_v55  ;;  %v4392_v14 = vsel %vm694_vm1, %v4384_v46, %v6685_v45  ;;  %v4399_v24 = vsel %vm3609_vm3, %v4391_v37, %v6699_v8  ;;  %v6705_v13 = vunpack.i.h.bf16 %v9406_v7  ;;  %v4176_v55 = vld [vmem:[#allocation2 + $0x52] sm:$0xff] }
 0x4f6   : > { %5200 = vmatprep.mubr.msk.f32.mxu1 %vm2743_vm11, %v6782_v15  ;;  %v4414_v26 = vsel %vm3626_vm4, %v4406_v50, %v6665_v18  ;;  %v4407_v10 = vsel %vm703_vm2, %v4399_v24, %v6704_v32  ;;  %v6710_v56 = vunpack.i.h.bf16 %v9408_v3  ;;  %v4178_v8 = vld [vmem:[#allocation2 + $0x72] sm:$0xff] }
 0x4f7   : > { %v6713_v1 = vpop.permute.xlu0 %6712  ;;  %v9427_v34 = vpop.permute.xlu1 %6717  ;;  %v4415_v44 = vsel %vm3626_vm4, %v4407_v10, %v6709_v9  ;;  %v4179_v9 = vld [vmem:[#allocation2 + $0x82] sm:$0xff] }
 0x4f8   : > { %v6714_v53 = vunpack.i.l.bf16 %v6713_v1  ;;  %v6715_v43 = vunpack.i.h.bf16 %v6713_v1  ;;  %v6719_v59 = vunpack.i.l.bf16 %v9427_v34  ;;  %v6720_v21 = vunpack.i.h.bf16 %v9427_v34 }
 0x4f9   : > { %4693 = vmatmul.mubr.f32.gmra.mrb[84].mxu1 %v4171_v4  ;;  %v6786_v4 = vld [vmem:[#allocation2 + $0x61] sm:$0xff] }
 0x4fa   : > { %5201 = vmatprep.mubr.msk.f32.mxu1 %vm2743_vm11, %v9030_v48  ;;  %v4397_v48 = vsel %vm3609_vm3, %v4389_v11, %v6654_v28  ;;  %v4369_v47 = vsel %vm2743_vm11, %v6785_v12, %v6714_v53  ;;  %v4400_v28 = vsel %vm3609_vm3, %v4392_v14, %v6700_v62  ;;  %v4370_v17 = vsel %vm2743_vm11, %v6786_v4, %v6715_v43  ;;  %v6787_v53 = vld [vmem:[#allocation2 + $0x81] sm:$0xff] }
 0x4fb   : > { %v4405_v54 = vsel %vm703_vm2, %v4397_v48, %v6659_v31  ;;  %v6723_v58 = vpop.permute.xlu0 %6722  ;;  %v6728_v36 = vpop.permute.xlu1 %6727  ;;  %v4377_v52 = vsel %vm685_vm0, %v4369_v47, %v6719_v59  ;;  %v4408_v5 = vsel %vm703_vm2, %v4400_v28, %v6705_v13  ;;  %v4378_v11 = vsel %vm685_vm0, %v4370_v17, %v6720_v21  ;;  %v4180_v21 = vld [vmem:[#allocation2 + $0x92] sm:$0xff] }
 0x4fc   : > { %v4413_v19 = vsel %vm3626_vm4, %v4405_v54, %v6664_v30  ;;  %v6724_v15 = vunpack.i.l.bf16 %v6723_v58  ;;  %v6725_v27 = vunpack.i.h.bf16 %v6723_v58  ;;  %v6729_v57 = vunpack.i.l.bf16 %v6728_v36 }
 0x4fd   : > { %4698 = vmatmul.mubr.f32.gmra.mrb[86].mxu1 %v4172_v22  ;;  %v6730_v39 = vunpack.i.h.bf16 %v6728_v36  ;;  %v4416_v31 = vsel %vm3626_vm4, %v4408_v5, %v6710_v56  ;;  %v6788_v36 = vld [vmem:[#allocation2 + $0x71] sm:$0xff] }
 0x4fe   : > { %5202 = vmatprep.mubr.msk.f32.mxu1 %vm2743_vm11, %v4173_v23  ;;  %v4385_v7 = vsel %vm3592_vm15, %v4377_v52, %v6724_v15  ;;  %v4386_v41 = vsel %vm3592_vm15, %v4378_v11, %v6725_v27  ;;  %v9507_v27 = vld [vmem:[%s9562_s14] ss:$0 sm:$0xff] }
 0x4ff   : > { %v6733_v51 = vpop.permute.xlu0 %6732  ;;  %v9458_v25 = vpop.permute.xlu1 %6737  ;;  %v4393_v3 = vsel %vm694_vm1, %v4385_v7, %v6729_v57  ;;  %v4394_v23 = vsel %vm694_vm1, %v4386_v41, %v6730_v39 }
 0x500   : > { %v6734_v33 = vunpack.i.l.bf16 %v6733_v51  ;;  %v6739_v30 = vunpack.i.l.bf16 %v9458_v25  ;;  %v6735_v1 = vunpack.i.h.bf16 %v6733_v51  ;;  %v6740_v60 = vunpack.i.h.bf16 %v9458_v25 }
 0x501   : > { %4703 = vmatmul.mubr.f32.gmra.mrb[88].mxu1 %v4413_v19 }
 0x502   : > { %5203 = vmatprep.mubr.msk.f32.mxu1 %vm2743_vm11, %v4174_v63  ;;  %v4401_v2 = vsel %vm3609_vm3, %v4393_v3, %v6734_v33  ;;  %v4402_v61 = vsel %vm3609_vm3, %v4394_v23, %v6735_v1 }
 0x503   : > { %v6743_v35 = vpop.permute.xlu0 %6742  ;;  %v6748_v0 = vpop.permute.xlu1 %6747  ;;  %v4409_v29 = vsel %vm703_vm2, %v4401_v2, %v6739_v30  ;;  %v4410_v62 = vsel %vm703_vm2, %v4402_v61, %v6740_v60 }
 0x504   : > { %v6744_v34 = vunpack.i.l.bf16 %v6743_v35  ;;  %v6750_v20 = vunpack.i.h.bf16 %v6748_v0  ;;  %v6749_v6 = vunpack.i.l.bf16 %v6748_v0  ;;  %v6745_v18 = vunpack.i.h.bf16 %v6743_v35 }
 0x505   : > { %4708 = vmatmul.mubr.f32.gmra.mrb[90].mxu1 %v4414_v26 }
 0x506   : > { %5204 = vmatprep.mubr.msk.f32.mxu1 %vm2743_vm11, %v4175_v49  ;;  %v4417_v54 = vsel %vm3626_vm4, %v4409_v29, %v6744_v34  ;;  %v4372_v58 = vsel %vm2743_vm11, %v6787_v53, %v6750_v20  ;;  %v4371_v19 = vsel %vm2743_vm11, %v6788_v36, %v6749_v6  ;;  %v4418_v43 = vsel %vm3626_vm4, %v4410_v62, %v6745_v18 }
 0x507   : > { %v6753_v22 = vpop.permute.xlu0 %6752  ;;  %v6758_v48 = vpop.permute.xlu1 %6757 }
 0x508   : > { %v6755_v16 = vunpack.i.h.bf16 %v6753_v22  ;;  %v6754_v40 = vunpack.i.l.bf16 %v6753_v22  ;;  %v6760_v37 = vunpack.i.h.bf16 %v6758_v48  ;;  %v6759_v32 = vunpack.i.l.bf16 %v6758_v48 }
 0x509   : > { %4713 = vmatmul.mubr.f32.gmra.mrb[92].mxu1 %v4415_v44 }
 0x50a   : > { %5205 = vmatprep.mubr.msk.f32.mxu1 %vm2743_vm11, %v4176_v55  ;;  %v4379_v63 = vsel %vm685_vm0, %v4371_v19, %v6754_v40  ;;  %v4380_v46 = vsel %vm685_vm0, %v4372_v58, %v6755_v16 }
 0x50b   : > { %v4322_v42 = vpop.permute.xlu0 %4321  ;;  %v4298_v45 = vpop.permute.xlu1 %4297  ;;  %v4387_v12 = vsel %vm3592_vm15, %v4379_v63, %v6759_v32  ;;  %v4388_v47 = vsel %vm3592_vm15, %v4380_v46, %v6760_v37 }
 0x50d   : > { %4718 = vmatmul.mubr.f32.gmra.mrb[94].mxu1 %v4416_v31 }
 0x50e   : > { %5206 = vmatprep.mubr.msk.f32.mxu1 %vm2743_vm11, %v4177_v38 }
 0x50f   : > { %v6763_v50 = vpop.permute.xlu0 %6762  ;;  %v4354_v14 = vpop.permute.xlu1 %4353 }
 0x510   : > { %v6765_v59 = vunpack.i.h.bf16 %v6763_v50  ;;  %v6764_v26 = vunpack.i.l.bf16 %v6763_v50 }
 0x511   : > { %4723 = vmatmul.mubr.f32.gmra.mrb[96].mxu1 %v4417_v54 }
 0x512   : > { %5207 = vmatprep.mubr.msk.f32.mxu1 %vm2743_vm11, %v4178_v8  ;;  %v4395_v15 = vsel %vm694_vm1, %v4387_v12, %v6764_v26  ;;  %v4396_v51 = vsel %vm694_vm1, %v4388_v47, %v6765_v59 }
 0x513   : > { %v4300_v25 = vpop.permute.xlu0 %4299  ;;  %v4403_v24 = vsel %vm3609_vm3, %v4395_v15, %v4298_v45  ;;  %v4324_v49 = vpop.permute.xlu1 %4323 }
 0x514   : > { %v4404_v13 = vsel %vm3609_vm3, %v4396_v51, %v4300_v25  ;;  %v4411_v10 = vsel %vm703_vm2, %v4403_v24, %v4322_v42 }
 0x515   : > { %4728 = vmatmul.mubr.f32.gmra.mrb[98].mxu1 %v4418_v43  ;;  %v4419_v28 = vsel %vm3626_vm4, %v4411_v10, %v4354_v14  ;;  %v4412_v4 = vsel %vm703_vm2, %v4404_v13, %v4324_v49 }
 0x516   : > { %5208 = vmatprep.mubr.msk.f32.mxu1 %vm2743_vm11, %v4179_v9 }
 0x517   : > { %v4356_v17 = vpop.permute.xlu0 %4355 }
 0x518   : > { %v4420_v52 = vsel %vm3626_vm4, %v4412_v4, %v4356_v17 }
 0x519   : > { %4733 = vmatmul.mubr.f32.gmra.mrb[100].mxu1 %v4419_v28 }
 0x51a   : > { %5209 = vmatprep.mubr.msk.f32.mxu1 %vm2743_vm11, %v4180_v21 }
 0x51d   : > { %4738 = vmatmul.mubr.f32.gmra.mrb[102].mxu1 %v4420_v52 }
 0x567   : > { %v4584_v57 = vpop.f32.mrb[40].mxu1 }
 0x568   : > { %v4585_v56 = vadd.f32 %v9507_v27, %v4584_v57  ;;  %v4586_v7 = vpop.f32.mrb[41].mxu1 }
 0x56a   : > { %v4775_v33 = vmul.f32 0.2, %v4585_v56  ;;  %vm4743_vm0 = vcmp.ge.f32.partialorder %v4585_v56, 0.0 }
 0x56b   : > { %v4589_v35 = vpop.f32.mrb[42].mxu1 }
 0x56c   : > { %v4590_v0 = vadd.f32 %v9507_v27, %v4589_v35  ;;  %v4591_v44 = vpop.f32.mrb[43].mxu1  ;;  %v4807_v55 = vsel %vm4743_vm0, %v4585_v56, %v4775_v33 }
 0x56d   : > { %4839 = vxpose.xlu1.b32.start [1/16] (narrow) %v4807_v55, 8 }
 0x56e   : > { %v4776_v5 = vmul.f32 0.2, %v4590_v0  ;;  %vm4744_vm1 = vcmp.ge.f32.partialorder %v4590_v0, 0.0 }
 0x570   : > { %v4808_v11 = vsel %vm4744_vm1, %v4590_v0, %v4776_v5 }
 0x571   : > { %4840 = vxpose.xlu1.b32.cont [2/16] (narrow) %v4808_v11, 8 }
 0x576   : > { %v4594_v39 = vpop.f32.mrb[44].mxu1 }
 0x577   : > { %v4595_v41 = vadd.f32 %v9507_v27, %v4594_v39  ;;  %v4596_v3 = vpop.f32.mrb[45].mxu1 }
 0x579   : > { %v4777_v30 = vmul.f32 0.2, %v4595_v41  ;;  %vm4745_vm2 = vcmp.ge.f32.partialorder %v4595_v41, 0.0 }
 0x57a   : > { %v4599_v1 = vpop.f32.mrb[46].mxu1 }
 0x57b   : > { %v4600_v34 = vadd.f32 %v9507_v27, %v4599_v1  ;;  %v4601_v22 = vpop.f32.mrb[47].mxu1  ;;  %v4809_v48 = vsel %vm4745_vm2, %v4595_v41, %v4777_v30 }
 0x57c   : > { %4841 = vxpose.xlu1.b32.cont [3/16] (narrow) %v4809_v48, 8 }
 0x57d   : > { %v4778_v31 = vmul.f32 0.2, %v4600_v34  ;;  %vm4746_vm11 = vcmp.ge.f32.partialorder %v4600_v34, 0.0 }
 0x57f   : > { %v4810_v20 = vsel %vm4746_vm11, %v4600_v34, %v4778_v31 }
 0x580   : > { %v4604_v2 = vpop.f32.mrb[48].mxu1  ;;  %4842 = vxpose.xlu1.b32.cont [4/16] (narrow) %v4810_v20, 8 }
 0x581   : > { %v4605_v38 = vadd.f32 %v9507_v27, %v4604_v2  ;;  %v4606_v23 = vpop.f32.mrb[49].mxu1 }
 0x583   : > { %v4779_v6 = vmul.f32 0.2, %v4605_v38  ;;  %vm4747_vm5 = vcmp.ge.f32.partialorder %v4605_v38, 0.0 }
 0x585   : > { %v4811_v29 = vsel %vm4747_vm5, %v4605_v38, %v4779_v6 }
 0x586   : > { %v4609_v60 = vpop.f32.mrb[50].mxu1  ;;  %4843 = vxpose.xlu1.b32.cont [5/16] (narrow) %v4811_v29, 8 }
 0x587   : > { %v4610_v16 = vadd.f32 %v9507_v27, %v4609_v60  ;;  %v4611_v40 = vpop.f32.mrb[51].mxu1 }
 0x589   : > { %v4780_v18 = vmul.f32 0.2, %v4610_v16  ;;  %vm4748_vm6 = vcmp.ge.f32.partialorder %v4610_v16, 0.0 }
 0x58b   : > { %v4812_v42 = vsel %vm4748_vm6, %v4610_v16, %v4780_v18 }
 0x58c   : > { %4844 = vxpose.xlu1.b32.cont [6/16] (narrow) %v4812_v42, 8  ;;  %v4614_v45 = vpop.f32.mrb[52].mxu1 }
 0x58d   : > { %v4615_v54 = vadd.f32 %v9507_v27, %v4614_v45  ;;  %v4616_v61 = vpop.f32.mrb[53].mxu1 }
 0x58f   : > { %v4781_v8 = vmul.f32 0.2, %v4615_v54  ;;  %vm4749_vm7 = vcmp.ge.f32.partialorder %v4615_v54, 0.0 }
 0x590   : > { %v4619_v53 = vpop.f32.mrb[54].mxu1 }
 0x591   : > { %v4620_v58 = vadd.f32 %v9507_v27, %v4619_v53  ;;  %v4621_v36 = vpop.f32.mrb[55].mxu1  ;;  %v4813_v19 = vsel %vm4749_vm7, %v4615_v54, %v4781_v8 }
 0x592   : > { %4845 = vxpose.xlu1.b32.cont [7/16] (narrow) %v4813_v19, 8 }
 0x593   : > { %v4782_v37 = vmul.f32 0.2, %v4620_v58  ;;  %vm4750_vm8 = vcmp.ge.f32.partialorder %v4620_v58, 0.0 }
 0x594   : > { %v4624_v32 = vpop.f32.mrb[56].mxu1 }
 0x595   : > { %v4625_v63 = vadd.f32 %v9507_v27, %v4624_v32  ;;  %v4626_v46 = vpop.f32.mrb[57].mxu1  ;;  %v4814_v62 = vsel %vm4750_vm8, %v4620_v58, %v4782_v37 }
 0x596   : > { %4846 = vxpose.xlu1.b32.cont [8/16] (narrow) %v4814_v62, 8 }
 0x597   : > { %v4783_v50 = vmul.f32 0.2, %v4625_v63  ;;  %vm4751_vm9 = vcmp.ge.f32.partialorder %v4625_v63, 0.0 }
 0x598   : > { %v4629_v14 = vpop.f32.mrb[58].mxu1 }
 0x599   : > { %v4630_v43 = vadd.f32 %v9507_v27, %v4629_v14  ;;  %v4631_v59 = vpop.f32.mrb[59].mxu1  ;;  %v4815_v26 = vsel %vm4751_vm9, %v4625_v63, %v4783_v50 }
 0x59a   : > { %4847 = vxpose.xlu1.b32.cont [9/16] (narrow) %v4815_v26, 8 }
 0x59b   : > { %v4784_v9 = vmul.f32 0.2, %v4630_v43  ;;  %vm4752_vm10 = vcmp.ge.f32.partialorder %v4630_v43, 0.0 }
 0x59c   : > { %v4634_v12 = vpop.f32.mrb[60].mxu1 }
 0x59d   : > { %v4635_v47 = vadd.f32 %v9507_v27, %v4634_v12  ;;  %v4636_v15 = vpop.f32.mrb[61].mxu1  ;;  %v4816_v51 = vsel %vm4752_vm10, %v4630_v43, %v4784_v9 }
 0x59e   : > { %4848 = vxpose.xlu1.b32.cont [10/16] (narrow) %v4816_v51, 8 }
 0x59f   : > { %v4785_v25 = vmul.f32 0.2, %v4635_v47  ;;  %vm4753_vm12 = vcmp.ge.f32.partialorder %v4635_v47, 0.0 }
 0x5a0   : > { %v4639_v24 = vpop.f32.mrb[62].mxu1 }
 0x5a1   : > { %v4640_v13 = vadd.f32 %v9507_v27, %v4639_v24  ;;  %v4641_v49 = vpop.f32.mrb[63].mxu1  ;;  %v4817_v10 = vsel %vm4753_vm12, %v4635_v47, %v4785_v25 }
 0x5a2   : > { %4849 = vxpose.xlu1.b32.cont [11/16] (narrow) %v4817_v10, 8 }
 0x5a3   : > { %v4786_v21 = vmul.f32 0.2, %v4640_v13  ;;  %vm4754_vm13 = vcmp.ge.f32.partialorder %v4640_v13, 0.0 }
 0x5a4   : > { %v4644_v28 = vpop.f32.mrb[64].mxu1 }
 0x5a5   : > { %v4645_v4 = vadd.f32 %v9507_v27, %v4644_v28  ;;  %v4646_v17 = vpop.f32.mrb[65].mxu1  ;;  %v4818_v52 = vsel %vm4754_vm13, %v4640_v13, %v4786_v21 }
 0x5a6   : > { %4850 = vxpose.xlu1.b32.cont [12/16] (narrow) %v4818_v52, 8 }
 0x5a7   : > { %v4787_v57 = vmul.f32 0.2, %v4645_v4  ;;  %vm4755_vm14 = vcmp.ge.f32.partialorder %v4645_v4, 0.0 }
 0x5a8   : > { %v4649_v56 = vpop.f32.mrb[66].mxu1 }
 0x5a9   : > { %v4650_v7 = vadd.f32 %v9507_v27, %v4649_v56  ;;  %v4651_v33 = vpop.f32.mrb[67].mxu1  ;;  %v4819_v35 = vsel %vm4755_vm14, %v4645_v4, %v4787_v57 }
 0x5aa   : > { %4851 = vxpose.xlu1.b32.cont [13/16] (narrow) %v4819_v35, 8 }
 0x5ab   : > { %v4788_v0 = vmul.f32 0.2, %v4650_v7  ;;  %vm4756_vm15 = vcmp.ge.f32.partialorder %v4650_v7, 0.0 }
 0x5ac   : > { %v4654_v44 = vpop.f32.mrb[68].mxu1 }
 0x5ad   : > { %v4655_v55 = vadd.f32 %v9507_v27, %v4654_v44  ;;  %v4656_v5 = vpop.f32.mrb[69].mxu1  ;;  %v4820_v11 = vsel %vm4756_vm15, %v4650_v7, %v4788_v0 }
 0x5ae   : > { %4852 = vxpose.xlu1.b32.cont [14/16] (narrow) %v4820_v11, 8 }
 0x5af   : > { %v4789_v39 = vmul.f32 0.2, %v4655_v55  ;;  %vm4757_vm3 = vcmp.ge.f32.partialorder %v4655_v55, 0.0 }
 0x5b0   : > { %v4659_v41 = vpop.f32.mrb[70].mxu1 }
 0x5b1   : > { %v4660_v3 = vadd.f32 %v9507_v27, %v4659_v41  ;;  %v4661_v30 = vpop.f32.mrb[71].mxu1  ;;  %v4821_v1 = vsel %vm4757_vm3, %v4655_v55, %v4789_v39 }
 0x5b2   : > { %4853 = vxpose.xlu1.b32.cont [15/16] (narrow) %v4821_v1, 8 }
 0x5b3   : > { %v4790_v34 = vmul.f32 0.2, %v4660_v3  ;;  %vm4758_vm4 = vcmp.ge.f32.partialorder %v4660_v3, 0.0 }
 0x5b4   : > { %v4664_v22 = vpop.f32.mrb[72].mxu1 }
 0x5b5   : > { %v4665_v48 = vadd.f32 %v9507_v27, %v4664_v22  ;;  %v4666_v31 = vpop.f32.mrb[73].mxu1  ;;  %v4822_v2 = vsel %vm4758_vm4, %v4660_v3, %v4790_v34 }
 0x5b6   : > { %4854 = vxpose.xlu1.b32.end [16/16] (narrow) %v4822_v2, 8 }
 0x5b7   : > { %v4791_v38 = vmul.f32 0.2, %v4665_v48  ;;  %vm4759_vm0 = vcmp.ge.f32.partialorder %v4665_v48, 0.0 }
 0x5b8   : > { %v4669_v23 = vpop.f32.mrb[74].mxu1 }
 0x5b9   : > { %v4670_v20 = vadd.f32 %v9507_v27, %v4669_v23  ;;  %v4671_v6 = vpop.f32.mrb[75].mxu1  ;;  %v4823_v60 = vsel %vm4759_vm0, %v4665_v48, %v4791_v38 }
 0x5ba   : > { %4871 = vxpose.xlu0.b32.start [1/16] (narrow) %v4823_v60, 8 }
 0x5bb   : > { %v4792_v16 = vmul.f32 0.2, %v4670_v20  ;;  %vm4760_vm1 = vcmp.ge.f32.partialorder %v4670_v20, 0.0 }
 0x5bc   : > { %v4674_v40 = vpop.f32.mrb[76].mxu1 }
 0x5bd   : > { %v4675_v29 = vadd.f32 %v9507_v27, %v4674_v40  ;;  %v4676_v18 = vpop.f32.mrb[77].mxu1  ;;  %v4824_v42 = vsel %vm4760_vm1, %v4670_v20, %v4792_v16 }
 0x5be   : > { %4872 = vxpose.xlu0.b32.cont [2/16] (narrow) %v4824_v42, 8 }
 0x5bf   : > { %v4793_v45 = vmul.f32 0.2, %v4675_v29  ;;  %vm4761_vm2 = vcmp.ge.f32.partialorder %v4675_v29, 0.0 }
 0x5c0   : > { %v4679_v54 = vpop.f32.mrb[78].mxu1 }
 0x5c1   : > { %v4680_v61 = vadd.f32 %v9507_v27, %v4679_v54  ;;  %v4681_v8 = vpop.f32.mrb[79].mxu1  ;;  %v4825_v53 = vsel %vm4761_vm2, %v4675_v29, %v4793_v45 }
 0x5c2   : > { %4873 = vxpose.xlu0.b32.cont [3/16] (narrow) %v4825_v53, 8 }
 0x5c3   : > { %v4794_v58 = vmul.f32 0.2, %v4680_v61  ;;  %vm4762_vm11 = vcmp.ge.f32.partialorder %v4680_v61, 0.0 }
 0x5c4   : > { %v4684_v36 = vpop.f32.mrb[80].mxu1 }
 0x5c5   : > { %v4685_v19 = vadd.f32 %v9507_v27, %v4684_v36  ;;  %v4686_v37 = vpop.f32.mrb[81].mxu1  ;;  %v4826_v32 = vsel %vm4762_vm11, %v4680_v61, %v4794_v58 }
 0x5c6   : > { %4874 = vxpose.xlu0.b32.cont [4/16] (narrow) %v4826_v32, 8 }
 0x5c7   : > { %v4795_v63 = vmul.f32 0.2, %v4685_v19  ;;  %vm4763_vm5 = vcmp.ge.f32.partialorder %v4685_v19, 0.0 }
 0x5c8   : > { %v4689_v46 = vpop.f32.mrb[82].mxu1 }
 0x5c9   : > { %v4690_v62 = vadd.f32 %v9507_v27, %v4689_v46  ;;  %v4691_v50 = vpop.f32.mrb[83].mxu1  ;;  %v4827_v14 = vsel %vm4763_vm5, %v4685_v19, %v4795_v63 }
 0x5ca   : > { %4875 = vxpose.xlu0.b32.cont [5/16] (narrow) %v4827_v14, 8 }
 0x5cb   : > { %v4796_v43 = vmul.f32 0.2, %v4690_v62  ;;  %vm4764_vm6 = vcmp.ge.f32.partialorder %v4690_v62, 0.0 }
 0x5cc   : > { %v4694_v59 = vpop.f32.mrb[84].mxu1 }
 0x5cd   : > { %v4695_v26 = vadd.f32 %v9507_v27, %v4694_v59  ;;  %v4696_v9 = vpop.f32.mrb[85].mxu1  ;;  %v4828_v12 = vsel %vm4764_vm6, %v4690_v62, %v4796_v43 }
 0x5ce   : > { %4876 = vxpose.xlu0.b32.cont [6/16] (narrow) %v4828_v12, 8 }
 0x5cf   : > { %v4797_v47 = vmul.f32 0.2, %v4695_v26  ;;  %vm4765_vm7 = vcmp.ge.f32.partialorder %v4695_v26, 0.0 }
 0x5d0   : > { %v4699_v15 = vpop.f32.mrb[86].mxu1 }
 0x5d1   : > { %v4700_v51 = vadd.f32 %v9507_v27, %v4699_v15  ;;  %v4701_v25 = vpop.f32.mrb[87].mxu1  ;;  %v4829_v24 = vsel %vm4765_vm7, %v4695_v26, %v4797_v47 }
 0x5d2   : > { %4877 = vxpose.xlu0.b32.cont [7/16] (narrow) %v4829_v24, 8 }
 0x5d3   : > { %v4798_v13 = vmul.f32 0.2, %v4700_v51  ;;  %vm4766_vm8 = vcmp.ge.f32.partialorder %v4700_v51, 0.0 }
 0x5d4   : > { %v4704_v49 = vpop.f32.mrb[88].mxu1 }
 0x5d5   : > { %v4705_v10 = vadd.f32 %v9507_v27, %v4704_v49  ;;  %v4706_v21 = vpop.f32.mrb[89].mxu1  ;;  %v4830_v28 = vsel %vm4766_vm8, %v4700_v51, %v4798_v13 }
 0x5d6   : > { %4878 = vxpose.xlu0.b32.cont [8/16] (narrow) %v4830_v28, 8 }
 0x5d7   : > { %v4799_v4 = vmul.f32 0.2, %v4705_v10  ;;  %vm4767_vm9 = vcmp.ge.f32.partialorder %v4705_v10, 0.0 }
 0x5d8   : > { %v4709_v17 = vpop.f32.mrb[90].mxu1 }
 0x5d9   : > { %v4710_v52 = vadd.f32 %v9507_v27, %v4709_v17  ;;  %v4711_v57 = vpop.f32.mrb[91].mxu1  ;;  %v4831_v56 = vsel %vm4767_vm9, %v4705_v10, %v4799_v4 }
 0x5da   : > { %4879 = vxpose.xlu0.b32.cont [9/16] (narrow) %v4831_v56, 8 }
 0x5db   : > { %v4800_v7 = vmul.f32 0.2, %v4710_v52  ;;  %vm4768_vm10 = vcmp.ge.f32.partialorder %v4710_v52, 0.0 }
 0x5dc   : > { %v4714_v33 = vpop.f32.mrb[92].mxu1 }
 0x5dd   : > { %v4715_v35 = vadd.f32 %v9507_v27, %v4714_v33  ;;  %v4716_v0 = vpop.f32.mrb[93].mxu1  ;;  %v4832_v44 = vsel %vm4768_vm10, %v4710_v52, %v4800_v7 }
 0x5de   : > { %4880 = vxpose.xlu0.b32.cont [10/16] (narrow) %v4832_v44, 8 }
 0x5df   : > { %v4801_v55 = vmul.f32 0.2, %v4715_v35  ;;  %vm4769_vm12 = vcmp.ge.f32.partialorder %v4715_v35, 0.0 }
 0x5e0   : > { %v4719_v5 = vpop.f32.mrb[94].mxu1 }
 0x5e1   : > { %v4720_v11 = vadd.f32 %v9507_v27, %v4719_v5  ;;  %v4721_v39 = vpop.f32.mrb[95].mxu1  ;;  %v4833_v41 = vsel %vm4769_vm12, %v4715_v35, %v4801_v55 }
 0x5e2   : > { %4881 = vxpose.xlu0.b32.cont [11/16] (narrow) %v4833_v41, 8 }
 0x5e3   : > { %v4802_v3 = vmul.f32 0.2, %v4720_v11  ;;  %vm4770_vm13 = vcmp.ge.f32.partialorder %v4720_v11, 0.0 }
 0x5e4   : > { %v4724_v30 = vpop.f32.mrb[96].mxu1 }
 0x5e5   : > { %v4725_v1 = vadd.f32 %v9507_v27, %v4724_v30  ;;  %v4726_v34 = vpop.f32.mrb[97].mxu1  ;;  %v4834_v22 = vsel %vm4770_vm13, %v4720_v11, %v4802_v3 }
 0x5e6   : > { %4882 = vxpose.xlu0.b32.cont [12/16] (narrow) %v4834_v22, 8 }
 0x5e7   : > { %v4803_v48 = vmul.f32 0.2, %v4725_v1  ;;  %vm4771_vm14 = vcmp.ge.f32.partialorder %v4725_v1, 0.0 }
 0x5e8   : > { %v4729_v31 = vpop.f32.mrb[98].mxu1 }
 0x5e9   : > { %v4730_v2 = vadd.f32 %v9507_v27, %v4729_v31  ;;  %v4731_v38 = vpop.f32.mrb[99].mxu1  ;;  %v4835_v23 = vsel %vm4771_vm14, %v4725_v1, %v4803_v48 }
 0x5ea   : > { %4883 = vxpose.xlu0.b32.cont [13/16] (narrow) %v4835_v23, 8 }
 0x5eb   : > { %v4804_v20 = vmul.f32 0.2, %v4730_v2  ;;  %vm4772_vm15 = vcmp.ge.f32.partialorder %v4730_v2, 0.0 }
 0x5ec   : > { %v4734_v60 = vpop.f32.mrb[100].mxu1 }
 0x5ed   : > { %v4836_v6 = vsel %vm4772_vm15, %v4730_v2, %v4804_v20  ;;  %v4735_v16 = vadd.f32 %v9507_v27, %v4734_v60  ;;  %v4736_v40 = vpop.f32.mrb[101].mxu1 }
 0x5ee   : > { %4884 = vxpose.xlu0.b32.cont [14/16] (narrow) %v4836_v6, 8 }
 0x5ef   : > { %v4805_v29 = vmul.f32 0.2, %v4735_v16  ;;  %vm4773_vm3 = vcmp.ge.f32.partialorder %v4735_v16, 0.0 }
 0x5f0   : > { %v4739_v18 = vpop.f32.mrb[102].mxu1 }
 0x5f1   : > { %v4740_v42 = vadd.f32 %v9507_v27, %v4739_v18  ;;  %v4741_v45 = vpop.f32.mrb[103].mxu1  ;;  %v4837_v54 = vsel %vm4773_vm3, %v4735_v16, %v4805_v29 }
 0x5f2   : > { %4885 = vxpose.xlu0.b32.cont [15/16] (narrow) %v4837_v54, 8 }
 0x5f3   : > { %v4806_v61 = vmul.f32 0.2, %v4740_v42  ;;  %vm4774_vm4 = vcmp.ge.f32.partialorder %v4740_v42, 0.0 }
 0x5f5   : > { %v4838_v8 = vsel %vm4774_vm4, %v4740_v42, %v4806_v61 }
 0x5f6   : > { %4886 = vxpose.xlu0.b32.end [16/16] (narrow) %v4838_v8, 8 }
 0x5fa   : > { %v4855_v53 = vpop.trf.xlu1 }
 0x5fb   : > { %4903 = vst [vmem:[%s514_s20] sm:$0xff] %v4855_v53 }
 0x63a   : > { %v4887_v58 = vpop.trf.xlu0 }
 0x63b   : > { %4904 = vst [vmem:[%s514_s20 + $0x8] sm:$0xff] %v4887_v58 }
 0x63c PF: > { %s25_s16 = sadd.s32 1, %s6795_s16  }
 0x63d   : > { %p22_p4 = scmp.ge.s32.totalorder %s25_s16, 4  }
 0x63f   :  { %24 = sbr.rel (!%p22_p4) target bundleno = 1 (0x1), region = 126 }

</bundles_post_ra>
